<compile_context>
chip_gen: v5e
topology: v5e:2x2
jax: 0.10.0
libtpu: 0.0.40
codegen_flags: <defaults>
</compile_context>

<pallas_src>
import functools
import math

import jax
import jax.numpy as jnp
from jax import lax
from jax.experimental import pallas as pl
from jax.experimental.pallas import tpu as pltpu


def _pick_tile_m(m, max_tile=512, min_steps=4):
    """Largest row tile <= max_tile dividing m that yields >= min_steps grid steps
    (>=2 steps per v7x TensorCore / good double-buffering on v5e/v6e)."""
    fallback = None
    for t in (1024, 512, 256, 128, 64, 32, 16, 8):
        if t <= max_tile and m % t == 0:
            if m // t >= min_steps:
                return t
            if fallback is None:
                fallback = t
    return fallback if fallback is not None else m


def _pick_tile_h(h, b, min_steps=4):
    """Largest row-tile height dividing h with at least min_steps (b * h/t) grid steps."""
    for t in (64, 32, 16, 8, 4, 2, 1):
        if h % t == 0 and b * (h // t) >= min_steps:
            return t
    return h


# ------------------------------------------------------------------------------------
# Kernel 1: training-mode BatchNorm1 folded to per-channel (scale, shift).
#   Per-step: per-sublane (8, C) partial sums (pure VPU adds).  Finalize: one 8->1
#   cross-sublane reduce + rsqrt, under pl.when on the last grid step ("arbitrary" axis).
# ------------------------------------------------------------------------------------
def _bn_stats_kernel(x_ref, g_ref, b_ref, scale_ref, shift_ref, sum_ref, sq_ref,
                     *, inv_n, eps):
    i = pl.program_id(0)

    @pl.when(i == 0)
    def _init():
        sum_ref[...] = jnp.zeros_like(sum_ref)
        sq_ref[...] = jnp.zeros_like(sq_ref)

    x = x_ref[...]                                            # (tm, C) f32
    xr = x.reshape(x.shape[0] // 8, 8, x.shape[1])            # tile-aligned split
    sum_ref[...] += jnp.sum(xr, axis=0)                       # leading-axis sum = VPU adds
    sq_ref[...] += jnp.sum(xr * xr, axis=0)

    @pl.when(i == pl.num_programs(0) - 1)
    def _finalize():
        mean = jnp.sum(sum_ref[...], axis=0, keepdims=True) * inv_n
        ex2 = jnp.sum(sq_ref[...], axis=0, keepdims=True) * inv_n
        var = jnp.maximum(ex2 - mean * mean, 0.0)             # biased batch variance
        scale = g_ref[...] * lax.rsqrt(var + eps)
        scale_ref[...] = scale
        shift_ref[...] = b_ref[...] - mean * scale


def pallas_bn_scale_shift(x2, gamma, beta, eps=1e-5):
    m, c = x2.shape
    tm = _pick_tile_m(m)
    g = gamma.reshape(1, c).astype(jnp.float32)
    b = beta.reshape(1, c).astype(jnp.float32)
    return pl.pallas_call(
        functools.partial(_bn_stats_kernel, inv_n=1.0 / m, eps=eps),
        out_shape=(jax.ShapeDtypeStruct((1, c), jnp.float32),
                   jax.ShapeDtypeStruct((1, c), jnp.float32)),
        grid=(m // tm,),
        in_specs=[pl.BlockSpec((tm, c), lambda i: (i, 0)),
                  pl.BlockSpec((1, c), lambda i: (0, 0)),
                  pl.BlockSpec((1, c), lambda i: (0, 0))],
        out_specs=(pl.BlockSpec((1, c), lambda i: (0, 0)),
                   pl.BlockSpec((1, c), lambda i: (0, 0))),
        scratch_shapes=[pltpu.VMEM((8, c), jnp.float32),
                        pltpu.VMEM((8, c), jnp.float32)],
        compiler_params=pltpu.CompilerParams(dimension_semantics=("arbitrary",)),
    )(x2, g, b)


# ------------------------------------------------------------------------------------
# Kernel 2: fused BN1-affine + ReLU prologue + 1x1 convT (matmul, bf16 MXU, f32 out)
#           + BN2 sum/sumsq accumulation in the epilogue (scale2/shift2 extra outputs).
#           No second HBM pass over h2.
# ------------------------------------------------------------------------------------
def _bn_relu_matmul_stats_kernel(x_ref, s1_ref, t1_ref, w_ref, g2_ref, b2_ref,
                                 h_ref, s2_ref, t2_ref, sum_ref, sq_ref, *, inv_n, eps):
    i = pl.program_id(0)

    @pl.when(i == 0)
    def _init():
        sum_ref[...] = jnp.zeros_like(sum_ref)
        sq_ref[...] = jnp.zeros_like(sq_ref)

    a = jnp.maximum(x_ref[...] * s1_ref[...] + t1_ref[...], 0.0)        # f32 on the VPU
    h = jnp.dot(a.astype(jnp.bfloat16), w_ref[...],                     # bf16 MXU, f32 acc
                preferred_element_type=jnp.float32)
    h_ref[...] = h

    hr = h.reshape(h.shape[0] // 8, 8, h.shape[1])                      # per-sublane partials
    sum_ref[...] += jnp.sum(hr, axis=0)
    sq_ref[...] += jnp.sum(hr * hr, axis=0)

    @pl.when(i == pl.num_programs(0) - 1)
    def _finalize():
        mean = jnp.sum(sum_ref[...], axis=0, keepdims=True) * inv_n
        ex2 = jnp.sum(sq_ref[...], axis=0, keepdims=True) * inv_n
        var = jnp.maximum(ex2 - mean * mean, 0.0)
        scale = g2_ref[...] * lax.rsqrt(var + eps)
        s2_ref[...] = scale
        t2_ref[...] = b2_ref[...] - mean * scale


def pallas_bn_relu_matmul_stats(x2, s1, t1, w1_bf16, bn2_g, bn2_b, eps=1e-5):
    m, cin = x2.shape
    c2 = w1_bf16.shape[1]
    tm = _pick_tile_m(m)
    g2 = bn2_g.reshape(1, c2).astype(jnp.float32)
    b2 = bn2_b.reshape(1, c2).astype(jnp.float32)
    return pl.pallas_call(
        functools.partial(_bn_relu_matmul_stats_kernel, inv_n=1.0 / m, eps=eps),
        out_shape=(jax.ShapeDtypeStruct((m, c2), jnp.float32),
                   jax.ShapeDtypeStruct((1, c2), jnp.float32),
                   jax.ShapeDtypeStruct((1, c2), jnp.float32)),
        grid=(m // tm,),
        in_specs=[
            pl.BlockSpec((tm, cin), lambda i: (i, 0)),
            pl.BlockSpec((1, cin), lambda i: (0, 0)),
            pl.BlockSpec((1, cin), lambda i: (0, 0)),
            pl.BlockSpec((cin, c2), lambda i: (0, 0)),
            pl.BlockSpec((1, c2), lambda i: (0, 0)),
            pl.BlockSpec((1, c2), lambda i: (0, 0)),
        ],
        out_specs=(pl.BlockSpec((tm, c2), lambda i: (i, 0)),
                   pl.BlockSpec((1, c2), lambda i: (0, 0)),
                   pl.BlockSpec((1, c2), lambda i: (0, 0))),
        scratch_shapes=[pltpu.VMEM((8, c2), jnp.float32),
                        pltpu.VMEM((8, c2), jnp.float32)],
        compiler_params=pltpu.CompilerParams(dimension_semantics=("arbitrary",)),
    )(x2, s1, t1, w1_bf16, g2, b2)


# ------------------------------------------------------------------------------------
# Kernel 3: fused BN2-affine + ReLU + 3x3 convT, gridded over (batch, row tiles).
#   Activation is hoisted (once per tile) into a bf16 VMEM scratch; the halo ring is
#   zeroed in-kernel post-activation; 9 shifted-window bf16 MXU matmuls accumulate
#   into an f32 VMEM scratch accumulator bounded by the row tile.
# ------------------------------------------------------------------------------------
def _bn_relu_conv3x3_kernel(hp_ref, s_ref, t_ref, w_ref, o_ref, a_ref, acc_ref,
                            *, tile_h, W):
    r = pl.program_id(1)
    C = a_ref.shape[-1]
    G = o_ref.shape[-1]

    # ---- hoisted prologue: BN2 affine + ReLU + bf16 cast, ONCE per tile (not 9x per tap) ----
    row0 = pl.multiple_of(r * tile_h, tile_h)
    slab = hp_ref[0, pl.ds(row0, tile_h + 2), :, :]            # (tile_h+2, W+2, C) f32
    a_ref[...] = jnp.maximum(slab * s_ref[...] + t_ref[...], 0.0).astype(jnp.bfloat16)

    # conv2(padding=1) zero-pads the *activated* tensor, so the halo ring must be exactly
    # zero after the affine+relu (0*scale+shift would otherwise leak relu(shift)).
    zcol = jnp.zeros((tile_h + 2, 1, C), jnp.bfloat16)
    a_ref[:, 0:1, :] = zcol
    a_ref[:, W + 1:W + 2, :] = zcol

    @pl.when(r == 0)
    def _top():                                                # global top halo row
        a_ref[0:1, :, :] = jnp.zeros((1, W + 2, C), jnp.bfloat16)

    @pl.when(r == pl.num_programs(1) - 1)
    def _bottom():                                             # global bottom halo row
        a_ref[tile_h + 1:tile_h + 2, :, :] = jnp.zeros((1, W + 2, C), jnp.bfloat16)

    # ---- 9 shifted-window MXU matmuls, f32 accumulation in VMEM scratch ----
    acc_ref[...] = jnp.zeros_like(acc_ref)
    for k in range(9):
        dy, dx = divmod(k, 3)
        win = a_ref[dy:dy + tile_h, dx:dx + W, :]              # bf16 window from VMEM scratch
        acc_ref[...] += jnp.dot(win.reshape(tile_h * W, C), w_ref[k],
                                preferred_element_type=jnp.float32)
    o_ref[0] = acc_ref[...].reshape(tile_h, W, G)


def pallas_bn_relu_conv3x3(hp, scale2, shift2, w_taps_bf16, growth, tile_h):
    b, hp2, wp2, c = hp.shape
    h, w = hp2 - 2, wp2 - 2
    n_row_tiles = h // tile_h
    return pl.pallas_call(
        functools.partial(_bn_relu_conv3x3_kernel, tile_h=tile_h, W=w),
        out_shape=jax.ShapeDtypeStruct((b, h, w, growth), jnp.float32),
        grid=(b, n_row_tiles),
        in_specs=[
            # whole padded image stays resident across the row-tile axis (block idx only
            # changes with b); each step slices its (tile_h+2)-row slab with pl.ds.
            pl.BlockSpec((1, hp2, wp2, c), lambda bi, ri: (bi, 0, 0, 0)),
            pl.BlockSpec((1, c), lambda bi, ri: (0, 0)),
            pl.BlockSpec((1, c), lambda bi, ri: (0, 0)),
            pl.BlockSpec((9, c, growth), lambda bi, ri: (0, 0, 0)),
        ],
        out_specs=pl.BlockSpec((1, tile_h, w, growth), lambda bi, ri: (bi, ri, 0, 0)),
        scratch_shapes=[pltpu.VMEM((tile_h + 2, wp2, c), jnp.bfloat16),   # activated slab
                        pltpu.VMEM((tile_h * w, growth), jnp.float32)],   # f32 accumulator
        compiler_params=pltpu.CompilerParams(
            dimension_semantics=("parallel", "parallel")),
    )(hp, scale2, shift2, w_taps_bf16)


# ------------------------------------------------------------------------------------
# GenBottleneck forward (NCHW in, NCHW out) — 3 pallas_calls total.
# ------------------------------------------------------------------------------------
def gen_bottleneck_forward(x_nchw, params, eps=1e-5):
    x = jnp.transpose(x_nchw, (0, 2, 3, 1)).astype(jnp.float32)   # NHWC
    B, H, W, Cin = x.shape
    C2 = params["w2_taps"].shape[1]                               # interChannels
    G = params["w2_taps"].shape[2]                                # growthRate
    x2 = x.reshape(B * H * W, Cin)

    # BN1 (batch stats) -> per-channel scale/shift
    s1, t1 = pallas_bn_scale_shift(x2, params["bn1_g"], params["bn1_b"], eps)

    # Fused BN1+ReLU+1x1 convT, with BN2 statistics folded into the epilogue.
    h2, s2, t2 = pallas_bn_relu_matmul_stats(
        x2, s1, t1, params["w1_mat"], params["bn2_g"], params["bn2_b"], eps)

    # Fused BN2+ReLU + 3x3 convT (ConvTranspose2d(k=3,p=1,s=1) == Conv2d(flip+swap w, pad=1)).
    hp = jnp.pad(h2.reshape(B, H, W, C2), ((0, 0), (1, 1), (1, 1), (0, 0)))
    tile_h = _pick_tile_h(H, B)
    new = pallas_bn_relu_conv3x3(hp, s2, t2, params["w2_taps"], G, tile_h)

    out = jnp.concatenate([x, new], axis=-1)                      # DenseNet concat
    return jnp.transpose(out, (0, 3, 1, 2))                       # back to NCHW


# ------------------------------------------------------------------------------------
# Parameters (raw ConvTranspose/BN params + Pallas-side prepped bf16 weights, UNPADDED)
# ------------------------------------------------------------------------------------
def build_params(key, n_channels, growth):
    inter = 4 * growth
    k1, k2, k3, k4, k5, k6 = jax.random.split(key, 6)

    w1_t = jax.random.normal(k1, (n_channels, inter, 1, 1), jnp.float32) * math.sqrt(2.0 / n_channels)
    w2_t = jax.random.normal(k2, (inter, growth, 3, 3), jnp.float32) * math.sqrt(2.0 / (9 * inter))
    bn1_g = 1.0 + 0.1 * jax.random.normal(k3, (n_channels,), jnp.float32)
    bn1_b = 0.1 * jax.random.normal(k4, (n_channels,), jnp.float32)
    bn2_g = 1.0 + 0.1 * jax.random.normal(k5, (inter,), jnp.float32)
    bn2_b = 0.1 * jax.random.normal(k6, (inter,), jnp.float32)

    # 1x1 ConvTranspose == matmul with W[ci, co] = w_t[ci, co, 0, 0].  No 128-lane padding:
    # inter/growth << 128, so padding would inflate HBM traffic and MXU K/N work 8-32x.
    w1_mat = w1_t[:, :, 0, 0].astype(jnp.bfloat16)

    # 3x3 ConvTranspose(k=3, p=1, s=1) == Conv2d with w'[ky,kx,ci,co] = w_t[ci,co,2-ky,2-kx], pad=1.
    w_hwio = jnp.flip(w2_t, axis=(2, 3)).transpose(2, 3, 0, 1)     # (3, 3, inter, growth)
    w2_taps = w_hwio.reshape(9, inter, growth).astype(jnp.bfloat16)

    return {"w1_t": w1_t, "w2_t": w2_t,
            "bn1_g": bn1_g, "bn1_b": bn1_b, "bn2_g": bn2_g, "bn2_b": bn2_b,
            "w1_mat": w1_mat, "w2_taps": w2_taps}


# ------------------------------------------------------------------------------------
# Pure-JAX (non-Pallas) reference of GenBottleneck.forward for validation.
# ------------------------------------------------------------------------------------
def reference_forward(x_nchw, params, eps=1e-5):
    x = x_nchw.astype(jnp.float32)

    def bn_relu(v, g, b):
        mean = jnp.mean(v, axis=(0, 2, 3), keepdims=True)
        var = jnp.mean(jnp.square(v - mean), axis=(0, 2, 3), keepdims=True)
        vhat = (v - mean) * lax.rsqrt(var + eps)
        return jnp.maximum(vhat * g.reshape(1, -1, 1, 1) + b.reshape(1, -1, 1, 1), 0.0)

    h = bn_relu(x, params["bn1_g"], params["bn1_b"])
    w1 = params["w1_t"][:, :, 0, 0]                                # (Cin, inter)
    h = jnp.einsum('nchw,cd->ndhw', h, w1)                         # ConvTranspose2d k=1
    h = bn_relu(h, params["bn2_g"], params["bn2_b"])
    w2 = jnp.flip(params["w2_t"], axis=(2, 3)).transpose(1, 0, 2, 3)   # (growth, inter, 3, 3)
    y = lax.conv_general_dilated(h, w2, (1, 1), ((1, 1), (1, 1)),
                                 dimension_numbers=('NCHW', 'OIHW', 'NCHW'))
    return jnp.concatenate([x, y], axis=1)


# ------------------------------------------------------------------------------------
if __name__ == "__main__":
    N_CHANNELS, GROWTH = 16, 4       # interChannels = 16
    B, H, W = 2, 16, 16

    key = jax.random.PRNGKey(0)
    pkey, xkey = jax.random.split(key)
    params = build_params(pkey, N_CHANNELS, GROWTH)
    x = jax.random.normal(xkey, (B, N_CHANNELS, H, W), jnp.float32)

    fwd = jax.jit(gen_bottleneck_forward)
    out = jax.block_until_ready(fwd(x, params))

    assert out.shape == (B, N_CHANNELS + GROWTH, H, W), out.shape
    assert bool(jnp.all(jnp.isfinite(out)))

    ref = reference_forward(x, params)
    max_err = float(jnp.max(jnp.abs(out - ref)))
    assert bool(jnp.allclose(out, ref, atol=0.1, rtol=0.1)), max_err

    print("KERNEL_OK")
</pallas_src>

<mosaic_0001>
module attributes {stable_mosaic.version = 11 : i64} {
  func.func @_bn_stats_kernel(%arg0: i32, %arg1: memref<128x16xf32, #tpu.memory_space<vmem>>, %arg2: memref<1x16xf32, #tpu.memory_space<vmem>>, %arg3: memref<1x16xf32, #tpu.memory_space<vmem>>, %arg4: memref<1x16xf32, #tpu.memory_space<vmem>>, %arg5: memref<1x16xf32, #tpu.memory_space<vmem>>, %arg6: memref<8x16xf32, #tpu.memory_space<vmem>>, %arg7: memref<8x16xf32, #tpu.memory_space<vmem>>) attributes {dimension_semantics = [#tpu.dimension_semantics<arbitrary>], iteration_bounds = array<i64: 4>, scalar_prefetch = 0 : i64, scratch_operands = 2 : i64, tpu.core_type = #tpu.core_type<tc>, window_params = [{transform_indices = @transform_0, window_bounds = array<i64: 128, 16>}, {pipeline_mode = #tpu.pipeline_mode<synchronous>, transform_indices = @transform_1, window_bounds = array<i64: 1, 16>}, {pipeline_mode = #tpu.pipeline_mode<synchronous>, transform_indices = @transform_2, window_bounds = array<i64: 1, 16>}, {pipeline_mode = #tpu.pipeline_mode<synchronous>, transform_indices = @transform_3, window_bounds = array<i64: 1, 16>}, {pipeline_mode = #tpu.pipeline_mode<synchronous>, transform_indices = @transform_4, window_bounds = array<i64: 1, 16>}]} {
    %c0_i32 = arith.constant 0 : i32
    %0 = arith.cmpi eq, %arg0, %c0_i32 : i32
    %1 = arith.extui %0 : i1 to i32
    %c0_i32_0 = arith.constant 0 : i32
    %2 = arith.cmpi ne, %1, %c0_i32_0 : i32
    scf.if %2 {
      %cst_12 = arith.constant 0.000000e+00 : f32
      %17 = vector.broadcast %cst_12 : f32 to vector<8x16xf32>
      %c0_13 = arith.constant 0 : index
      %c0_14 = arith.constant 0 : index
      %18 = vector.load %arg6[%c0_13, %c0_14] : memref<8x16xf32, #tpu.memory_space<vmem>>, vector<8x16xf32>
      tpu.vector_store %arg6[%c0_13, %c0_14], %17 {strides = array<i32>} : memref<8x16xf32, #tpu.memory_space<vmem>>, vector<8x16xf32>,
      %cst_15 = arith.constant 0.000000e+00 : f32
      %19 = vector.broadcast %cst_15 : f32 to vector<8x16xf32>
      %c0_16 = arith.constant 0 : index
      %c0_17 = arith.constant 0 : index
      %20 = vector.load %arg7[%c0_16, %c0_17] : memref<8x16xf32, #tpu.memory_space<vmem>>, vector<8x16xf32>
      tpu.vector_store %arg7[%c0_16, %c0_17], %19 {strides = array<i32>} : memref<8x16xf32, #tpu.memory_space<vmem>>, vector<8x16xf32>,
    } else {
    }
    %c0 = arith.constant 0 : index
    %c0_1 = arith.constant 0 : index
    %3 = vector.load %arg1[%c0, %c0_1] : memref<128x16xf32, #tpu.memory_space<vmem>>, vector<128x16xf32>
    %4 = vector.shape_cast %3 : vector<128x16xf32> to vector<16x8x16xf32>
    %c0_2 = arith.constant 0 : index
    %c0_3 = arith.constant 0 : index
    %5 = vector.load %arg6[%c0_2, %c0_3] : memref<8x16xf32, #tpu.memory_space<vmem>>, vector<8x16xf32>
    %cst = arith.constant dense<0.000000e+00> : vector<8x16xf32>
    %6 = vector.multi_reduction <add>, %4, %cst [0] : vector<16x8x16xf32> to vector<8x16xf32>
    %7 = arith.addf %5, %6 : vector<8x16xf32>
    %c0_4 = arith.constant 0 : index
    %c0_5 = arith.constant 0 : index
    %8 = vector.load %arg6[%c0_4, %c0_5] : memref<8x16xf32, #tpu.memory_space<vmem>>, vector<8x16xf32>
    tpu.vector_store %arg6[%c0_4, %c0_5], %7 {strides = array<i32>} : memref<8x16xf32, #tpu.memory_space<vmem>>, vector<8x16xf32>,
    %c0_6 = arith.constant 0 : index
    %c0_7 = arith.constant 0 : index
    %9 = vector.load %arg7[%c0_6, %c0_7] : memref<8x16xf32, #tpu.memory_space<vmem>>, vector<8x16xf32>
    %10 = arith.mulf %4, %4 : vector<16x8x16xf32>
    %cst_8 = arith.constant dense<0.000000e+00> : vector<8x16xf32>
    %11 = vector.multi_reduction <add>, %10, %cst_8 [0] : vector<16x8x16xf32> to vector<8x16xf32>
    %12 = arith.addf %9, %11 : vector<8x16xf32>
    %c0_9 = arith.constant 0 : index
    %c0_10 = arith.constant 0 : index
    %13 = vector.load %arg7[%c0_9, %c0_10] : memref<8x16xf32, #tpu.memory_space<vmem>>, vector<8x16xf32>
    tpu.vector_store %arg7[%c0_9, %c0_10], %12 {strides = array<i32>} : memref<8x16xf32, #tpu.memory_space<vmem>>, vector<8x16xf32>,
    %c3_i32 = arith.constant 3 : i32
    %14 = arith.cmpi eq, %arg0, %c3_i32 : i32
    %15 = arith.extui %14 : i1 to i32
    %c0_i32_11 = arith.constant 0 : i32
    %16 = arith.cmpi ne, %15, %c0_i32_11 : i32
    scf.if %16 {
      %c0_12 = arith.constant 0 : index
      %c0_13 = arith.constant 0 : index
      %17 = vector.load %arg6[%c0_12, %c0_13] : memref<8x16xf32, #tpu.memory_space<vmem>>, vector<8x16xf32>
      %cst_14 = arith.constant dense<0.000000e+00> : vector<16xf32>
      %18 = vector.multi_reduction <add>, %17, %cst_14 [0] : vector<8x16xf32> to vector<16xf32>
      %19 = vector.shape_cast %18 : vector<16xf32> to vector<1x16xf32>
      %cst_15 = arith.constant 0.001953125 : f32
      %20 = vector.broadcast %cst_15 : f32 to vector<1x16xf32>
      %21 = arith.mulf %19, %20 : vector<1x16xf32>
      %c0_16 = arith.constant 0 : index
      %c0_17 = arith.constant 0 : index
      %22 = vector.load %arg7[%c0_16, %c0_17] : memref<8x16xf32, #tpu.memory_space<vmem>>, vector<8x16xf32>
      %cst_18 = arith.constant dense<0.000000e+00> : vector<16xf32>
      %23 = vector.multi_reduction <add>, %22, %cst_18 [0] : vector<8x16xf32> to vector<16xf32>
      %24 = vector.shape_cast %23 : vector<16xf32> to vector<1x16xf32>
      %cst_19 = arith.constant 0.001953125 : f32
      %25 = vector.broadcast %cst_19 : f32 to vector<1x16xf32>
      %26 = arith.mulf %24, %25 : vector<1x16xf32>
      %27 = arith.mulf %21, %21 : vector<1x16xf32>
      %28 = arith.subf %26, %27 : vector<1x16xf32>
      %cst_20 = arith.constant 0.000000e+00 : f32
      %29 = vector.broadcast %cst_20 : f32 to vector<1x16xf32>
      %30 = arith.maximumf %28, %29 : vector<1x16xf32>
      %c0_21 = arith.constant 0 : index
      %c0_22 = arith.constant 0 : index
      %31 = vector.load %arg2[%c0_21, %c0_22] : memref<1x16xf32, #tpu.memory_space<vmem>>, vector<1x16xf32>
      %cst_23 = arith.constant 9.99999974E-6 : f32
      %32 = vector.broadcast %cst_23 : f32 to vector<1x16xf32>
      %33 = arith.addf %30, %32 : vector<1x16xf32>
      %34 = math.rsqrt %33 : vector<1x16xf32>
      %35 = arith.mulf %31, %34 : vector<1x16xf32>
      %c0_24 = arith.constant 0 : index
      %c0_25 = arith.constant 0 : index
      %36 = vector.load %arg4[%c0_24, %c0_25] : memref<1x16xf32, #tpu.memory_space<vmem>>, vector<1x16xf32>
      tpu.vector_store %arg4[%c0_24, %c0_25], %35 {strides = array<i32>} : memref<1x16xf32, #tpu.memory_space<vmem>>, vector<1x16xf32>,
      %c0_26 = arith.constant 0 : index
      %c0_27 = arith.constant 0 : index
      %37 = vector.load %arg3[%c0_26, %c0_27] : memref<1x16xf32, #tpu.memory_space<vmem>>, vector<1x16xf32>
      %38 = arith.mulf %21, %35 : vector<1x16xf32>
      %39 = arith.subf %37, %38 : vector<1x16xf32>
      %c0_28 = arith.constant 0 : index
      %c0_29 = arith.constant 0 : index
      %40 = vector.load %arg5[%c0_28, %c0_29] : memref<1x16xf32, #tpu.memory_space<vmem>>, vector<1x16xf32>
      tpu.vector_store %arg5[%c0_28, %c0_29], %39 {strides = array<i32>} : memref<1x16xf32, #tpu.memory_space<vmem>>, vector<1x16xf32>,
    } else {
    }
    return
  }
  func.func @transform_0(%arg0: i32) -> (i32, i32) {
    %c0_i32 = arith.constant 0 : i32
    %c0_i32_0 = arith.constant 0 : i32
    return %arg0, %c0_i32 : i32, i32
  }
  func.func @transform_1(%arg0: i32) -> (i32, i32) {
    %c0_i32 = arith.constant 0 : i32
    %c0_i32_0 = arith.constant 0 : i32
    %c0_i32_1 = arith.constant 0 : i32
    return %c0_i32, %c0_i32_0 : i32, i32
  }
  func.func @transform_2(%arg0: i32) -> (i32, i32) {
    %c0_i32 = arith.constant 0 : i32
    %c0_i32_0 = arith.constant 0 : i32
    %c0_i32_1 = arith.constant 0 : i32
    return %c0_i32, %c0_i32_0 : i32, i32
  }
  func.func @transform_3(%arg0: i32) -> (i32, i32) {
    %c0_i32 = arith.constant 0 : i32
    %c0_i32_0 = arith.constant 0 : i32
    %c0_i32_1 = arith.constant 0 : i32
    return %c0_i32, %c0_i32_0 : i32, i32
  }
  func.func @transform_4(%arg0: i32) -> (i32, i32) {
    %c0_i32 = arith.constant 0 : i32
    %c0_i32_0 = arith.constant 0 : i32
    %c0_i32_1 = arith.constant 0 : i32
    return %c0_i32, %c0_i32_0 : i32, i32
  }
}

module attributes {stable_mosaic.version = 11 : i64} {
  func.func @_bn_relu_matmul_stats_kernel(%arg0: i32, %arg1: memref<128x16xf32, #tpu.memory_space<vmem>>, %arg2: memref<1x16xf32, #tpu.memory_space<vmem>>, %arg3: memref<1x16xf32, #tpu.memory_space<vmem>>, %arg4: memref<16x16xbf16, #tpu.memory_space<vmem>>, %arg5: memref<1x16xf32, #tpu.memory_space<vmem>>, %arg6: memref<1x16xf32, #tpu.memory_space<vmem>>, %arg7: memref<128x16xf32, #tpu.memory_space<vmem>>, %arg8: memref<1x16xf32, #tpu.memory_space<vmem>>, %arg9: memref<1x16xf32, #tpu.memory_space<vmem>>, %arg10: memref<8x16xf32, #tpu.memory_space<vmem>>, %arg11: memref<8x16xf32, #tpu.memory_space<vmem>>) attributes {dimension_semantics = [#tpu.dimension_semantics<arbitrary>], iteration_bounds = array<i64: 4>, scalar_prefetch = 0 : i64, scratch_operands = 2 : i64, tpu.core_type = #tpu.core_type<tc>, window_params = [{transform_indices = @transform_0, window_bounds = array<i64: 128, 16>}, {pipeline_mode = #tpu.pipeline_mode<synchronous>, transform_indices = @transform_1, window_bounds = array<i64: 1, 16>}, {pipeline_mode = #tpu.pipeline_mode<synchronous>, transform_indices = @transform_2, window_bounds = array<i64: 1, 16>}, {pipeline_mode = #tpu.pipeline_mode<synchronous>, transform_indices = @transform_3, window_bounds = array<i64: 16, 16>}, {pipeline_mode = #tpu.pipeline_mode<synchronous>, transform_indices = @transform_4, window_bounds = array<i64: 1, 16>}, {pipeline_mode = #tpu.pipeline_mode<synchronous>, transform_indices = @transform_5, window_bounds = array<i64: 1, 16>}, {transform_indices = @transform_6, window_bounds = array<i64: 128, 16>}, {pipeline_mode = #tpu.pipeline_mode<synchronous>, transform_indices = @transform_7, window_bounds = array<i64: 1, 16>}, {pipeline_mode = #tpu.pipeline_mode<synchronous>, transform_indices = @transform_8, window_bounds = array<i64: 1, 16>}]} {
    %c0_i32 = arith.constant 0 : i32
    %0 = arith.cmpi eq, %arg0, %c0_i32 : i32
    %1 = arith.extui %0 : i1 to i32
    %c0_i32_0 = arith.constant 0 : i32
    %2 = arith.cmpi ne, %1, %c0_i32_0 : i32
    scf.if %2 {
      %cst_22 = arith.constant 0.000000e+00 : f32
      %29 = vector.broadcast %cst_22 : f32 to vector<8x16xf32>
      %c0_23 = arith.constant 0 : index
      %c0_24 = arith.constant 0 : index
      %30 = vector.load %arg10[%c0_23, %c0_24] : memref<8x16xf32, #tpu.memory_space<vmem>>, vector<8x16xf32>
      tpu.vector_store %arg10[%c0_23, %c0_24], %29 {strides = array<i32>} : memref<8x16xf32, #tpu.memory_space<vmem>>, vector<8x16xf32>,
      %cst_25 = arith.constant 0.000000e+00 : f32
      %31 = vector.broadcast %cst_25 : f32 to vector<8x16xf32>
      %c0_26 = arith.constant 0 : index
      %c0_27 = arith.constant 0 : index
      %32 = vector.load %arg11[%c0_26, %c0_27] : memref<8x16xf32, #tpu.memory_space<vmem>>, vector<8x16xf32>
      tpu.vector_store %arg11[%c0_26, %c0_27], %31 {strides = array<i32>} : memref<8x16xf32, #tpu.memory_space<vmem>>, vector<8x16xf32>,
    } else {
    }
    %c0 = arith.constant 0 : index
    %c0_1 = arith.constant 0 : index
    %3 = vector.load %arg1[%c0, %c0_1] : memref<128x16xf32, #tpu.memory_space<vmem>>, vector<128x16xf32>
    %c0_2 = arith.constant 0 : index
    %c0_3 = arith.constant 0 : index
    %4 = vector.load %arg2[%c0_2, %c0_3] : memref<1x16xf32, #tpu.memory_space<vmem>>, vector<1x16xf32>
    %5 = vector.broadcast %4 : vector<1x16xf32> to vector<128x16xf32>
    %6 = arith.mulf %3, %5 : vector<128x16xf32>
    %c0_4 = arith.constant 0 : index
    %c0_5 = arith.constant 0 : index
    %7 = vector.load %arg3[%c0_4, %c0_5] : memref<1x16xf32, #tpu.memory_space<vmem>>, vector<1x16xf32>
    %8 = vector.broadcast %7 : vector<1x16xf32> to vector<128x16xf32>
    %9 = arith.addf %6, %8 : vector<128x16xf32>
    %cst = arith.constant 0.000000e+00 : f32
    %10 = vector.broadcast %cst : f32 to vector<128x16xf32>
    %11 = arith.maximumf %9, %10 : vector<128x16xf32>
    %12 = arith.truncf %11 : vector<128x16xf32> to vector<128x16xbf16>
    %c0_6 = arith.constant 0 : index
    %c0_7 = arith.constant 0 : index
    %13 = vector.load %arg4[%c0_6, %c0_7] : memref<16x16xbf16, #tpu.memory_space<vmem>>, vector<16x16xbf16>
    %cst_8 = arith.constant dense<0.000000e+00> : vector<128x16xf32>
    %14 = tpu.matmul %12, %13, %cst_8 {dimension_numbers = #tpu.dot_dimension_numbers<[1], [0], [0], [1], [0, 0, 1, 1], [], []>} : vector<128x16xbf16>, vector<16x16xbf16>, vector<128x16xf32> -> vector<128x16xf32>
    %c0_9 = arith.constant 0 : index
    %c0_10 = arith.constant 0 : index
    %15 = vector.load %arg7[%c0_9, %c0_10] : memref<128x16xf32, #tpu.memory_space<vmem>>, vector<128x16xf32>
    tpu.vector_store %arg7[%c0_9, %c0_10], %14 {strides = array<i32>} : memref<128x16xf32, #tpu.memory_space<vmem>>, vector<128x16xf32>,
    %16 = vector.shape_cast %14 : vector<128x16xf32> to vector<16x8x16xf32>
    %c0_11 = arith.constant 0 : index
    %c0_12 = arith.constant 0 : index
    %17 = vector.load %arg10[%c0_11, %c0_12] : memref<8x16xf32, #tpu.memory_space<vmem>>, vector<8x16xf32>
    %cst_13 = arith.constant dense<0.000000e+00> : vector<8x16xf32>
    %18 = vector.multi_reduction <add>, %16, %cst_13 [0] : vector<16x8x16xf32> to vector<8x16xf32>
    %19 = arith.addf %17, %18 : vector<8x16xf32>
    %c0_14 = arith.constant 0 : index
    %c0_15 = arith.constant 0 : index
    %20 = vector.load %arg10[%c0_14, %c0_15] : memref<8x16xf32, #tpu.memory_space<vmem>>, vector<8x16xf32>
    tpu.vector_store %arg10[%c0_14, %c0_15], %19 {strides = array<i32>} : memref<8x16xf32, #tpu.memory_space<vmem>>, vector<8x16xf32>,
    %c0_16 = arith.constant 0 : index
    %c0_17 = arith.constant 0 : index
    %21 = vector.load %arg11[%c0_16, %c0_17] : memref<8x16xf32, #tpu.memory_space<vmem>>, vector<8x16xf32>
    %22 = arith.mulf %16, %16 : vector<16x8x16xf32>
    %cst_18 = arith.constant dense<0.000000e+00> : vector<8x16xf32>
    %23 = vector.multi_reduction <add>, %22, %cst_18 [0] : vector<16x8x16xf32> to vector<8x16xf32>
    %24 = arith.addf %21, %23 : vector<8x16xf32>
    %c0_19 = arith.constant 0 : index
    %c0_20 = arith.constant 0 : index
    %25 = vector.load %arg11[%c0_19, %c0_20] : memref<8x16xf32, #tpu.memory_space<vmem>>, vector<8x16xf32>
    tpu.vector_store %arg11[%c0_19, %c0_20], %24 {strides = array<i32>} : memref<8x16xf32, #tpu.memory_space<vmem>>, vector<8x16xf32>,
    %c3_i32 = arith.constant 3 : i32
    %26 = arith.cmpi eq, %arg0, %c3_i32 : i32
    %27 = arith.extui %26 : i1 to i32
    %c0_i32_21 = arith.constant 0 : i32
    %28 = arith.cmpi ne, %27, %c0_i32_21 : i32
    scf.if %28 {
      %c0_22 = arith.constant 0 : index
      %c0_23 = arith.constant 0 : index
      %29 = vector.load %arg10[%c0_22, %c0_23] : memref<8x16xf32, #tpu.memory_space<vmem>>, vector<8x16xf32>
      %cst_24 = arith.constant dense<0.000000e+00> : vector<16xf32>
      %30 = vector.multi_reduction <add>, %29, %cst_24 [0] : vector<8x16xf32> to vector<16xf32>
      %31 = vector.shape_cast %30 : vector<16xf32> to vector<1x16xf32>
      %cst_25 = arith.constant 0.001953125 : f32
      %32 = vector.broadcast %cst_25 : f32 to vector<1x16xf32>
      %33 = arith.mulf %31, %32 : vector<1x16xf32>
      %c0_26 = arith.constant 0 : index
      %c0_27 = arith.constant 0 : index
      %34 = vector.load %arg11[%c0_26, %c0_27] : memref<8x16xf32, #tpu.memory_space<vmem>>, vector<8x16xf32>
      %cst_28 = arith.constant dense<0.000000e+00> : vector<16xf32>
      %35 = vector.multi_reduction <add>, %34, %cst_28 [0] : vector<8x16xf32> to vector<16xf32>
      %36 = vector.shape_cast %35 : vector<16xf32> to vector<1x16xf32>
      %cst_29 = arith.constant 0.001953125 : f32
      %37 = vector.broadcast %cst_29 : f32 to vector<1x16xf32>
      %38 = arith.mulf %36, %37 : vector<1x16xf32>
      %39 = arith.mulf %33, %33 : vector<1x16xf32>
      %40 = arith.subf %38, %39 : vector<1x16xf32>
      %cst_30 = arith.constant 0.000000e+00 : f32
      %41 = vector.broadcast %cst_30 : f32 to vector<1x16xf32>
      %42 = arith.maximumf %40, %41 : vector<1x16xf32>
      %c0_31 = arith.constant 0 : index
      %c0_32 = arith.constant 0 : index
      %43 = vector.load %arg5[%c0_31, %c0_32] : memref<1x16xf32, #tpu.memory_space<vmem>>, vector<1x16xf32>
      %cst_33 = arith.constant 9.99999974E-6 : f32
      %44 = vector.broadcast %cst_33 : f32 to vector<1x16xf32>
      %45 = arith.addf %42, %44 : vector<1x16xf32>
      %46 = math.rsqrt %45 : vector<1x16xf32>
      %47 = arith.mulf %43, %46 : vector<1x16xf32>
      %c0_34 = arith.constant 0 : index
      %c0_35 = arith.constant 0 : index
      %48 = vector.load %arg8[%c0_34, %c0_35] : memref<1x16xf32, #tpu.memory_space<vmem>>, vector<1x16xf32>
      tpu.vector_store %arg8[%c0_34, %c0_35], %47 {strides = array<i32>} : memref<1x16xf32, #tpu.memory_space<vmem>>, vector<1x16xf32>,
      %c0_36 = arith.constant 0 : index
      %c0_37 = arith.constant 0 : index
      %49 = vector.load %arg6[%c0_36, %c0_37] : memref<1x16xf32, #tpu.memory_space<vmem>>, vector<1x16xf32>
      %50 = arith.mulf %33, %47 : vector<1x16xf32>
      %51 = arith.subf %49, %50 : vector<1x16xf32>
      %c0_38 = arith.constant 0 : index
      %c0_39 = arith.constant 0 : index
      %52 = vector.load %arg9[%c0_38, %c0_39] : memref<1x16xf32, #tpu.memory_space<vmem>>, vector<1x16xf32>
      tpu.vector_store %arg9[%c0_38, %c0_39], %51 {strides = array<i32>} : memref<1x16xf32, #tpu.memory_space<vmem>>, vector<1x16xf32>,
    } else {
    }
    return
  }
  func.func @transform_0(%arg0: i32) -> (i32, i32) {
    %c0_i32 = arith.constant 0 : i32
    %c0_i32_0 = arith.constant 0 : i32
    return %arg0, %c0_i32 : i32, i32
  }
  func.func @transform_1(%arg0: i32) -> (i32, i32) {
    %c0_i32 = arith.constant 0 : i32
    %c0_i32_0 = arith.constant 0 : i32
    %c0_i32_1 = arith.constant 0 : i32
    return %c0_i32, %c0_i32_0 : i32, i32
  }
  func.func @transform_2(%arg0: i32) -> (i32, i32) {
    %c0_i32 = arith.constant 0 : i32
    %c0_i32_0 = arith.constant 0 : i32
    %c0_i32_1 = arith.constant 0 : i32
    return %c0_i32, %c0_i32_0 : i32, i32
  }
  func.func @transform_3(%arg0: i32) -> (i32, i32) {
    %c0_i32 = arith.constant 0 : i32
    %c0_i32_0 = arith.constant 0 : i32
    %c0_i32_1 = arith.constant 0 : i32
    return %c0_i32, %c0_i32_0 : i32, i32
  }
  func.func @transform_4(%arg0: i32) -> (i32, i32) {
    %c0_i32 = arith.constant 0 : i32
    %c0_i32_0 = arith.constant 0 : i32
    %c0_i32_1 = arith.constant 0 : i32
    return %c0_i32, %c0_i32_0 : i32, i32
  }
  func.func @transform_5(%arg0: i32) -> (i32, i32) {
    %c0_i32 = arith.constant 0 : i32
    %c0_i32_0 = arith.constant 0 : i32
    %c0_i32_1 = arith.constant 0 : i32
    return %c0_i32, %c0_i32_0 : i32, i32
  }
  func.func @transform_6(%arg0: i32) -> (i32, i32) {
    %c0_i32 = arith.constant 0 : i32
    %c0_i32_0 = arith.constant 0 : i32
    return %arg0, %c0_i32 : i32, i32
  }
  func.func @transform_7(%arg0: i32) -> (i32, i32) {
    %c0_i32 = arith.constant 0 : i32
    %c0_i32_0 = arith.constant 0 : i32
    %c0_i32_1 = arith.constant 0 : i32
    return %c0_i32, %c0_i32_0 : i32, i32
  }
  func.func @transform_8(%arg0: i32) -> (i32, i32) {
    %c0_i32 = arith.constant 0 : i32
    %c0_i32_0 = arith.constant 0 : i32
    %c0_i32_1 = arith.constant 0 : i32
    return %c0_i32, %c0_i32_0 : i32, i32
  }
}

module attributes {stable_mosaic.version = 11 : i64} {
  func.func @_bn_relu_conv3x3_kernel(%arg0: i32, %arg1: i32, %arg2: memref<1x18x18x16xf32, #tpu.memory_space<vmem>>, %arg3: memref<1x16xf32, #tpu.memory_space<vmem>>, %arg4: memref<1x16xf32, #tpu.memory_space<vmem>>, %arg5: memref<9x16x4xbf16, #tpu.memory_space<vmem>>, %arg6: memref<1x8x16x4xf32, #tpu.memory_space<vmem>>, %arg7: memref<10x18x16xbf16, #tpu.memory_space<vmem>>, %arg8: memref<128x4xf32, #tpu.memory_space<vmem>>) attributes {dimension_semantics = [#tpu.dimension_semantics<parallel>, #tpu.dimension_semantics<parallel>], iteration_bounds = array<i64: 2, 2>, scalar_prefetch = 0 : i64, scratch_operands = 2 : i64, tpu.core_type = #tpu.core_type<tc>, window_params = [{transform_indices = @transform_0, window_bounds = array<i64: 1, 18, 18, 16>}, {pipeline_mode = #tpu.pipeline_mode<synchronous>, transform_indices = @transform_1, window_bounds = array<i64: 1, 16>}, {pipeline_mode = #tpu.pipeline_mode<synchronous>, transform_indices = @transform_2, window_bounds = array<i64: 1, 16>}, {pipeline_mode = #tpu.pipeline_mode<synchronous>, transform_indices = @transform_3, window_bounds = array<i64: 9, 16, 4>}, {transform_indices = @transform_4, window_bounds = array<i64: 1, 8, 16, 4>}]} {
    %c8_i32 = arith.constant 8 : i32
    %0 = arith.muli %arg1, %c8_i32 : i32
    %1 = tpu.assume_multiple %0, 8 : i32
    %c0 = arith.constant 0 : index
    %2 = arith.index_cast %1 : i32 to index
    %c0_0 = arith.constant 0 : index
    %c0_1 = arith.constant 0 : index
    %3 = vector.load %arg2[%c0, %2, %c0_0, %c0_1] : memref<1x18x18x16xf32, #tpu.memory_space<vmem>>, vector<1x10x18x16xf32>
    %4 = vector.shape_cast %3 : vector<1x10x18x16xf32> to vector<10x18x16xf32>
    %c0_2 = arith.constant 0 : index
    %c0_3 = arith.constant 0 : index
    %5 = vector.load %arg3[%c0_2, %c0_3] : memref<1x16xf32, #tpu.memory_space<vmem>>, vector<1x16xf32>
    %6 = vector.shape_cast %5 : vector<1x16xf32> to vector<1x1x16xf32>
    %7 = vector.broadcast %6 : vector<1x1x16xf32> to vector<10x18x16xf32>
    %8 = arith.mulf %4, %7 : vector<10x18x16xf32>
    %c0_4 = arith.constant 0 : index
    %c0_5 = arith.constant 0 : index
    %9 = vector.load %arg4[%c0_4, %c0_5] : memref<1x16xf32, #tpu.memory_space<vmem>>, vector<1x16xf32>
    %10 = vector.shape_cast %9 : vector<1x16xf32> to vector<1x1x16xf32>
    %11 = vector.broadcast %10 : vector<1x1x16xf32> to vector<10x18x16xf32>
    %12 = arith.addf %8, %11 : vector<10x18x16xf32>
    %cst = arith.constant 0.000000e+00 : f32
    %13 = vector.broadcast %cst : f32 to vector<10x18x16xf32>
    %14 = arith.maximumf %12, %13 : vector<10x18x16xf32>
    %15 = arith.truncf %14 : vector<10x18x16xf32> to vector<10x18x16xbf16>
    %c0_6 = arith.constant 0 : index
    %c0_7 = arith.constant 0 : index
    %c0_8 = arith.constant 0 : index
    %16 = vector.load %arg7[%c0_6, %c0_7, %c0_8] : memref<10x18x16xbf16, #tpu.memory_space<vmem>>, vector<10x18x16xbf16>
    tpu.vector_store %arg7[%c0_6, %c0_7, %c0_8], %15 {strides = array<i32>} : memref<10x18x16xbf16, #tpu.memory_space<vmem>>, vector<10x18x16xbf16>,
    %cst_9 = arith.constant 0.000000e+00 : bf16
    %17 = vector.broadcast %cst_9 : bf16 to vector<10x1x16xbf16>
    %c0_10 = arith.constant 0 : index
    %c0_11 = arith.constant 0 : index
    %c0_12 = arith.constant 0 : index
    %18 = vector.load %arg7[%c0_10, %c0_11, %c0_12] : memref<10x18x16xbf16, #tpu.memory_space<vmem>>, vector<10x1x16xbf16>
    tpu.vector_store %arg7[%c0_10, %c0_11, %c0_12], %17 {strides = array<i32>} : memref<10x18x16xbf16, #tpu.memory_space<vmem>>, vector<10x1x16xbf16>,
    %c0_13 = arith.constant 0 : index
    %c17 = arith.constant 17 : index
    %c0_14 = arith.constant 0 : index
    %19 = vector.load %arg7[%c0_13, %c17, %c0_14] : memref<10x18x16xbf16, #tpu.memory_space<vmem>>, vector<10x1x16xbf16>
    tpu.vector_store %arg7[%c0_13, %c17, %c0_14], %17 {strides = array<i32>} : memref<10x18x16xbf16, #tpu.memory_space<vmem>>, vector<10x1x16xbf16>,
    %c0_i32 = arith.constant 0 : i32
    %20 = arith.cmpi eq, %arg1, %c0_i32 : i32
    %21 = arith.extui %20 : i1 to i32
    %c0_i32_15 = arith.constant 0 : i32
    %22 = arith.cmpi ne, %21, %c0_i32_15 : i32
    scf.if %22 {
      %cst_117 = arith.constant 0.000000e+00 : bf16
      %105 = vector.broadcast %cst_117 : bf16 to vector<1x18x16xbf16>
      %c0_118 = arith.constant 0 : index
      %c0_119 = arith.constant 0 : index
      %c0_120 = arith.constant 0 : index
      %106 = vector.load %arg7[%c0_118, %c0_119, %c0_120] : memref<10x18x16xbf16, #tpu.memory_space<vmem>>, vector<1x18x16xbf16>
      tpu.vector_store %arg7[%c0_118, %c0_119, %c0_120], %105 {strides = array<i32>} : memref<10x18x16xbf16, #tpu.memory_space<vmem>>, vector<1x18x16xbf16>,
    } else {
    }
    %c1_i32 = arith.constant 1 : i32
    %23 = arith.cmpi eq, %arg1, %c1_i32 : i32
    %24 = arith.extui %23 : i1 to i32
    %c0_i32_16 = arith.constant 0 : i32
    %25 = arith.cmpi ne, %24, %c0_i32_16 : i32
    scf.if %25 {
      %cst_117 = arith.constant 0.000000e+00 : bf16
      %105 = vector.broadcast %cst_117 : bf16 to vector<1x18x16xbf16>
      %c9 = arith.constant 9 : index
      %c0_118 = arith.constant 0 : index
      %c0_119 = arith.constant 0 : index
      %106 = vector.load %arg7[%c9, %c0_118, %c0_119] : memref<10x18x16xbf16, #tpu.memory_space<vmem>>, vector<1x18x16xbf16>
      tpu.vector_store %arg7[%c9, %c0_118, %c0_119], %105 {strides = array<i32>} : memref<10x18x16xbf16, #tpu.memory_space<vmem>>, vector<1x18x16xbf16>,
    } else {
    }
    %cst_17 = arith.constant 0.000000e+00 : f32
    %26 = vector.broadcast %cst_17 : f32 to vector<128x4xf32>
    %c0_18 = arith.constant 0 : index
    %c0_19 = arith.constant 0 : index
    %27 = vector.load %arg8[%c0_18, %c0_19] : memref<128x4xf32, #tpu.memory_space<vmem>>, vector<128x4xf32>
    tpu.vector_store %arg8[%c0_18, %c0_19], %26 {strides = array<i32>} : memref<128x4xf32, #tpu.memory_space<vmem>>, vector<128x4xf32>,
    %c0_20 = arith.constant 0 : index
    %c0_21 = arith.constant 0 : index
    %c0_22 = arith.constant 0 : index
    %28 = vector.load %arg7[%c0_20, %c0_21, %c0_22] : memref<10x18x16xbf16, #tpu.memory_space<vmem>>, vector<8x16x16xbf16>
    %c0_23 = arith.constant 0 : index
    %c0_24 = arith.constant 0 : index
    %29 = vector.load %arg8[%c0_23, %c0_24] : memref<128x4xf32, #tpu.memory_space<vmem>>, vector<128x4xf32>
    %30 = vector.shape_cast %28 : vector<8x16x16xbf16> to vector<128x16xbf16>
    %c0_25 = arith.constant 0 : index
    %c0_26 = arith.constant 0 : index
    %c0_27 = arith.constant 0 : index
    %31 = vector.load %arg5[%c0_25, %c0_26, %c0_27] : memref<9x16x4xbf16, #tpu.memory_space<vmem>>, vector<1x16x4xbf16>
    %32 = vector.shape_cast %31 : vector<1x16x4xbf16> to vector<16x4xbf16>
    %cst_28 = arith.constant dense<0.000000e+00> : vector<128x4xf32>
    %33 = tpu.matmul %30, %32, %cst_28 {dimension_numbers = #tpu.dot_dimension_numbers<[1], [0], [0], [1], [0, 0, 1, 1], [], []>} : vector<128x16xbf16>, vector<16x4xbf16>, vector<128x4xf32> -> vector<128x4xf32>
    %34 = arith.addf %29, %33 : vector<128x4xf32>
    %c0_29 = arith.constant 0 : index
    %c0_30 = arith.constant 0 : index
    %35 = vector.load %arg8[%c0_29, %c0_30] : memref<128x4xf32, #tpu.memory_space<vmem>>, vector<128x4xf32>
    tpu.vector_store %arg8[%c0_29, %c0_30], %34 {strides = array<i32>} : memref<128x4xf32, #tpu.memory_space<vmem>>, vector<128x4xf32>,
    %c0_31 = arith.constant 0 : index
    %c1 = arith.constant 1 : index
    %c0_32 = arith.constant 0 : index
    %36 = vector.load %arg7[%c0_31, %c1, %c0_32] : memref<10x18x16xbf16, #tpu.memory_space<vmem>>, vector<8x16x16xbf16>
    %c0_33 = arith.constant 0 : index
    %c0_34 = arith.constant 0 : index
    %37 = vector.load %arg8[%c0_33, %c0_34] : memref<128x4xf32, #tpu.memory_space<vmem>>, vector<128x4xf32>
    %38 = vector.shape_cast %36 : vector<8x16x16xbf16> to vector<128x16xbf16>
    %c1_35 = arith.constant 1 : index
    %c0_36 = arith.constant 0 : index
    %c0_37 = arith.constant 0 : index
    %39 = vector.load %arg5[%c1_35, %c0_36, %c0_37] : memref<9x16x4xbf16, #tpu.memory_space<vmem>>, vector<1x16x4xbf16>
    %40 = vector.shape_cast %39 : vector<1x16x4xbf16> to vector<16x4xbf16>
    %cst_38 = arith.constant dense<0.000000e+00> : vector<128x4xf32>
    %41 = tpu.matmul %38, %40, %cst_38 {dimension_numbers = #tpu.dot_dimension_numbers<[1], [0], [0], [1], [0, 0, 1, 1], [], []>} : vector<128x16xbf16>, vector<16x4xbf16>, vector<128x4xf32> -> vector<128x4xf32>
    %42 = arith.addf %37, %41 : vector<128x4xf32>
    %c0_39 = arith.constant 0 : index
    %c0_40 = arith.constant 0 : index
    %43 = vector.load %arg8[%c0_39, %c0_40] : memref<128x4xf32, #tpu.memory_space<vmem>>, vector<128x4xf32>
    tpu.vector_store %arg8[%c0_39, %c0_40], %42 {strides = array<i32>} : memref<128x4xf32, #tpu.memory_space<vmem>>, vector<128x4xf32>,
    %c0_41 = arith.constant 0 : index
    %c2 = arith.constant 2 : index
    %c0_42 = arith.constant 0 : index
    %44 = vector.load %arg7[%c0_41, %c2, %c0_42] : memref<10x18x16xbf16, #tpu.memory_space<vmem>>, vector<8x16x16xbf16>
    %c0_43 = arith.constant 0 : index
    %c0_44 = arith.constant 0 : index
    %45 = vector.load %arg8[%c0_43, %c0_44] : memref<128x4xf32, #tpu.memory_space<vmem>>, vector<128x4xf32>
    %46 = vector.shape_cast %44 : vector<8x16x16xbf16> to vector<128x16xbf16>
    %c2_45 = arith.constant 2 : index
    %c0_46 = arith.constant 0 : index
    %c0_47 = arith.constant 0 : index
    %47 = vector.load %arg5[%c2_45, %c0_46, %c0_47] : memref<9x16x4xbf16, #tpu.memory_space<vmem>>, vector<1x16x4xbf16>
    %48 = vector.shape_cast %47 : vector<1x16x4xbf16> to vector<16x4xbf16>
    %cst_48 = arith.constant dense<0.000000e+00> : vector<128x4xf32>
    %49 = tpu.matmul %46, %48, %cst_48 {dimension_numbers = #tpu.dot_dimension_numbers<[1], [0], [0], [1], [0, 0, 1, 1], [], []>} : vector<128x16xbf16>, vector<16x4xbf16>, vector<128x4xf32> -> vector<128x4xf32>
    %50 = arith.addf %45, %49 : vector<128x4xf32>
    %c0_49 = arith.constant 0 : index
    %c0_50 = arith.constant 0 : index
    %51 = vector.load %arg8[%c0_49, %c0_50] : memref<128x4xf32, #tpu.memory_space<vmem>>, vector<128x4xf32>
    tpu.vector_store %arg8[%c0_49, %c0_50], %50 {strides = array<i32>} : memref<128x4xf32, #tpu.memory_space<vmem>>, vector<128x4xf32>,
    %c1_51 = arith.constant 1 : index
    %c0_52 = arith.constant 0 : index
    %c0_53 = arith.constant 0 : index
    %52 = vector.load %arg7[%c1_51, %c0_52, %c0_53] : memref<10x18x16xbf16, #tpu.memory_space<vmem>>, vector<8x16x16xbf16>
    %c0_54 = arith.constant 0 : index
    %c0_55 = arith.constant 0 : index
    %53 = vector.load %arg8[%c0_54, %c0_55] : memref<128x4xf32, #tpu.memory_space<vmem>>, vector<128x4xf32>
    %54 = vector.shape_cast %52 : vector<8x16x16xbf16> to vector<128x16xbf16>
    %c3 = arith.constant 3 : index
    %c0_56 = arith.constant 0 : index
    %c0_57 = arith.constant 0 : index
    %55 = vector.load %arg5[%c3, %c0_56, %c0_57] : memref<9x16x4xbf16, #tpu.memory_space<vmem>>, vector<1x16x4xbf16>
    %56 = vector.shape_cast %55 : vector<1x16x4xbf16> to vector<16x4xbf16>
    %cst_58 = arith.constant dense<0.000000e+00> : vector<128x4xf32>
    %57 = tpu.matmul %54, %56, %cst_58 {dimension_numbers = #tpu.dot_dimension_numbers<[1], [0], [0], [1], [0, 0, 1, 1], [], []>} : vector<128x16xbf16>, vector<16x4xbf16>, vector<128x4xf32> -> vector<128x4xf32>
    %58 = arith.addf %53, %57 : vector<128x4xf32>
    %c0_59 = arith.constant 0 : index
    %c0_60 = arith.constant 0 : index
    %59 = vector.load %arg8[%c0_59, %c0_60] : memref<128x4xf32, #tpu.memory_space<vmem>>, vector<128x4xf32>
    tpu.vector_store %arg8[%c0_59, %c0_60], %58 {strides = array<i32>} : memref<128x4xf32, #tpu.memory_space<vmem>>, vector<128x4xf32>,
    %c1_61 = arith.constant 1 : index
    %c1_62 = arith.constant 1 : index
    %c0_63 = arith.constant 0 : index
    %60 = vector.load %arg7[%c1_61, %c1_62, %c0_63] : memref<10x18x16xbf16, #tpu.memory_space<vmem>>, vector<8x16x16xbf16>
    %c0_64 = arith.constant 0 : index
    %c0_65 = arith.constant 0 : index
    %61 = vector.load %arg8[%c0_64, %c0_65] : memref<128x4xf32, #tpu.memory_space<vmem>>, vector<128x4xf32>
    %62 = vector.shape_cast %60 : vector<8x16x16xbf16> to vector<128x16xbf16>
    %c4 = arith.constant 4 : index
    %c0_66 = arith.constant 0 : index
    %c0_67 = arith.constant 0 : index
    %63 = vector.load %arg5[%c4, %c0_66, %c0_67] : memref<9x16x4xbf16, #tpu.memory_space<vmem>>, vector<1x16x4xbf16>
    %64 = vector.shape_cast %63 : vector<1x16x4xbf16> to vector<16x4xbf16>
    %cst_68 = arith.constant dense<0.000000e+00> : vector<128x4xf32>
    %65 = tpu.matmul %62, %64, %cst_68 {dimension_numbers = #tpu.dot_dimension_numbers<[1], [0], [0], [1], [0, 0, 1, 1], [], []>} : vector<128x16xbf16>, vector<16x4xbf16>, vector<128x4xf32> -> vector<128x4xf32>
    %66 = arith.addf %61, %65 : vector<128x4xf32>
    %c0_69 = arith.constant 0 : index
    %c0_70 = arith.constant 0 : index
    %67 = vector.load %arg8[%c0_69, %c0_70] : memref<128x4xf32, #tpu.memory_space<vmem>>, vector<128x4xf32>
    tpu.vector_store %arg8[%c0_69, %c0_70], %66 {strides = array<i32>} : memref<128x4xf32, #tpu.memory_space<vmem>>, vector<128x4xf32>,
    %c1_71 = arith.constant 1 : index
    %c2_72 = arith.constant 2 : index
    %c0_73 = arith.constant 0 : index
    %68 = vector.load %arg7[%c1_71, %c2_72, %c0_73] : memref<10x18x16xbf16, #tpu.memory_space<vmem>>, vector<8x16x16xbf16>
    %c0_74 = arith.constant 0 : index
    %c0_75 = arith.constant 0 : index
    %69 = vector.load %arg8[%c0_74, %c0_75] : memref<128x4xf32, #tpu.memory_space<vmem>>, vector<128x4xf32>
    %70 = vector.shape_cast %68 : vector<8x16x16xbf16> to vector<128x16xbf16>
    %c5 = arith.constant 5 : index
    %c0_76 = arith.constant 0 : index
    %c0_77 = arith.constant 0 : index
    %71 = vector.load %arg5[%c5, %c0_76, %c0_77] : memref<9x16x4xbf16, #tpu.memory_space<vmem>>, vector<1x16x4xbf16>
    %72 = vector.shape_cast %71 : vector<1x16x4xbf16> to vector<16x4xbf16>
    %cst_78 = arith.constant dense<0.000000e+00> : vector<128x4xf32>
    %73 = tpu.matmul %70, %72, %cst_78 {dimension_numbers = #tpu.dot_dimension_numbers<[1], [0], [0], [1], [0, 0, 1, 1], [], []>} : vector<128x16xbf16>, vector<16x4xbf16>, vector<128x4xf32> -> vector<128x4xf32>
    %74 = arith.addf %69, %73 : vector<128x4xf32>
    %c0_79 = arith.constant 0 : index
    %c0_80 = arith.constant 0 : index
    %75 = vector.load %arg8[%c0_79, %c0_80] : memref<128x4xf32, #tpu.memory_space<vmem>>, vector<128x4xf32>
    tpu.vector_store %arg8[%c0_79, %c0_80], %74 {strides = array<i32>} : memref<128x4xf32, #tpu.memory_space<vmem>>, vector<128x4xf32>,
    %c2_81 = arith.constant 2 : index
    %c0_82 = arith.constant 0 : index
    %c0_83 = arith.constant 0 : index
    %76 = vector.load %arg7[%c2_81, %c0_82, %c0_83] : memref<10x18x16xbf16, #tpu.memory_space<vmem>>, vector<8x16x16xbf16>
    %c0_84 = arith.constant 0 : index
    %c0_85 = arith.constant 0 : index
    %77 = vector.load %arg8[%c0_84, %c0_85] : memref<128x4xf32, #tpu.memory_space<vmem>>, vector<128x4xf32>
    %78 = vector.shape_cast %76 : vector<8x16x16xbf16> to vector<128x16xbf16>
    %c6 = arith.constant 6 : index
    %c0_86 = arith.constant 0 : index
    %c0_87 = arith.constant 0 : index
    %79 = vector.load %arg5[%c6, %c0_86, %c0_87] : memref<9x16x4xbf16, #tpu.memory_space<vmem>>, vector<1x16x4xbf16>
    %80 = vector.shape_cast %79 : vector<1x16x4xbf16> to vector<16x4xbf16>
    %cst_88 = arith.constant dense<0.000000e+00> : vector<128x4xf32>
    %81 = tpu.matmul %78, %80, %cst_88 {dimension_numbers = #tpu.dot_dimension_numbers<[1], [0], [0], [1], [0, 0, 1, 1], [], []>} : vector<128x16xbf16>, vector<16x4xbf16>, vector<128x4xf32> -> vector<128x4xf32>
    %82 = arith.addf %77, %81 : vector<128x4xf32>
    %c0_89 = arith.constant 0 : index
    %c0_90 = arith.constant 0 : index
    %83 = vector.load %arg8[%c0_89, %c0_90] : memref<128x4xf32, #tpu.memory_space<vmem>>, vector<128x4xf32>
    tpu.vector_store %arg8[%c0_89, %c0_90], %82 {strides = array<i32>} : memref<128x4xf32, #tpu.memory_space<vmem>>, vector<128x4xf32>,
    %c2_91 = arith.constant 2 : index
    %c1_92 = arith.constant 1 : index
    %c0_93 = arith.constant 0 : index
    %84 = vector.load %arg7[%c2_91, %c1_92, %c0_93] : memref<10x18x16xbf16, #tpu.memory_space<vmem>>, vector<8x16x16xbf16>
    %c0_94 = arith.constant 0 : index
    %c0_95 = arith.constant 0 : index
    %85 = vector.load %arg8[%c0_94, %c0_95] : memref<128x4xf32, #tpu.memory_space<vmem>>, vector<128x4xf32>
    %86 = vector.shape_cast %84 : vector<8x16x16xbf16> to vector<128x16xbf16>
    %c7 = arith.constant 7 : index
    %c0_96 = arith.constant 0 : index
    %c0_97 = arith.constant 0 : index
    %87 = vector.load %arg5[%c7, %c0_96, %c0_97] : memref<9x16x4xbf16, #tpu.memory_space<vmem>>, vector<1x16x4xbf16>
    %88 = vector.shape_cast %87 : vector<1x16x4xbf16> to vector<16x4xbf16>
    %cst_98 = arith.constant dense<0.000000e+00> : vector<128x4xf32>
    %89 = tpu.matmul %86, %88, %cst_98 {dimension_numbers = #tpu.dot_dimension_numbers<[1], [0], [0], [1], [0, 0, 1, 1], [], []>} : vector<128x16xbf16>, vector<16x4xbf16>, vector<128x4xf32> -> vector<128x4xf32>
    %90 = arith.addf %85, %89 : vector<128x4xf32>
    %c0_99 = arith.constant 0 : index
    %c0_100 = arith.constant 0 : index
    %91 = vector.load %arg8[%c0_99, %c0_100] : memref<128x4xf32, #tpu.memory_space<vmem>>, vector<128x4xf32>
    tpu.vector_store %arg8[%c0_99, %c0_100], %90 {strides = array<i32>} : memref<128x4xf32, #tpu.memory_space<vmem>>, vector<128x4xf32>,
    %c2_101 = arith.constant 2 : index
    %c2_102 = arith.constant 2 : index
    %c0_103 = arith.constant 0 : index
    %92 = vector.load %arg7[%c2_101, %c2_102, %c0_103] : memref<10x18x16xbf16, #tpu.memory_space<vmem>>, vector<8x16x16xbf16>
    %c0_104 = arith.constant 0 : index
    %c0_105 = arith.constant 0 : index
    %93 = vector.load %arg8[%c0_104, %c0_105] : memref<128x4xf32, #tpu.memory_space<vmem>>, vector<128x4xf32>
    %94 = vector.shape_cast %92 : vector<8x16x16xbf16> to vector<128x16xbf16>
    %c8 = arith.constant 8 : index
    %c0_106 = arith.constant 0 : index
    %c0_107 = arith.constant 0 : index
    %95 = vector.load %arg5[%c8, %c0_106, %c0_107] : memref<9x16x4xbf16, #tpu.memory_space<vmem>>, vector<1x16x4xbf16>
    %96 = vector.shape_cast %95 : vector<1x16x4xbf16> to vector<16x4xbf16>
    %cst_108 = arith.constant dense<0.000000e+00> : vector<128x4xf32>
    %97 = tpu.matmul %94, %96, %cst_108 {dimension_numbers = #tpu.dot_dimension_numbers<[1], [0], [0], [1], [0, 0, 1, 1], [], []>} : vector<128x16xbf16>, vector<16x4xbf16>, vector<128x4xf32> -> vector<128x4xf32>
    %98 = arith.addf %93, %97 : vector<128x4xf32>
    %c0_109 = arith.constant 0 : index
    %c0_110 = arith.constant 0 : index
    %99 = vector.load %arg8[%c0_109, %c0_110] : memref<128x4xf32, #tpu.memory_space<vmem>>, vector<128x4xf32>
    tpu.vector_store %arg8[%c0_109, %c0_110], %98 {strides = array<i32>} : memref<128x4xf32, #tpu.memory_space<vmem>>, vector<128x4xf32>,
    %c0_111 = arith.constant 0 : index
    %c0_112 = arith.constant 0 : index
    %100 = vector.load %arg8[%c0_111, %c0_112] : memref<128x4xf32, #tpu.memory_space<vmem>>, vector<128x4xf32>
    %101 = vector.shape_cast %100 : vector<128x4xf32> to vector<8x16x4xf32>
    %c0_113 = arith.constant 0 : index
    %c0_114 = arith.constant 0 : index
    %c0_115 = arith.constant 0 : index
    %c0_116 = arith.constant 0 : index
    %102 = vector.load %arg6[%c0_113, %c0_114, %c0_115, %c0_116] : memref<1x8x16x4xf32, #tpu.memory_space<vmem>>, vector<1x8x16x4xf32>
    %103 = vector.shape_cast %102 : vector<1x8x16x4xf32> to vector<8x16x4xf32>
    %104 = vector.shape_cast %101 : vector<8x16x4xf32> to vector<1x8x16x4xf32>
    tpu.vector_store %arg6[%c0_113, %c0_114, %c0_115, %c0_116], %104 {strides = array<i32>} : memref<1x8x16x4xf32, #tpu.memory_space<vmem>>, vector<1x8x16x4xf32>,
    return
  }
  func.func @transform_0(%arg0: i32, %arg1: i32) -> (i32, i32, i32, i32) {
    %c0_i32 = arith.constant 0 : i32
    %c0_i32_0 = arith.constant 0 : i32
    %c0_i32_1 = arith.constant 0 : i32
    %c0_i32_2 = arith.constant 0 : i32
    return %arg0, %c0_i32, %c0_i32_0, %c0_i32_1 : i32, i32, i32, i32
  }
  func.func @transform_1(%arg0: i32, %arg1: i32) -> (i32, i32) {
    %c0_i32 = arith.constant 0 : i32
    %c0_i32_0 = arith.constant 0 : i32
    %c0_i32_1 = arith.constant 0 : i32
    return %c0_i32, %c0_i32_0 : i32, i32
  }
  func.func @transform_2(%arg0: i32, %arg1: i32) -> (i32, i32) {
    %c0_i32 = arith.constant 0 : i32
    %c0_i32_0 = arith.constant 0 : i32
    %c0_i32_1 = arith.constant 0 : i32
    return %c0_i32, %c0_i32_0 : i32, i32
  }
  func.func @transform_3(%arg0: i32, %arg1: i32) -> (i32, i32, i32) {
    %c0_i32 = arith.constant 0 : i32
    %c0_i32_0 = arith.constant 0 : i32
    %c0_i32_1 = arith.constant 0 : i32
    %c0_i32_2 = arith.constant 0 : i32
    return %c0_i32, %c0_i32_0, %c0_i32_1 : i32, i32, i32
  }
  func.func @transform_4(%arg0: i32, %arg1: i32) -> (i32, i32, i32, i32) {
    %c0_i32 = arith.constant 0 : i32
    %c0_i32_0 = arith.constant 0 : i32
    %c0_i32_1 = arith.constant 0 : i32
    return %arg0, %arg1, %c0_i32, %c0_i32_0 : i32, i32, i32, i32
  }
}

</mosaic_0001>

<bundles_post_ra>
// kernel: gen_bottleneck_forward.3
= control target key start
LH: loop header
LB: loop body
LE: loop exit
PB: predicated region body
PF: predicated region fallthrough
CT: control target
= control target key end

     0   :  { %s424_s15 = smov 0   ;;  %s509_s0 = inlined_call_operand.vmem [shape: f32[512,16], index: 0, kind: input, shape index: {}]   ;;  %s510_s1 = inlined_call_operand.vmem [shape: f32[1,16], index: 1, kind: input, shape index: {}]   ;;  %s511_s2 = inlined_call_operand.vmem [shape: f32[1,16], index: 2, kind: input, shape index: {}]   ;;  %s512_s3 = inlined_call_operand.vmem [shape: f32[1,16], index: 3, kind: output, shape index: {0}]   ;;  %s513_s4 = inlined_call_operand.vmem [shape: f32[1,16], index: 4, kind: output, shape index: {1}]  }
   0x1 LB: > { %s430_s16 = sadd.s32 4294967295, %s396_s15   ;;  %p372_p0 = scmp.ge.s32.totalorder %s396_s15, 1  ;;  %s396_s15 = sphi %s424_s15, %s15_s15  }
   0x2   : > { %p156_p1 = scmp.lt.s32.totalorder %s396_s15, 5 }
   0x4   : > { %p157_p2 = pnand %p372_p0, %p156_p1 }
   0x5   : > { %s373_s17 = sshll.u32 (!%p157_p2), %s430_s16, 4  ;;  %p375_p4 = scmp.ne.s32.totalorder (!%p157_p2), %s430_s16, 0 }
   0x6   : > { %160 = sbr.rel (%p157_p2) target bundleno = 110 (0x6e), region = 32  ;;  %p178_p3 = scmp.lt.s32.totalorder (!%p157_p2), %s373_s17, 63 }
   0xb   : > { %s515_s17 = smov (!%p178_p3, %s373_s17), 63  ;;  %186 = sbr.rel (%p375_p4) target bundleno = 19 (0x13), region = 36 }
   0xc   : > { %s374_s18 = sshll.u32 %s515_s17, 3 }
   0xd   : > { %s438_s21 = scalar_lea.vmem %s509_s0, %s374_s18 }
  0x10   : > { %vm187_vm0 = vcmask 130048   ;;  %v398_v0 = vmov 0.0  }
  0x11   : > { %188 = vst.msk [vmem:[#allocation2] sm:$0xff] %vm187_vm0, %v398_v0 }
  0x12   : > { %189 = vst.msk [vmem:[#allocation3] sm:$0xff] %vm187_vm0, %v398_v0 }
  0x13 PF: > { %v190_v1 = vld [vmem:[%s438_s21] sm:$0xff]  ;;  %v191_v2 = vld [vmem:[%s438_s21 + $0x8] sm:$0xff]  ;;  %v192_v3 = vld [vmem:[%s438_s21 + $0x10] sm:$0xff]  ;;  %vm207_vm1 = vcmask 130048   ;;  %p376_p5 = scmp.ne.s32.totalorder %s430_s16, 3 }
  0x14   : > { %v208_v4 = vsel %vm207_vm1, %v190_v1, 0.0  ;;  %v209_v5 = vsel %vm207_vm1, %v191_v2, 0.0  ;;  %v211_v6 = vsel %vm207_vm1, %v192_v3, 0.0  ;;  %v193_v7 = vld [vmem:[%s438_s21 + $0x18] sm:$0xff]  ;;  %v194_v10 = vld [vmem:[%s438_s21 + $0x20] sm:$0xff]  ;;  %v195_v13 = vld [vmem:[%s438_s21 + $0x28] sm:$0xff]  ;;  %v242_v15 = vmul.f32 %v190_v1, %v190_v1 }
  0x15   : > { %v210_v8 = vadd.f32 %v209_v5, %v208_v4  ;;  %v213_v9 = vsel %vm207_vm1, %v193_v7, 0.0  ;;  %v215_v12 = vsel %vm207_vm1, %v194_v10, 0.0  ;;  %v243_v16 = vmul.f32 %v191_v2, %v191_v2  ;;  %v196_v19 = vld [vmem:[%s438_s21 + $0x30] sm:$0xff]  ;;  %v197_v24 = vld [vmem:[%s438_s21 + $0x38] sm:$0xff]  ;;  %v198_v31 = vld [vmem:[%s438_s21 + $0x40] sm:$0xff] }
  0x16   : > { %v244_v17 = vmul.f32 %v192_v3, %v192_v3  ;;  %v217_v18 = vsel %vm207_vm1, %v195_v13, 0.0  ;;  %v245_v21 = vmul.f32 %v193_v7, %v193_v7  ;;  %v219_v22 = vsel %vm207_vm1, %v196_v19, 0.0  ;;  %v199_v37 = vld [vmem:[%s438_s21 + $0x48] sm:$0xff]  ;;  %v200_v43 = vld [vmem:[%s438_s21 + $0x50] sm:$0xff]  ;;  %v201_v49 = vld [vmem:[%s438_s21 + $0x58] sm:$0xff] }
  0x17   : > { %v212_v11 = vadd.f32 %v211_v6, %v210_v8  ;;  %v246_v23 = vmul.f32 %v194_v10, %v194_v10  ;;  %v258_v26 = vsel %vm207_vm1, %v242_v15, 0.0  ;;  %v259_v27 = vsel %vm207_vm1, %v243_v16, 0.0  ;;  %v202_v55 = vld [vmem:[%s438_s21 + $0x60] sm:$0xff]  ;;  %v203_v61 = vld [vmem:[%s438_s21 + $0x68] sm:$0xff]  ;;  %v204_v3 = vld [vmem:[%s438_s21 + $0x70] sm:$0xff] }
  0x18   : > { %v261_v28 = vsel %vm207_vm1, %v244_v17, 0.0  ;;  %v221_v29 = vsel %vm207_vm1, %v197_v24, 0.0  ;;  %v260_v30 = vadd.f32 %v259_v27, %v258_v26  ;;  %v247_v33 = vmul.f32 %v195_v13, %v195_v13 }
  0x19   : > { %v214_v14 = vadd.f32 %v213_v9, %v212_v11  ;;  %v263_v34 = vsel %vm207_vm1, %v245_v21, 0.0  ;;  %v223_v35 = vsel %vm207_vm1, %v198_v31, 0.0  ;;  %v248_v39 = vmul.f32 %v196_v19, %v196_v19  ;;  %v205_v9 = vld [vmem:[%s438_s21 + $0x78] sm:$0xff] }
  0x1a   : > { %v262_v36 = vadd.f32 %v261_v28, %v260_v30  ;;  %v265_v40 = vsel %vm207_vm1, %v246_v23, 0.0  ;;  %v225_v41 = vsel %vm207_vm1, %v199_v37, 0.0  ;;  %v249_v45 = vmul.f32 %v197_v24, %v197_v24 }
  0x1b   : > { %v216_v20 = vadd.f32 %v215_v12, %v214_v14  ;;  %v267_v46 = vsel %vm207_vm1, %v247_v33, 0.0  ;;  %v227_v47 = vsel %vm207_vm1, %v200_v43, 0.0  ;;  %v250_v51 = vmul.f32 %v198_v31, %v198_v31 }
  0x1c   : > { %v264_v42 = vadd.f32 %v263_v34, %v262_v36  ;;  %v269_v52 = vsel %vm207_vm1, %v248_v39, 0.0  ;;  %v229_v53 = vsel %vm207_vm1, %v201_v49, 0.0  ;;  %v251_v57 = vmul.f32 %v199_v37, %v199_v37 }
  0x1d   : > { %v218_v25 = vadd.f32 %v217_v18, %v216_v20  ;;  %v271_v58 = vsel %vm207_vm1, %v249_v45, 0.0  ;;  %v231_v59 = vsel %vm207_vm1, %v202_v55, 0.0  ;;  %v252_v63 = vmul.f32 %v200_v43, %v200_v43  ;;  %v206_v18 = vld [vmem:[#allocation2] sm:$0xff] }
  0x1e   : > { %v266_v48 = vadd.f32 %v265_v40, %v264_v42  ;;  %v273_v0 = vsel %vm207_vm1, %v250_v51, 0.0  ;;  %v233_v1 = vsel %vm207_vm1, %v203_v61, 0.0  ;;  %v253_v5 = vmul.f32 %v201_v49, %v201_v49 }
  0x1f   : > { %v220_v32 = vadd.f32 %v219_v22, %v218_v25  ;;  %v275_v6 = vsel %vm207_vm1, %v251_v57, 0.0  ;;  %v235_v7 = vsel %vm207_vm1, %v204_v3, 0.0  ;;  %v254_v11 = vmul.f32 %v202_v55, %v202_v55 }
  0x20   : > { %v268_v54 = vadd.f32 %v267_v46, %v266_v48  ;;  %v277_v12 = vsel %vm207_vm1, %v252_v63, 0.0  ;;  %v237_v13 = vsel %vm207_vm1, %v205_v9, 0.0  ;;  %v255_v16 = vmul.f32 %v203_v61, %v203_v61 }
  0x21   : > { %v222_v38 = vadd.f32 %v221_v29, %v220_v32  ;;  %v279_v17 = vsel %vm207_vm1, %v253_v5, 0.0  ;;  %v256_v21 = vmul.f32 %v204_v3, %v204_v3  ;;  %v281_v22 = vsel %vm207_vm1, %v254_v11, 0.0  ;;  %v241_v32 = vld [vmem:[#allocation3] sm:$0xff] }
  0x22   : > { %v270_v60 = vadd.f32 %v269_v52, %v268_v54  ;;  %v257_v25 = vmul.f32 %v205_v9, %v205_v9  ;;  %v283_v26 = vsel %vm207_vm1, %v255_v16, 0.0 }
  0x23   : > { %v224_v44 = vadd.f32 %v223_v35, %v222_v38  ;;  %v285_v28 = vsel %vm207_vm1, %v256_v21, 0.0 }
  0x24   : > { %v272_v2 = vadd.f32 %v271_v58, %v270_v60  ;;  %v287_v30 = vsel %vm207_vm1, %v257_v25, 0.0 }
  0x25   : > { %v226_v50 = vadd.f32 %v225_v41, %v224_v44 }
  0x26   : > { %v274_v8 = vadd.f32 %v273_v0, %v272_v2 }
  0x27   : > { %v228_v56 = vadd.f32 %v227_v47, %v226_v50 }
  0x28   : > { %v276_v14 = vadd.f32 %v275_v6, %v274_v8 }
  0x29   : > { %v230_v62 = vadd.f32 %v229_v53, %v228_v56 }
  0x2a   : > { %v278_v19 = vadd.f32 %v277_v12, %v276_v14 }
  0x2b   : > { %v232_v4 = vadd.f32 %v231_v59, %v230_v62 }
  0x2c   : > { %v280_v23 = vadd.f32 %v279_v17, %v278_v19 }
  0x2d   : > { %v234_v10 = vadd.f32 %v233_v1, %v232_v4 }
  0x2e   : > { %v282_v27 = vadd.f32 %v281_v22, %v280_v23 }
  0x2f   : > { %v236_v15 = vadd.f32 %v235_v7, %v234_v10 }
  0x30   : > { %v284_v29 = vadd.f32 %v283_v26, %v282_v27 }
  0x31   : > { %v238_v20 = vadd.f32 %v237_v13, %v236_v15 }
  0x32   : > { %v286_v31 = vadd.f32 %v285_v28, %v284_v29 }
  0x33   : > { %v239_v24 = vadd.f32 %v238_v20, %v206_v18 }
  0x34   : > { %v288_v33 = vadd.f32 %v287_v30, %v286_v31  ;;  %294 = sbr.rel (%p376_p5) target bundleno = 110 (0x6e), region = 40 }
  0x35   : > { %240 = vst.msk [vmem:[#allocation2] sm:$0xff] %vm207_vm1, %v239_v24 }
  0x36   : > { %v289_v34 = vadd.f32 %v288_v33, %v241_v32 }
  0x38   : > { %290 = vst.msk [vmem:[#allocation3] sm:$0xff] %vm207_vm1, %v289_v34 }
  0x39   : > { %v316_v62 = vld [vmem:[%s510_s1] sm:$0x1]  ;;  %vm329_vm5 = vcmask 122880  }
  0x3a   : > { %v331_v2 = vld [vmem:[%s511_s2] sm:$0x1] }
  0x3c   : > { %v295_v35 = vld [vmem:[#allocation2] sm:$0xff] }
  0x3d   : > { %v296_v37 = vsel %vm207_vm1, %v295_v35, 0.0 }
  0x3e   : > { %v297_v39 = vrot.slane %v296_v37, 4 }
  0x3f   : > { %v304_v36 = vld [vmem:[#allocation3] sm:$0xff] }
  0x40   : > { %v305_v38 = vsel %vm207_vm1, %v304_v36, 0.0  ;;  %v298_v41 = vadd.f32 %v297_v39, %v296_v37 }
  0x41   : > { %v306_v40 = vrot.slane %v305_v38, 4 }
  0x42   : > { %v299_v43 = vrot.slane %v298_v41, 2 }
  0x43   : > { %v307_v42 = vadd.f32 %v306_v40, %v305_v38 }
  0x44   : > { %v300_v45 = vadd.f32 %v299_v43, %v298_v41 }
  0x45   : > { %v308_v44 = vrot.slane %v307_v42, 2 }
  0x46   : > { %v301_v47 = vrot.slane %v300_v45, 1 }
  0x47   : > { %v309_v46 = vadd.f32 %v308_v44, %v307_v42 }
  0x48   : > { %v302_v49 = vadd.f32 %v301_v47, %v300_v45 }
  0x49   : > { %v310_v48 = vrot.slane %v309_v46, 1 }
  0x4a   : > { %v303_v51 = vmul.f32 0.001953125, %v302_v49 }
  0x4b   : > { %v311_v50 = vadd.f32 %v310_v48, %v309_v46 }
  0x4c   : > { %v313_v53 = vmul.f32 %v303_v51, %v303_v51 }
  0x4d   : > { %v312_v52 = vmul.f32 0.001953125, %v311_v50 }
  0x4f   : > { %v314_v54 = vsub.f32 %v312_v52, %v313_v53 }
  0x51   : > { %v315_v55 = vmax.f32 %v314_v54, 0.0 }
  0x53   : > { %v317_v56 = vadd.f32 1e-05, %v315_v55 }
  0x55   : > { %388 = vrsqrt.f32 %v317_v56  ;;  %vm324_vm2 = vweird.f32 %v317_v56 }
  0x5b   : > { %v389_v57 = vpop.eup %388 }
  0x5c   : > { %v319_v58 = vmul.f32 %v389_v57, %v317_v56  ;;  %vm325_vm3 = vweird.f32 %v389_v57 }
  0x5d   : > { %vm326_vm4 = vmor %vm324_vm2, %vm325_vm3 }
  0x5e   : > { %v320_v59 = vmul.f32 %v389_v57, %v319_v58 }
  0x60   : > { %v321_v60 = vmul.f32 0.5, %v320_v59 }
  0x62   : > { %v322_v61 = vsub.f32 1.5, %v321_v60 }
  0x64   : > { %v323_v63 = vmul.f32 %v389_v57, %v322_v61 }
  0x66   : > { %v327_v0 = vsel %vm326_vm4, %v389_v57, %v323_v63 }
  0x67   : > { %v328_v1 = vmul.f32 %v327_v0, %v316_v62 }
  0x69   : > { %330 = vst.msk [vmem:[%s512_s3] sm:$0x1] %vm329_vm5, %v328_v1  ;;  %v332_v3 = vmul.f32 %v328_v1, %v303_v51 }
  0x6b   : > { %v333_v4 = vsub.f32 %v331_v2, %v332_v3 }
  0x6d   : > { %334 = vst.msk [vmem:[%s513_s4] sm:$0x1] %vm329_vm5, %v333_v4 }
  0x6e PF: > { %s15_s15 = sadd.s32 1, %s396_s15  }
  0x6f   : > { %p12_p6 = scmp.ge.s32.totalorder %s15_s15, 6  }
  0x71   :  { %14 = sbr.rel (!%p12_p6) target bundleno = 1 (0x1), region = 74 }

// kernel: gen_bottleneck_forward.4
= control target key start
LH: loop header
LB: loop body
LE: loop exit
PB: predicated region body
PF: predicated region fallthrough
CT: control target
= control target key end

     0   :  { %s782_s27 = smov 0   ;;  %s963_s0 = inlined_call_operand.vmem [shape: f32[512,16], index: 0, kind: input, shape index: {}]   ;;  %s964_s1 = inlined_call_operand.vmem [shape: f32[1,16], index: 1, kind: input, shape index: {}]   ;;  %s965_s2 = inlined_call_operand.vmem [shape: f32[1,16], index: 2, kind: input, shape index: {}]   ;;  %s966_s3 = inlined_call_operand.vmem [shape: bf16[16,16], index: 3, kind: input, shape index: {}]   ;;  %s967_s4 = inlined_call_operand.vmem [shape: f32[1,16], index: 4, kind: input, shape index: {}]   ;;  %s968_s5 = inlined_call_operand.vmem [shape: f32[1,16], index: 5, kind: input, shape index: {}]   ;;  %s969_s6 = inlined_call_operand.vmem [shape: f32[512,16], index: 6, kind: output, shape index: {0}]   ;;  %s970_s7 = inlined_call_operand.vmem [shape: f32[1,16], index: 7, kind: output, shape index: {1}]   ;;  %s971_s8 = inlined_call_operand.vmem [shape: f32[1,16], index: 8, kind: output, shape index: {2}]  }
   0x1 LB: > { %s788_s28 = sadd.s32 4294967295, %s734_s27   ;;  %p690_p0 = scmp.ge.s32.totalorder %s734_s27, 1  ;;  %s734_s27 = sphi %s782_s27, %s19_s27  }
   0x2   : > { %p258_p1 = scmp.lt.s32.totalorder %s734_s27, 5 }
   0x4   : > { %p259_p2 = pnand %p690_p0, %p258_p1 }
   0x5   : > { %s691_s29 = sshll.u32 (!%p259_p2), %s788_s28, 4  ;;  %p695_p4 = scmp.ne.s32.totalorder (!%p259_p2), %s788_s28, 0 }
   0x6   : > { %262 = sbr.rel (%p259_p2) target bundleno = 265 (0x109), region = 44  ;;  %p293_p3 = scmp.lt.s32.totalorder (!%p259_p2), %s691_s29, 63 }
   0xb   : > { %s973_s29 = smov (!%p293_p3, %s691_s29), 63  ;;  %308 = sbr.rel (%p695_p4) target bundleno = 19 (0x13), region = 48 }
   0xc   : > { %s692_s30 = sshll.u32 %s973_s29, 3 }
   0xd   : > { %s796_s11 = scalar_lea.vmem %s963_s0, %s692_s30  ;;  %s801_s14 = scalar_lea.vmem %s969_s6, %s692_s30 }
  0x10   : > { %vm309_vm0 = vcmask 130048   ;;  %v736_v0 = vmov 0.0  }
  0x11   : > { %310 = vst.msk [vmem:[#allocation2] sm:$0xff] %vm309_vm0, %v736_v0 }
  0x12   : > { %311 = vst.msk [vmem:[#allocation3] sm:$0xff] %vm309_vm0, %v736_v0 }
  0x13 PF: > { %v711_v1 = vld [vmem:[%s966_s3] sm:$0xff]  ;;  %v313_v3 = vld [vmem:[%s796_s11 + $0x8] sm:$0xff]  ;;  %vm400_vm1 = vcmask 130048   ;;  %v314_v31 = vld [vmem:[%s796_s11 + $0x10] sm:$0xff]  ;;  %p708_p5 = scmp.ne.s32.totalorder %s788_s28, 3 }
  0x14   : > { %v312_v2 = vld [vmem:[%s796_s11] sm:$0xff]  ;;  %432 = vmatpush.bf16.msra.mxu0 %v711_v1  ;;  %712 = vmatpush.bf16.msra.mxu1 %v711_v1  ;;  %v317_v7 = vld [vmem:[%s796_s11 + $0x28] sm:$0xff]  ;;  %v315_v36 = vld [vmem:[%s796_s11 + $0x18] sm:$0xff] }
  0x15   : > { %v724_v4 = vld [vmem:[%s964_s1] ss:$0 sm:$0xff]  ;;  %713 = vmatpush.bf16.msra.mxu2 %v711_v1  ;;  %v321_v13 = vld [vmem:[%s796_s11 + $0x48] sm:$0xff]  ;;  %714 = vmatpush.bf16.msra.mxu3 %v711_v1  ;;  %v318_v37 = vld [vmem:[%s796_s11 + $0x30] sm:$0xff] }
  0x16   : > { %v815_v5 = vld [vmem:[%s965_s2] ss:$0 sm:$0xff]  ;;  %v332_v8 = vmul.f32 %v724_v4, %v312_v2  ;;  %v333_v9 = vmul.f32 %v724_v4, %v313_v3  ;;  %v337_v11 = vmul.f32 %v724_v4, %v317_v7  ;;  %v341_v16 = vmul.f32 %v724_v4, %v321_v13  ;;  %v325_v17 = vld [vmem:[%s796_s11 + $0x68] sm:$0xff]  ;;  %v319_v38 = vld [vmem:[%s796_s11 + $0x38] sm:$0xff] }
  0x17   : > { %v316_v6 = vld [vmem:[%s796_s11 + $0x20] sm:$0xff]  ;;  %v345_v25 = vmul.f32 %v724_v4, %v325_v17  ;;  %v322_v41 = vld [vmem:[%s796_s11 + $0x50] sm:$0xff]  ;;  %v323_v42 = vld [vmem:[%s796_s11 + $0x58] sm:$0xff]  ;;  %v334_v45 = vmul.f32 %v724_v4, %v314_v31  ;;  %v335_v46 = vmul.f32 %v724_v4, %v315_v36  ;;  %v338_v47 = vmul.f32 %v724_v4, %v318_v37 }
  0x18   : > { %v336_v10 = vmul.f32 %v724_v4, %v316_v6  ;;  %v320_v12 = vld [vmem:[%s796_s11 + $0x40] sm:$0xff]  ;;  %v352_v19 = vadd.f32 %v815_v5, %v332_v8  ;;  %v353_v20 = vadd.f32 %v815_v5, %v333_v9  ;;  %v357_v22 = vadd.f32 %v815_v5, %v337_v11  ;;  %v326_v49 = vld [vmem:[%s796_s11 + $0x70] sm:$0xff]  ;;  %v327_v50 = vld [vmem:[%s796_s11 + $0x78] sm:$0xff] }
  0x19   : > { %v324_v14 = vld [vmem:[%s796_s11 + $0x60] sm:$0xff]  ;;  %v340_v15 = vmul.f32 %v724_v4, %v320_v12  ;;  %v361_v24 = vadd.f32 %v815_v5, %v341_v16  ;;  %v365_v34 = vadd.f32 %v815_v5, %v345_v25  ;;  %v339_v48 = vmul.f32 %v724_v4, %v319_v38 }
  0x1a   : > { %v344_v18 = vmul.f32 %v724_v4, %v324_v14  ;;  %v356_v21 = vadd.f32 %v815_v5, %v336_v10  ;;  %v368_v27 = vmax.f32 %v352_v19, 0.0  ;;  %v369_v28 = vmax.f32 %v353_v20, 0.0 }
  0x1b   : > { %v360_v23 = vadd.f32 %v815_v5, %v340_v15  ;;  %v373_v30 = vmax.f32 %v357_v22, 0.0  ;;  %v377_v33 = vmax.f32 %v361_v24, 0.0  ;;  %v381_v44 = vmax.f32 %v365_v34, 0.0 }
  0x1c   : > { %v364_v26 = vadd.f32 %v815_v5, %v344_v18  ;;  %v372_v29 = vmax.f32 %v356_v21, 0.0  ;;  %v384_v39 = vpack.c.bf16 %v369_v28, %v368_v27  ;;  %v342_v52 = vmul.f32 %v724_v4, %v322_v41 }
  0x1d   : > { %v376_v32 = vmax.f32 %v360_v23, 0.0  ;;  %v343_v53 = vmul.f32 %v724_v4, %v323_v42  ;;  %v346_v54 = vmul.f32 %v724_v4, %v326_v49  ;;  %v347_v55 = vmul.f32 %v724_v4, %v327_v50 }
  0x1e   : > { %v380_v35 = vmax.f32 %v364_v26, 0.0  ;;  %v386_v40 = vpack.c.bf16 %v373_v30, %v372_v29  ;;  %700 = vmatmul.msk.bf16.vlgmr.msra.gmra.mxu0 %vm400_vm1, %v384_v39  ;;  %v354_v56 = vadd.f32 %v815_v5, %v334_v45  ;;  %v355_v57 = vadd.f32 %v815_v5, %v335_v46 }
  0x1f   : > { %v388_v43 = vpack.c.bf16 %v377_v33, %v376_v32  ;;  %v358_v58 = vadd.f32 %v815_v5, %v338_v47  ;;  %v359_v59 = vadd.f32 %v815_v5, %v339_v48  ;;  %v362_v60 = vadd.f32 %v815_v5, %v342_v52 }
  0x20   : > { %702 = vmatmul.msk.bf16.vlgmr.msra.gmra.mxu1 %vm400_vm1, %v386_v40  ;;  %v390_v51 = vpack.c.bf16 %v381_v44, %v380_v35  ;;  %v363_v61 = vadd.f32 %v815_v5, %v343_v53  ;;  %v366_v62 = vadd.f32 %v815_v5, %v346_v54  ;;  %v367_v63 = vadd.f32 %v815_v5, %v347_v55 }
  0x21   : > { %704 = vmatmul.msk.bf16.vlgmr.msra.gmra.mxu2 %vm400_vm1, %v388_v43  ;;  %v370_v0 = vmax.f32 %v354_v56, 0.0  ;;  %v371_v1 = vmax.f32 %v355_v57, 0.0  ;;  %v374_v2 = vmax.f32 %v358_v58, 0.0  ;;  %v375_v3 = vmax.f32 %v359_v59, 0.0 }
  0x22   : > { %706 = vmatmul.msk.bf16.vlgmr.msra.gmra.mxu3 %vm400_vm1, %v390_v51  ;;  %v378_v4 = vmax.f32 %v362_v60, 0.0  ;;  %v379_v6 = vmax.f32 %v363_v61, 0.0  ;;  %v382_v7 = vmax.f32 %v366_v62, 0.0  ;;  %v383_v8 = vmax.f32 %v367_v63, 0.0 }
  0x23   : > { %v385_v9 = vpack.c.bf16 %v371_v1, %v370_v0  ;;  %v387_v10 = vpack.c.bf16 %v375_v3, %v374_v2 }
  0x24   : > { %v389_v11 = vpack.c.bf16 %v379_v6, %v378_v4  ;;  %v391_v12 = vpack.c.bf16 %v383_v8, %v382_v7 }
  0x2e   : > { %701 = vmatmul.msk.bf16.gmra.mxu0 %vm400_vm1, %v385_v9 }
  0x30   : > { %703 = vmatmul.msk.bf16.gmra.mxu1 %vm400_vm1, %v387_v10 }
  0x31   : > { %705 = vmatmul.msk.bf16.gmra.mxu2 %vm400_vm1, %v389_v11 }
  0x32   : > { %707 = vmatmul.msk.bf16.gmra.mxu3 %vm400_vm1, %v391_v12 }
  0x9b   : > { %v434_v5 = vpop.f32.mrf.mxu0 }
  0x9c   : > { %474 = vst.msk [vmem:[%s801_s14] sm:$0xff] %vm400_vm1, %v434_v5  ;;  %v525_v23 = vmul.f32 %v434_v5, %v434_v5  ;;  %v491_v26 = vsel %vm400_vm1, %v434_v5, 0.0 }
  0x9d   : > { %v444_v13 = vpop.f32.mrf.mxu1 }
  0x9e   : > { %478 = vst.msk [vmem:[%s801_s14 + $0x20] sm:$0xff] %vm400_vm1, %v444_v13  ;;  %v541_v30 = vsel %vm400_vm1, %v525_v23, 0.0  ;;  %v529_v37 = vmul.f32 %v444_v13, %v444_v13  ;;  %v498_v43 = vsel %vm400_vm1, %v444_v13, 0.0 }
  0xa0   : > { %v548_v48 = vsel %vm400_vm1, %v529_v37, 0.0 }
  0xa3   : > { %v436_v15 = vpop.f32.mrf.mxu0 }
  0xa4   : > { %v859_v14 = vpop.f32.mrf.mxu2  ;;  %475 = vst.msk [vmem:[%s801_s14 + $0x8] sm:$0xff] %vm400_vm1, %v436_v15  ;;  %v526_v21 = vmul.f32 %v436_v15, %v436_v15  ;;  %v492_v24 = vsel %vm400_vm1, %v436_v15, 0.0 }
  0xa5   : > { %v446_v16 = vpop.f32.mrf.mxu1  ;;  %482 = vst.msk [vmem:[%s801_s14 + $0x40] sm:$0xff] %vm400_vm1, %v859_v14  ;;  %v866_v17 = vpop.f32.mrf.mxu3  ;;  %v493_v29 = vadd.f32 %v492_v24, %v491_v26  ;;  %v533_v59 = vmul.f32 %v859_v14, %v859_v14  ;;  %v506_v1 = vsel %vm400_vm1, %v859_v14, 0.0 }
  0xa6   : > { %479 = vst.msk [vmem:[%s801_s14 + $0x28] sm:$0xff] %vm400_vm1, %v446_v16  ;;  %v542_v27 = vsel %vm400_vm1, %v526_v21, 0.0  ;;  %v530_v44 = vmul.f32 %v446_v16, %v446_v16  ;;  %v500_v49 = vsel %vm400_vm1, %v446_v16, 0.0  ;;  %v537_v16 = vmul.f32 %v866_v17, %v866_v17 }
  0xa7   : > { %486 = vst.msk [vmem:[%s801_s14 + $0x60] sm:$0xff] %vm400_vm1, %v866_v17  ;;  %v543_v33 = vadd.f32 %v542_v27, %v541_v30  ;;  %v556_v7 = vsel %vm400_vm1, %v533_v59, 0.0 }
  0xa8   : > { %v550_v53 = vsel %vm400_vm1, %v530_v44, 0.0 }
  0xab   : > { %v439_v19 = vpop.f32.mrf.mxu0 }
  0xac   : > { %v873_v18 = vpop.f32.mrf.mxu2  ;;  %476 = vst.msk [vmem:[%s801_s14 + $0x10] sm:$0xff] %vm400_vm1, %v439_v19  ;;  %v527_v25 = vmul.f32 %v439_v19, %v439_v19  ;;  %v494_v28 = vsel %vm400_vm1, %v439_v19, 0.0 }
  0xad   : > { %v449_v20 = vpop.f32.mrf.mxu1  ;;  %483 = vst.msk [vmem:[%s801_s14 + $0x48] sm:$0xff] %vm400_vm1, %v873_v18  ;;  %v880_v22 = vpop.f32.mrf.mxu3  ;;  %v495_v34 = vadd.f32 %v494_v28, %v493_v29  ;;  %v534_v2 = vmul.f32 %v873_v18, %v873_v18  ;;  %v508_v8 = vsel %vm400_vm1, %v873_v18, 0.0  ;;  %v514_v18 = vsel %vm400_vm1, %v866_v17, 0.0 }
  0xae   : > { %480 = vst.msk [vmem:[%s801_s14 + $0x30] sm:$0xff] %vm400_vm1, %v449_v20  ;;  %v544_v31 = vsel %vm400_vm1, %v527_v25, 0.0  ;;  %v531_v50 = vmul.f32 %v449_v20, %v449_v20  ;;  %v502_v54 = vsel %vm400_vm1, %v449_v20, 0.0  ;;  %v538_v24 = vmul.f32 %v880_v22, %v880_v22 }
  0xaf   : > { %487 = vst.msk [vmem:[%s801_s14 + $0x68] sm:$0xff] %vm400_vm1, %v880_v22  ;;  %v545_v41 = vadd.f32 %v544_v31, %v543_v33  ;;  %v558_v12 = vsel %vm400_vm1, %v534_v2, 0.0  ;;  %v564_v28 = vsel %vm400_vm1, %v537_v16, 0.0  ;;  %v516_v29 = vsel %vm400_vm1, %v880_v22, 0.0 }
  0xb0   : > { %v552_v60 = vsel %vm400_vm1, %v531_v50, 0.0  ;;  %v566_v33 = vsel %vm400_vm1, %v538_v24, 0.0 }
  0xb3   : > { %v441_v35 = vpop.f32.mrf.mxu0 }
  0xb4   : > { %v459_v32 = vpop.f32.mrf.mxu2  ;;  %477 = vst.msk [vmem:[%s801_s14 + $0x18] sm:$0xff] %vm400_vm1, %v441_v35  ;;  %v496_v38 = vsel %vm400_vm1, %v441_v35, 0.0  ;;  %v528_v39 = vmul.f32 %v441_v35, %v441_v35 }
  0xb5   : > { %v451_v36 = vpop.f32.mrf.mxu1  ;;  %484 = vst.msk [vmem:[%s801_s14 + $0x50] sm:$0xff] %vm400_vm1, %v459_v32  ;;  %v469_v40 = vpop.f32.mrf.mxu3  ;;  %v497_v42 = vadd.f32 %v496_v38, %v495_v34  ;;  %v535_v9 = vmul.f32 %v459_v32, %v459_v32  ;;  %v510_v5 = vsel %vm400_vm1, %v459_v32, 0.0  ;;  %v490_v38 = vld [vmem:[#allocation2] sm:$0xff] }
  0xb6   : > { %481 = vst.msk [vmem:[%s801_s14 + $0x38] sm:$0xff] %vm400_vm1, %v451_v36  ;;  %v546_v45 = vsel %vm400_vm1, %v528_v39, 0.0  ;;  %v532_v55 = vmul.f32 %v451_v36, %v451_v36  ;;  %v504_v61 = vsel %vm400_vm1, %v451_v36, 0.0  ;;  %v539_v30 = vmul.f32 %v469_v40, %v469_v40 }
  0xb7   : > { %488 = vst.msk [vmem:[%s801_s14 + $0x70] sm:$0xff] %vm400_vm1, %v469_v40  ;;  %v499_v46 = vadd.f32 %v498_v43, %v497_v42  ;;  %v547_v47 = vadd.f32 %v546_v45, %v545_v41  ;;  %v560_v19 = vsel %vm400_vm1, %v535_v9, 0.0  ;;  %v518_v34 = vsel %vm400_vm1, %v469_v40, 0.0  ;;  %v524_v43 = vld [vmem:[#allocation3] sm:$0xff] }
  0xb8   : > { %v554_v3 = vsel %vm400_vm1, %v532_v55, 0.0  ;;  %v568_v37 = vsel %vm400_vm1, %v539_v30, 0.0 }
  0xb9   : > { %v549_v51 = vadd.f32 %v548_v48, %v547_v47  ;;  %v501_v52 = vadd.f32 %v500_v49, %v499_v46 }
  0xbb   : > { %v503_v57 = vadd.f32 %v502_v54, %v501_v52  ;;  %v551_v58 = vadd.f32 %v550_v53, %v549_v51 }
  0xbc   : > { %v461_v56 = vpop.f32.mrf.mxu2 }
  0xbd   : > { %485 = vst.msk [vmem:[%s801_s14 + $0x58] sm:$0xff] %vm400_vm1, %v461_v56  ;;  %v471_v62 = vpop.f32.mrf.mxu3  ;;  %v505_v63 = vadd.f32 %v504_v61, %v503_v57  ;;  %v553_v0 = vadd.f32 %v552_v60, %v551_v58  ;;  %v536_v13 = vmul.f32 %v461_v56, %v461_v56  ;;  %v512_v20 = vsel %vm400_vm1, %v461_v56, 0.0 }
  0xbe   : > { %489 = vst.msk [vmem:[%s801_s14 + $0x78] sm:$0xff] %vm400_vm1, %v471_v62  ;;  %v540_v17 = vmul.f32 %v471_v62, %v471_v62  ;;  %v520_v39 = vsel %vm400_vm1, %v471_v62, 0.0 }
  0xbf   : > { %v507_v4 = vadd.f32 %v506_v1, %v505_v63  ;;  %v555_v6 = vadd.f32 %v554_v3, %v553_v0  ;;  %v562_v25 = vsel %vm400_vm1, %v536_v13, 0.0 }
  0xc0   : > { %v570_v22 = vsel %vm400_vm1, %v540_v17, 0.0 }
  0xc1   : > { %v557_v10 = vadd.f32 %v556_v7, %v555_v6  ;;  %v509_v11 = vadd.f32 %v508_v8, %v507_v4 }
  0xc3   : > { %v511_v14 = vadd.f32 %v510_v5, %v509_v11  ;;  %v559_v15 = vadd.f32 %v558_v12, %v557_v10 }
  0xc5   : > { %v561_v21 = vadd.f32 %v560_v19, %v559_v15  ;;  %v513_v23 = vadd.f32 %v512_v20, %v511_v14 }
  0xc7   : > { %v515_v26 = vadd.f32 %v514_v18, %v513_v23  ;;  %v563_v27 = vadd.f32 %v562_v25, %v561_v21 }
  0xc9   : > { %v565_v31 = vadd.f32 %v564_v28, %v563_v27  ;;  %v517_v32 = vadd.f32 %v516_v29, %v515_v26 }
  0xcb   : > { %v519_v35 = vadd.f32 %v518_v34, %v517_v32  ;;  %v567_v36 = vadd.f32 %v566_v33, %v565_v31 }
  0xcd   : > { %v569_v41 = vadd.f32 %v568_v37, %v567_v36  ;;  %v521_v42 = vadd.f32 %v520_v39, %v519_v35 }
  0xcf   : > { %v522_v44 = vadd.f32 %v521_v42, %v490_v38  ;;  %v571_v45 = vadd.f32 %v570_v22, %v569_v41  ;;  %577 = sbr.rel (%p708_p5) target bundleno = 265 (0x109), region = 52 }
  0xd1   : > { %523 = vst.msk [vmem:[#allocation2] sm:$0xff] %vm400_vm1, %v522_v44  ;;  %v572_v46 = vadd.f32 %v571_v45, %v524_v43 }
  0xd3   : > { %573 = vst.msk [vmem:[#allocation3] sm:$0xff] %vm400_vm1, %v572_v46 }
  0xd4   : > { %v599_v10 = vld [vmem:[%s967_s4] sm:$0x1]  ;;  %vm612_vm5 = vcmask 122880  }
  0xd5   : > { %v614_v13 = vld [vmem:[%s968_s5] sm:$0x1] }
  0xd8   : > { %v578_v40 = vld [vmem:[#allocation2] sm:$0xff] }
  0xd9   : > { %v579_v48 = vsel %vm400_vm1, %v578_v40, 0.0 }
  0xda   : > { %v587_v47 = vld [vmem:[#allocation3] sm:$0xff]  ;;  %v580_v50 = vrot.slane %v579_v48, 4 }
  0xdb   : > { %v588_v49 = vsel %vm400_vm1, %v587_v47, 0.0 }
  0xdc   : > { %v589_v51 = vrot.slane %v588_v49, 4  ;;  %v581_v52 = vadd.f32 %v580_v50, %v579_v48 }
  0xde   : > { %v590_v53 = vadd.f32 %v589_v51, %v588_v49  ;;  %v582_v54 = vrot.slane %v581_v52, 2 }
  0xe0   : > { %v591_v55 = vrot.slane %v590_v53, 2  ;;  %v583_v56 = vadd.f32 %v582_v54, %v581_v52 }
  0xe2   : > { %v592_v57 = vadd.f32 %v591_v55, %v590_v53  ;;  %v584_v58 = vrot.slane %v583_v56, 1 }
  0xe4   : > { %v593_v59 = vrot.slane %v592_v57, 1  ;;  %v585_v60 = vadd.f32 %v584_v58, %v583_v56 }
  0xe6   : > { %v594_v61 = vadd.f32 %v593_v59, %v592_v57  ;;  %v586_v62 = vmul.f32 0.001953125, %v585_v60 }
  0xe8   : > { %v595_v63 = vmul.f32 0.001953125, %v594_v61  ;;  %v596_v0 = vmul.f32 %v586_v62, %v586_v62 }
  0xea   : > { %v597_v1 = vsub.f32 %v595_v63, %v596_v0 }
  0xec   : > { %v598_v2 = vmax.f32 %v597_v1, 0.0 }
  0xee   : > { %v600_v3 = vadd.f32 1e-05, %v598_v2 }
  0xf0   : > { %726 = vrsqrt.f32 %v600_v3  ;;  %vm607_vm2 = vweird.f32 %v600_v3 }
  0xf6   : > { %v727_v4 = vpop.eup %726 }
  0xf7   : > { %v602_v6 = vmul.f32 %v727_v4, %v600_v3  ;;  %vm608_vm3 = vweird.f32 %v727_v4 }
  0xf8   : > { %vm609_vm4 = vmor %vm607_vm2, %vm608_vm3 }
  0xf9   : > { %v603_v7 = vmul.f32 %v727_v4, %v602_v6 }
  0xfb   : > { %v604_v8 = vmul.f32 0.5, %v603_v7 }
  0xfd   : > { %v605_v9 = vsub.f32 1.5, %v604_v8 }
  0xff   : > { %v606_v11 = vmul.f32 %v727_v4, %v605_v9 }
 0x101   : > { %v610_v12 = vsel %vm609_vm4, %v727_v4, %v606_v11 }
 0x102   : > { %v611_v5 = vmul.f32 %v610_v12, %v599_v10 }
 0x104   : > { %613 = vst.msk [vmem:[%s970_s7] sm:$0x1] %vm612_vm5, %v611_v5  ;;  %v615_v14 = vmul.f32 %v611_v5, %v586_v62 }
 0x106   : > { %v616_v15 = vsub.f32 %v614_v13, %v615_v14 }
 0x108   : > { %617 = vst.msk [vmem:[%s971_s8] sm:$0x1] %vm612_vm5, %v616_v15 }
 0x109 PF: > { %s19_s27 = sadd.s32 1, %s734_s27  }
 0x10a   : > { %p16_p6 = scmp.ge.s32.totalorder %s19_s27, 6  }
 0x10c   :  { %18 = sbr.rel (!%p16_p6) target bundleno = 1 (0x1), region = 98 }

// kernel: gen_bottleneck_forward.5
= control target key start
LH: loop header
LB: loop body
LE: loop exit
PB: predicated region body
PF: predicated region fallthrough
CT: control target
= control target key end

     0   :  { %s3498_s15 = smov 0   ;;  %s3500_s16 = smov 0   ;;  %s4385_s0 = inlined_call_operand.vmem [shape: f32[2,18,18,16], index: 0, kind: input, shape index: {}]   ;;  %s4386_s1 = inlined_call_operand.vmem [shape: f32[1,16], index: 1, kind: input, shape index: {}]   ;;  %s4387_s2 = inlined_call_operand.vmem [shape: f32[1,16], index: 2, kind: input, shape index: {}]   ;;  %s4388_s3 = inlined_call_operand.vmem [shape: bf16[9,16,4], index: 3, kind: input, shape index: {}]   ;;  %s4389_s4 = inlined_call_operand.vmem [shape: f32[2,16,16,4], index: 4, kind: output, shape index: {}]  }
   0x1   :  { %s3502_s17 = smov 0   ;;  %s3504_s18 = smov 0  }
   0x2   :  { %s3506_s19 = smov 0  }
   0x3 LB: > { %s23_s20 = sadd.s32 1, %s3460_s17  ;;  %s26_s21 = sadd.s32 1, %s3464_s18  ;;  %s3468_s19 = sphi %s3506_s19, %s14_s19   ;;  %s3464_s18 = sphi %s3504_s18, %s4401_s18   ;;  %s3460_s17 = sphi %s3502_s17, %s4400_s17   ;;  %s3456_s16 = sphi %s3500_s16, %s4399_s16   ;;  %s3452_s15 = sphi %s3498_s15, %s4398_s15  }
   0x4   : > { %p24_p0 = scmp.ge.s32.totalorder %s23_s20, 2  ;;  %p3092_p1 = scmp.ge.s32.totalorder %s3468_s19, 1 }
   0x5   : > { %p176_p2 = scmp.lt.s32.totalorder %s3468_s19, 5 }
   0x6   : > { %s4403_s20 = smov (%p24_p0, %s23_s20), 0  ;;  %s4405_s21 = smov (!%p24_p0, %s26_s21), %s3464_s18 }
   0x7   : > { %p177_p3 = pnand %p3092_p1, %p176_p2  ;;  %p28_p4 = scmp.ge.s32.totalorder %s4405_s21, 2 }
   0x8   : > { %p207_p5 = scmp.lt.s32.totalorder (!%p177_p3), %s3456_s16, 1  ;;  %s3094_s22 = sshll.u32 (!%p177_p3), %s3452_s15, 3 }
   0x9   : > { %s4407_s21 = smov (%p28_p4, %s4405_s21), 0  ;;  %180 = sbr.rel (%p177_p3) target bundleno = 545 (0x221), region = 36 }
   0xa   : > { %p215_p6 = scmp.lt.s32.totalorder (!%p177_p3), %s3094_s22, 15  ;;  %s3099_s23 = smul.u32 (!%p177_p3), 192, %s3452_s15 }
   0xb   : > { %p3100_p7 = scmp.ne.s32.totalorder (!%p177_p3), %s3452_s15, 0 }
   0xe   : > { %s4409_s16 = smov (!%p207_p5, %s3456_s16), 1  ;;  %s4411_s22 = smov (!%p215_p6, %s3094_s22), 15  ;;  %v3535_v0 = vld [vmem:[%s4386_s1] ss:$0 sm:$0xff]  ;;  %vm385_vm0 = vcmask 125952   ;;  %vm388_vm1 = vcmask 122880  }
   0xf   : > { %s3384_s24 = smul.u32 432, %s4409_s16  ;;  %s3096_s25 = sshll.u32 %s4409_s16, 5  ;;  %v3545_v1 = vld [vmem:[%s4387_s2] ss:$0 sm:$0xff]  ;;  %vm418_vm2 = vsmask.f32 256 }
  0x10   : > { %s3095_s26 = sshll.u32 %s4411_s22, 1  ;;  %vm3669_vm3 = vmand %vm388_vm1, %vm418_vm2  ;;  %vm450_vm4 = vsmask.f32 7938 }
  0x11   : > { %s211_s5 = scalar_lea.vmem %s4385_s0, %s3384_s24  ;;  %s219_s6 = sadd.s32 %s3096_s25, %s3095_s26  ;;  %vm3695_vm5 = vmand %vm388_vm1, %vm450_vm4 }
  0x12   : > { %s3097_s7 = sshll.u32 %s219_s6, 3  ;;  %s3540_s8 = scalar_lea.vmem %s211_s5, %s3099_s23 }
  0x13   : > { %s3550_s13 = scalar_lea.vmem %s4389_s4, %s3097_s7  ;;  %v227_v2 = vld [vmem:[%s3540_s8] sm:$0xff]  ;;  %v229_v3 = vld [vmem:[%s3540_s8 + $0x10] sm:$0x3]  ;;  %v230_v4 = vld [vmem:[%s3540_s8 + $0x18] sm:$0xff] }
  0x14   : > { %v261_v5 = vmul.f32 %v3535_v0, %v227_v2  ;;  %v263_v6 = vmul.f32 %v3535_v0, %v229_v3  ;;  %v264_v7 = vmul.f32 %v3535_v0, %v230_v4  ;;  %v232_v8 = vld [vmem:[%s3540_s8 + $0x28] sm:$0x3]  ;;  %v233_v9 = vld [vmem:[%s3540_s8 + $0x30] sm:$0xff]  ;;  %v235_v10 = vld [vmem:[%s3540_s8 + $0x40] sm:$0x3] }
  0x15   : > { %v266_v11 = vmul.f32 %v3535_v0, %v232_v8  ;;  %v267_v12 = vmul.f32 %v3535_v0, %v233_v9  ;;  %v269_v13 = vmul.f32 %v3535_v0, %v235_v10  ;;  %v236_v14 = vld [vmem:[%s3540_s8 + $0x48] sm:$0xff]  ;;  %v238_v15 = vld [vmem:[%s3540_s8 + $0x58] sm:$0x3]  ;;  %v239_v28 = vld [vmem:[%s3540_s8 + $0x60] sm:$0xff] }
  0x16   : > { %v295_v16 = vadd.f32 %v3545_v1, %v261_v5  ;;  %v297_v17 = vadd.f32 %v3545_v1, %v263_v6  ;;  %v298_v18 = vadd.f32 %v3545_v1, %v264_v7  ;;  %v270_v19 = vmul.f32 %v3535_v0, %v236_v14  ;;  %v241_v33 = vld [vmem:[%s3540_s8 + $0x70] sm:$0x3]  ;;  %v242_v34 = vld [vmem:[%s3540_s8 + $0x78] sm:$0xff]  ;;  %v244_v39 = vld [vmem:[%s3540_s8 + $0x88] sm:$0x3] }
  0x17   : > { %v300_v20 = vadd.f32 %v3545_v1, %v266_v11  ;;  %v301_v21 = vadd.f32 %v3545_v1, %v267_v12  ;;  %v303_v22 = vadd.f32 %v3545_v1, %v269_v13  ;;  %v272_v23 = vmul.f32 %v3535_v0, %v238_v15  ;;  %v245_v40 = vld [vmem:[%s3540_s8 + $0x90] sm:$0xff]  ;;  %v247_v41 = vld [vmem:[%s3540_s8 + $0xa0] sm:$0x3]  ;;  %v248_v46 = vld [vmem:[%s3540_s8 + $0xa8] sm:$0xff] }
  0x18   : > { %v325_v24 = vmax.f32 %v295_v16, 0.0  ;;  %v327_v25 = vmax.f32 %v297_v17, 0.0  ;;  %v328_v26 = vmax.f32 %v298_v18, 0.0  ;;  %v304_v27 = vadd.f32 %v3545_v1, %v270_v19  ;;  %v250_v51 = vld [vmem:[%s3540_s8 + $0xb8] sm:$0x3]  ;;  %v251_v7 = vld [vmem:[%s3540_s8 + $0xc0] sm:$0xff] }
  0x19   : > { %v330_v29 = vmax.f32 %v300_v20, 0.0  ;;  %v331_v30 = vmax.f32 %v301_v21, 0.0  ;;  %v333_v31 = vmax.f32 %v303_v22, 0.0  ;;  %v306_v32 = vadd.f32 %v3545_v1, %v272_v23  ;;  %v253_v2 = vld [vmem:[%s3540_s8 + $0xd0] sm:$0x3]  ;;  %v254_v13 = vld [vmem:[%s3540_s8 + $0xd8] sm:$0xff] }
  0x1a   : > { %v355_v35 = vpack.c.bf16 %v325_v24, %v325_v24  ;;  %v357_v36 = vpack.c.bf16 %v327_v25, %v327_v25  ;;  %v358_v37 = vpack.c.bf16 %v328_v26, %v328_v26  ;;  %v334_v38 = vmax.f32 %v304_v27, 0.0  ;;  %v256_v8 = vld [vmem:[%s3540_s8 + $0xe8] sm:$0x3]  ;;  %v231_v19 = vld [vmem:[%s3540_s8 + $0x20] sm:$0xff]  ;;  %v234_v24 = vld [vmem:[%s3540_s8 + $0x38] sm:$0xff] }
  0x1b   : > { %v360_v42 = vpack.c.bf16 %v330_v29, %v330_v29  ;;  %v361_v43 = vpack.c.bf16 %v331_v30, %v331_v30  ;;  %v363_v44 = vpack.c.bf16 %v333_v31, %v333_v31  ;;  %v336_v45 = vmax.f32 %v306_v32, 0.0  ;;  %v228_v18 = vld [vmem:[%s3540_s8 + $0x8] sm:$0xff]  ;;  %v237_v29 = vld [vmem:[%s3540_s8 + $0x50] sm:$0xff] }
  0x1c   : > { %386 = vst.msk [vmem:[#allocation2] sm:$0xf] %vm385_vm0, %v355_v35  ;;  %v364_v47 = vpack.c.bf16 %v334_v38, %v334_v38  ;;  %v273_v48 = vmul.f32 %v3535_v0, %v239_v28  ;;  %v275_v49 = vmul.f32 %v3535_v0, %v241_v33  ;;  %v276_v50 = vmul.f32 %v3535_v0, %v242_v34 }
  0x1d   : > { %389 = vst.msk [vmem:[#allocation2 + $0x8] sm:$0x1] %vm388_vm1, %v357_v36  ;;  %v366_v52 = vpack.c.bf16 %v336_v45, %v336_v45  ;;  %v278_v53 = vmul.f32 %v3535_v0, %v244_v39  ;;  %v279_v54 = vmul.f32 %v3535_v0, %v245_v40  ;;  %v281_v55 = vmul.f32 %v3535_v0, %v247_v41 }
  0x1e   : > { %390 = vst.msk [vmem:[#allocation2 + $0xc] sm:$0xf] %vm385_vm0, %v358_v37  ;;  %v307_v56 = vadd.f32 %v3545_v1, %v273_v48  ;;  %v309_v57 = vadd.f32 %v3545_v1, %v275_v49  ;;  %v310_v58 = vadd.f32 %v3545_v1, %v276_v50  ;;  %v282_v59 = vmul.f32 %v3535_v0, %v248_v46 }
  0x1f   : > { %392 = vst.msk [vmem:[#allocation2 + $0x14] sm:$0x1] %vm388_vm1, %v360_v42  ;;  %v312_v60 = vadd.f32 %v3545_v1, %v278_v53  ;;  %v313_v61 = vadd.f32 %v3545_v1, %v279_v54  ;;  %v315_v62 = vadd.f32 %v3545_v1, %v281_v55  ;;  %v284_v63 = vmul.f32 %v3535_v0, %v250_v51  ;;  %v240_v42 = vld [vmem:[%s3540_s8 + $0x68] sm:$0xff] }
  0x20   : > { %393 = vst.msk [vmem:[#allocation2 + $0x18] sm:$0xf] %vm385_vm0, %v361_v43  ;;  %v337_v3 = vmax.f32 %v307_v56, 0.0  ;;  %v339_v4 = vmax.f32 %v309_v57, 0.0  ;;  %v340_v5 = vmax.f32 %v310_v58, 0.0  ;;  %v316_v6 = vadd.f32 %v3545_v1, %v282_v59  ;;  %v249_v57 = vld [vmem:[%s3540_s8 + $0xb0] sm:$0xff] }
  0x21   : > { %395 = vst.msk [vmem:[#allocation2 + $0x20] sm:$0x1] %vm388_vm1, %v363_v44  ;;  %v342_v9 = vmax.f32 %v312_v60, 0.0  ;;  %v343_v10 = vmax.f32 %v313_v61, 0.0  ;;  %v345_v11 = vmax.f32 %v315_v62, 0.0  ;;  %v318_v12 = vadd.f32 %v3545_v1, %v284_v63  ;;  %v252_v58 = vld [vmem:[%s3540_s8 + $0xc8] sm:$0xff] }
  0x22   : > { %396 = vst.msk [vmem:[#allocation2 + $0x24] sm:$0xf] %vm385_vm0, %v364_v47  ;;  %v367_v14 = vpack.c.bf16 %v337_v3, %v337_v3  ;;  %v369_v15 = vpack.c.bf16 %v339_v4, %v339_v4  ;;  %v370_v16 = vpack.c.bf16 %v340_v5, %v340_v5  ;;  %v346_v17 = vmax.f32 %v316_v6, 0.0  ;;  %v243_v47 = vld [vmem:[%s3540_s8 + $0x80] sm:$0xff] }
  0x23   : > { %398 = vst.msk [vmem:[#allocation2 + $0x2c] sm:$0x1] %vm388_vm1, %v366_v52  ;;  %v372_v20 = vpack.c.bf16 %v342_v9, %v342_v9  ;;  %v373_v21 = vpack.c.bf16 %v343_v10, %v343_v10  ;;  %v375_v22 = vpack.c.bf16 %v345_v11, %v345_v11  ;;  %v348_v23 = vmax.f32 %v318_v12, 0.0  ;;  %v246_v52 = vld [vmem:[%s3540_s8 + $0x98] sm:$0xff]  ;;  %v255_v59 = vld [vmem:[%s3540_s8 + $0xe0] sm:$0xff] }
  0x24   : > { %399 = vst.msk [vmem:[#allocation2 + $0x30] sm:$0xf] %vm385_vm0, %v367_v14  ;;  %v376_v25 = vpack.c.bf16 %v346_v17, %v346_v17  ;;  %v285_v26 = vmul.f32 %v3535_v0, %v251_v7  ;;  %v287_v27 = vmul.f32 %v3535_v0, %v253_v2  ;;  %v288_v28 = vmul.f32 %v3535_v0, %v254_v13 }
  0x25   : > { %401 = vst.msk [vmem:[#allocation2 + $0x38] sm:$0x1] %vm388_vm1, %v369_v15  ;;  %v378_v30 = vpack.c.bf16 %v348_v23, %v348_v23  ;;  %v290_v31 = vmul.f32 %v3535_v0, %v256_v8  ;;  %v262_v32 = vmul.f32 %v3535_v0, %v228_v18  ;;  %v265_v33 = vmul.f32 %v3535_v0, %v231_v19 }
  0x26   : > { %402 = vst.msk [vmem:[#allocation2 + $0x3c] sm:$0xf] %vm385_vm0, %v370_v16  ;;  %v319_v34 = vadd.f32 %v3545_v1, %v285_v26  ;;  %v321_v35 = vadd.f32 %v3545_v1, %v287_v27  ;;  %v322_v36 = vadd.f32 %v3545_v1, %v288_v28  ;;  %v268_v37 = vmul.f32 %v3535_v0, %v234_v24  ;;  %v420_v26 = vld [vmem:[#allocation2] sm:$0x1]  ;;  %v423_v28 = vld [vmem:[#allocation2 + $0xc] sm:$0x1] }
  0x27   : > { %404 = vst.msk [vmem:[#allocation2 + $0x44] sm:$0x1] %vm388_vm1, %v372_v20  ;;  %v324_v38 = vadd.f32 %v3545_v1, %v290_v31  ;;  %v296_v39 = vadd.f32 %v3545_v1, %v262_v32  ;;  %v299_v40 = vadd.f32 %v3545_v1, %v265_v33  ;;  %v271_v41 = vmul.f32 %v3535_v0, %v237_v29  ;;  %v426_v29 = vld [vmem:[#allocation2 + $0x18] sm:$0x1] }
  0x28   : > { %405 = vst.msk [vmem:[#allocation2 + $0x48] sm:$0xf] %vm385_vm0, %v373_v21  ;;  %v349_v43 = vmax.f32 %v319_v34, 0.0  ;;  %v351_v44 = vmax.f32 %v321_v35, 0.0  ;;  %v352_v45 = vmax.f32 %v322_v36, 0.0  ;;  %v302_v46 = vadd.f32 %v3545_v1, %v268_v37 }
  0x29   : > { %407 = vst.msk [vmem:[#allocation2 + $0x50] sm:$0x1] %vm388_vm1, %v375_v22  ;;  %v354_v48 = vmax.f32 %v324_v38, 0.0  ;;  %v326_v49 = vmax.f32 %v296_v39, 0.0  ;;  %v329_v50 = vmax.f32 %v299_v40, 0.0  ;;  %v305_v51 = vadd.f32 %v3545_v1, %v271_v41 }
  0x2a   : > { %408 = vst.msk [vmem:[#allocation2 + $0x54] sm:$0xf] %vm385_vm0, %v376_v25  ;;  %v379_v53 = vpack.c.bf16 %v349_v43, %v349_v43  ;;  %v381_v54 = vpack.c.bf16 %v351_v44, %v351_v44  ;;  %v382_v55 = vpack.c.bf16 %v352_v45, %v352_v45  ;;  %v332_v56 = vmax.f32 %v302_v46, 0.0  ;;  %v452_v46 = vld [vmem:[#allocation2 + $0x8] sm:$0x1] }
  0x2b   : > { %410 = vst.msk [vmem:[#allocation2 + $0x5c] sm:$0x1] %vm388_vm1, %v378_v30  ;;  %v384_v60 = vpack.c.bf16 %v354_v48, %v354_v48  ;;  %v356_v61 = vpack.c.bf16 %v326_v49, %v326_v49  ;;  %v335_v62 = vmax.f32 %v305_v51, 0.0  ;;  %v359_v63 = vpack.c.bf16 %v329_v50, %v329_v50  ;;  %v429_v30 = vld [vmem:[#allocation2 + $0x24] sm:$0x1] }
  0x2c   : > { %411 = vst.msk [vmem:[#allocation2 + $0x60] sm:$0xf] %vm385_vm0, %v379_v53  ;;  %v274_v2 = vmul.f32 %v3535_v0, %v240_v42  ;;  %v277_v3 = vmul.f32 %v3535_v0, %v243_v47  ;;  %v280_v4 = vmul.f32 %v3535_v0, %v246_v52  ;;  %v362_v5 = vpack.c.bf16 %v332_v56, %v332_v56  ;;  %v432_v32 = vld [vmem:[#allocation2 + $0x30] sm:$0x1]  ;;  %v455_v48 = vld [vmem:[#allocation2 + $0x14] sm:$0x1] }
  0x2d   : > { %413 = vst.msk [vmem:[#allocation2 + $0x68] sm:$0x1] %vm388_vm1, %v381_v54  ;;  %v283_v6 = vmul.f32 %v3535_v0, %v249_v57  ;;  %v286_v7 = vmul.f32 %v3535_v0, %v252_v58  ;;  %v289_v8 = vmul.f32 %v3535_v0, %v255_v59  ;;  %v365_v9 = vpack.c.bf16 %v335_v62, %v335_v62  ;;  %v435_v34 = vld [vmem:[#allocation2 + $0x3c] sm:$0x1]  ;;  %v458_v50 = vld [vmem:[#allocation2 + $0x20] sm:$0x1] }
  0x2e   : > { %414 = vst.msk [vmem:[#allocation2 + $0x6c] sm:$0xf] %vm385_vm0, %v382_v55  ;;  %v308_v10 = vadd.f32 %v3545_v1, %v274_v2  ;;  %v311_v11 = vadd.f32 %v3545_v1, %v277_v3  ;;  %v314_v12 = vadd.f32 %v3545_v1, %v280_v4  ;;  %v421_v31 = vsel %vm3669_vm3, 0, %v420_v26  ;;  %v461_v52 = vld [vmem:[#allocation2 + $0x2c] sm:$0x1] }
  0x2f   : > { %416 = vst.msk [vmem:[#allocation2 + $0x74] sm:$0x1] %vm388_vm1, %v384_v60  ;;  %v317_v13 = vadd.f32 %v3545_v1, %v283_v6  ;;  %v320_v14 = vadd.f32 %v3545_v1, %v286_v7  ;;  %v323_v15 = vadd.f32 %v3545_v1, %v289_v8  ;;  %v424_v33 = vsel %vm3669_vm3, 0, %v423_v28  ;;  %v438_v36 = vld [vmem:[#allocation2 + $0x48] sm:$0x1] }
  0x30   : > { %387 = vst.msk [vmem:[#allocation2 + $0x4] sm:$0xf] %vm385_vm0, %v356_v61  ;;  %v338_v0 = vmax.f32 %v308_v10, 0.0  ;;  %v341_v16 = vmax.f32 %v311_v11, 0.0  ;;  %v344_v17 = vmax.f32 %v314_v12, 0.0  ;;  %v427_v35 = vsel %vm3669_vm3, 0, %v426_v29 }
  0x31   : > { %391 = vst.msk [vmem:[#allocation2 + $0x10] sm:$0xf] %vm385_vm0, %v359_v63  ;;  %v347_v18 = vmax.f32 %v317_v13, 0.0  ;;  %v350_v19 = vmax.f32 %v320_v14, 0.0  ;;  %v353_v20 = vmax.f32 %v323_v15, 0.0  ;;  %v430_v37 = vsel %vm3669_vm3, 0, %v429_v30 }
  0x32   : > { %394 = vst.msk [vmem:[#allocation2 + $0x1c] sm:$0xf] %vm385_vm0, %v362_v5  ;;  %v368_v21 = vpack.c.bf16 %v338_v0, %v338_v0  ;;  %v371_v22 = vpack.c.bf16 %v341_v16, %v341_v16  ;;  %v374_v23 = vpack.c.bf16 %v344_v17, %v344_v17  ;;  %v433_v38 = vsel %vm3669_vm3, 0, %v432_v32  ;;  %v441_v39 = vld [vmem:[#allocation2 + $0x54] sm:$0x1] }
  0x33   : > { %397 = vst.msk [vmem:[#allocation2 + $0x28] sm:$0xf] %vm385_vm0, %v365_v9  ;;  %v377_v24 = vpack.c.bf16 %v347_v18, %v347_v18  ;;  %v380_v1 = vpack.c.bf16 %v350_v19, %v350_v19  ;;  %v383_v27 = vpack.c.bf16 %v353_v20, %v353_v20  ;;  %v436_v40 = vsel %vm3669_vm3, 0, %v435_v34  ;;  %v444_v41 = vld [vmem:[#allocation2 + $0x60] sm:$0x1] }
  0x34   : > { %400 = vst.msk [vmem:[#allocation2 + $0x34] sm:$0xf] %vm385_vm0, %v368_v21  ;;  %v439_v42 = vsel %vm3669_vm3, 0, %v438_v36  ;;  %v442_v44 = vsel %vm3669_vm3, 0, %v441_v39  ;;  %v445_v47 = vsel %vm3669_vm3, 0, %v444_v41  ;;  %v453_v51 = vsel %vm3695_vm5, 0, %v452_v46 }
  0x35   : > { %403 = vst.msk [vmem:[#allocation2 + $0x40] sm:$0xf] %vm385_vm0, %v371_v22  ;;  %v447_v43 = vld [vmem:[#allocation2 + $0x6c] sm:$0x1]  ;;  %v456_v53 = vsel %vm3695_vm5, 0, %v455_v48  ;;  %v459_v55 = vsel %vm3695_vm5, 0, %v458_v50 }
  0x36   : > { %406 = vst.msk [vmem:[#allocation2 + $0x4c] sm:$0xf] %vm385_vm0, %v374_v23  ;;  %v448_v49 = vsel %vm3669_vm3, 0, %v447_v43  ;;  %v464_v54 = vld [vmem:[#allocation2 + $0x38] sm:$0x1]  ;;  %v462_v57 = vsel %vm3695_vm5, 0, %v461_v52 }
  0x37   : > { %409 = vst.msk [vmem:[#allocation2 + $0x58] sm:$0xf] %vm385_vm0, %v377_v24  ;;  %v467_v56 = vld [vmem:[#allocation2 + $0x44] sm:$0x1]  ;;  %v470_v58 = vld [vmem:[#allocation2 + $0x50] sm:$0x1] }
  0x38   : > { %412 = vst.msk [vmem:[#allocation2 + $0x64] sm:$0xf] %vm385_vm0, %v380_v1  ;;  %v465_v59 = vsel %vm3695_vm5, 0, %v464_v54  ;;  %v473_v60 = vld [vmem:[#allocation2 + $0x5c] sm:$0x1]  ;;  %v468_v61 = vsel %vm3695_vm5, 0, %v467_v56 }
  0x39   : > { %415 = vst.msk [vmem:[#allocation2 + $0x70] sm:$0xf] %vm385_vm0, %v383_v27  ;;  %v476_v62 = vld [vmem:[#allocation2 + $0x68] sm:$0x1]  ;;  %v471_v63 = vsel %vm3695_vm5, 0, %v470_v58  ;;  %v474_v3 = vsel %vm3695_vm5, 0, %v473_v60 }
  0x3a   : > { %422 = vst [vmem:[#allocation2] sm:$0x1] %v421_v31  ;;  %v479_v2 = vld [vmem:[#allocation2 + $0x74] sm:$0x1]  ;;  %v477_v4 = vsel %vm3695_vm5, 0, %v476_v62 }
  0x3b   : > { %425 = vst [vmem:[#allocation2 + $0xc] sm:$0x1] %v424_v33  ;;  %v480_v5 = vsel %vm3695_vm5, 0, %v479_v2 }
  0x3c   : > { %428 = vst [vmem:[#allocation2 + $0x18] sm:$0x1] %v427_v35 }
  0x3d   : > { %431 = vst [vmem:[#allocation2 + $0x24] sm:$0x1] %v430_v37 }
  0x3e   : > { %434 = vst [vmem:[#allocation2 + $0x30] sm:$0x1] %v433_v38 }
  0x3f   : > { %437 = vst [vmem:[#allocation2 + $0x3c] sm:$0x1] %v436_v40 }
  0x40   : > { %440 = vst [vmem:[#allocation2 + $0x48] sm:$0x1] %v439_v42 }
  0x41   : > { %443 = vst [vmem:[#allocation2 + $0x54] sm:$0x1] %v442_v44 }
  0x42   : > { %446 = vst [vmem:[#allocation2 + $0x60] sm:$0x1] %v445_v47 }
  0x43   : > { %449 = vst [vmem:[#allocation2 + $0x6c] sm:$0x1] %v448_v49 }
  0x44   : > { %454 = vst [vmem:[#allocation2 + $0x8] sm:$0x1] %v453_v51 }
  0x45   : > { %457 = vst [vmem:[#allocation2 + $0x14] sm:$0x1] %v456_v53 }
  0x46   : > { %460 = vst [vmem:[#allocation2 + $0x20] sm:$0x1] %v459_v55 }
  0x47   : > { %463 = vst [vmem:[#allocation2 + $0x2c] sm:$0x1] %v462_v57 }
  0x48   : > { %466 = vst [vmem:[#allocation2 + $0x38] sm:$0x1] %v465_v59 }
  0x49   : > { %469 = vst [vmem:[#allocation2 + $0x44] sm:$0x1] %v468_v61  ;;  %485 = sbr.rel (%p3100_p7) target bundleno = 82 (0x52), region = 40 }
  0x4a   : > { %472 = vst [vmem:[#allocation2 + $0x50] sm:$0x1] %v471_v63 }
  0x4b   : > { %475 = vst [vmem:[#allocation2 + $0x5c] sm:$0x1] %v474_v3 }
  0x4c   : > { %478 = vst [vmem:[#allocation2 + $0x68] sm:$0x1] %v477_v4 }
  0x4d   : > { %481 = vst [vmem:[#allocation2 + $0x74] sm:$0x1] %v480_v5 }
  0x4e   : > { %v3470_v6 = vmov 0  }
  0x4f   : > { %486 = vst.msk [vmem:[#allocation2] sm:$0xf] %vm385_vm0, %v3470_v6 }
  0x50   : > { %487 = vst.msk [vmem:[#allocation2 + $0x4] sm:$0xf] %vm385_vm0, %v3470_v6 }
  0x51   : > { %488 = vst.msk [vmem:[#allocation2 + $0x8] sm:$0x1] %vm388_vm1, %v3470_v6 }
  0x52 PF: > { %p3101_p8 = scmp.ne.s32.totalorder %s3452_s15, 1 }
  0x54   : > { %492 = sbr.rel (%p3101_p8) target bundleno = 93 (0x5d), region = 44 }
  0x59   : > { %v3471_v7 = vmov 0  }
  0x5a   : > { %494 = vst.msk [vmem:[#allocation2 + $0x6c] sm:$0xf] %vm385_vm0, %v3471_v7 }
  0x5b   : > { %495 = vst.msk [vmem:[#allocation2 + $0x70] sm:$0xf] %vm385_vm0, %v3471_v7 }
  0x5c   : > { %496 = vst.msk [vmem:[#allocation2 + $0x74] sm:$0x1] %vm388_vm1, %v3471_v7 }
  0x5d PF: > { %v3356_v8 = vld [vmem:[%s4388_s3] sm:$0xff]  ;;  %v3350_v9 = vld [vmem:[#allocation2 + $0x18] sm:$0xff]  ;;  %v3352_v10 = vld [vmem:[#allocation2 + $0x30] sm:$0xff]  ;;  %vm594_vm6 = vcmask 130048   ;;  %vm740_vm7 = vsmask.f32 3328 }
  0x5e   : > { %v3357_v11 = vld [vmem:[%s4388_s3 + $0x8] sm:$0xff]  ;;  %v3358_v12 = vld [vmem:[%s4388_s3 + $0x10] sm:$0xff]  ;;  %3381 = vmatpush.bf16.msra.mxu1 %v3356_v8  ;;  %3382 = vmatpush.bf16.msra.mxu2 %v3356_v8  ;;  %v3367_v14 = vld [vmem:[%s4388_s3 + $0x18] sm:$0xff]  ;;  %vm741_vm8 = vsmask.f32 7440  ;;  %vm1137_vm9 = vcmask 1042432  }
  0x5f   : > { %v3354_v13 = vld [vmem:[#allocation2 + $0x48] sm:$0xff]  ;;  %3383 = vmatpush.bf16.msra.mxu3 %v3356_v8  ;;  %v3368_v15 = vld [vmem:[%s4388_s3 + $0x20] sm:$0xff]  ;;  %626 = vmatpush.bf16.msra.mxu0 %v3356_v8  ;;  %v3378_v19 = vld [vmem:[%s4388_s3 + $0x30] sm:$0xff]  ;;  %vm1138_vm10 = vcmask 1046532   ;;  %vm497_vm13 = vcmask 31744  }
  0x60   : > { %v3348_v0 = vld [vmem:[#allocation2] sm:$0xff]  ;;  %v3369_v18 = vld [vmem:[%s4388_s3 + $0x28] sm:$0xff]  ;;  %v3379_v20 = vld [vmem:[%s4388_s3 + $0x38] sm:$0xff] }
  0x61   : > { %3140 = vmatmul.msk.bf16.vlgmr.msra.gmra.mxu1 %vm594_vm6, %v3350_v9  ;;  %3142 = vmatmul.msk.bf16.vlgmr.msra.gmra.mxu2 %vm594_vm6, %v3352_v10  ;;  %v700_v16 = vld [vmem:[#allocation2] sm:$0xf]  ;;  %v701_v17 = vld [vmem:[#allocation2 + $0x4] sm:$0xf]  ;;  %v702_v1 = vld [vmem:[#allocation2 + $0x8] sm:$0x1] }
  0x62   : > { %999 = vmatpush.bf16.msrb.mxu1 %v3357_v11  ;;  %1260 = vmatpush.bf16.msrb.mxu2 %v3358_v12  ;;  %v744_v21 = vshrl.u32 %v700_v16, 16  ;;  %v747_v22 = vshll.u32 %v700_v16, 16  ;;  %v753_v23 = vshll.u32 %v701_v17, 16  ;;  %v757_v24 = vshrl.u32 %v701_v17, 16  ;;  %v1074_v29 = vld [vmem:[#allocation2 + $0x4] sm:$0xf]  ;;  %vm3761_vm11 = vmor %vm1137_vm9, %vm1138_vm10 }
  0x63   : > { %1447 = vmatpush.bf16.msrb.mxu3 %v3367_v14  ;;  %1817 = vmatpush.bf16.msrb.mxu0 %v3368_v15  ;;  %v1521_v30 = vld [vmem:[#allocation2 + $0xc] sm:$0xf]  ;;  %v763_v31 = vshll.u32 %v702_v1, 16  ;;  %v1073_v32 = vld [vmem:[#allocation2] sm:$0xe]  ;;  %v3351_v34 = vld [vmem:[#allocation2 + $0x24] sm:$0xff] }
  0x64   : > { %3144 = vmatmul.msk.bf16.vlgmr.msra.gmra.mxu3 %vm594_vm6, %v3354_v13  ;;  %3138 = vmatmul.msk.bf16.vlgmr.msra.gmra.mxu0 %vm594_vm6, %v3348_v0  ;;  %v746_v25 = vrot.slane %v744_v21, 4  ;;  %v749_v26 = vrot.slane %v747_v22, 5  ;;  %v755_v27 = vrot.slane %v753_v23, 5  ;;  %v759_v28 = vrot.slane %v757_v24, 4  ;;  %v1522_v33 = vld [vmem:[#allocation2 + $0x10] sm:$0xf]  ;;  %vm3768_vm12 = vmor %vm740_vm7, %vm741_vm8 }
  0x65   : > { %v3353_v35 = vld [vmem:[#allocation2 + $0x3c] sm:$0xff]  ;;  %v1075_v37 = vld [vmem:[#allocation2 + $0x8] sm:$0x1]  ;;  %v1142_v38 = vrot.slane %v1074_v29, 5  ;;  %v1562_v39 = vshrl.u32 %v1521_v30, 16  ;;  %v3355_v40 = vld [vmem:[#allocation2 + $0x54] sm:$0xff] }
  0x66   : > { %2075 = vmatpush.bf16.msra.mxu1 %v3369_v18  ;;  %2262 = vmatpush.bf16.msra.mxu2 %v3378_v19  ;;  %v750_v36 = vor.u32 %v749_v26, %v746_v25  ;;  %v760_v41 = vor.u32 %v759_v28, %v755_v27  ;;  %v1565_v42 = vshll.u32 %v1521_v30, 16  ;;  %v3160_v43 = vrot.slane %v1073_v32, 9  ;;  %v1523_v44 = vld [vmem:[#allocation2 + $0x14] sm:$0x1]  ;;  %v3349_v54 = vld [vmem:[#allocation2 + $0xc] sm:$0xff]  ;;  %v3380_v63 = vld [vmem:[%s4388_s3 + $0x40] sm:$0xff] }
  0x67   : > { %2632 = vmatpush.bf16.msra.mxu3 %v3379_v20  ;;  %v1564_v45 = vrot.slane %v1562_v39, 4  ;;  %v1571_v46 = vshll.u32 %v1522_v33, 16  ;;  %v765_v47 = vrot.slane %v763_v31, 5  ;;  %v1145_v48 = vrot.slane %v1075_v37, 5  ;;  %v703_v55 = vld [vmem:[#allocation2 + $0xc] sm:$0xf]  ;;  %2890 = vmatpush.bf16.msra.mxu0 %v3380_v63 }
  0x68   : > { %v1567_v49 = vrot.slane %v1565_v42, 5  ;;  %v1575_v50 = vshrl.u32 %v1522_v33, 16  ;;  %v751_v51 = vrot.slane %v750_v36, 4  ;;  %v1144_v53 = vrot.slane %v1142_v38, 4  ;;  %v704_v59 = vld [vmem:[#allocation2 + $0x10] sm:$0xf] }
  0x69   : > { %v1573_v56 = vrot.slane %v1571_v46, 5  ;;  %v761_v58 = vrot.slane %v760_v41, 4  ;;  %v1581_v62 = vshll.u32 %v1523_v44, 16  ;;  %v1143_v2 = vsel %vm3761_vm11, %v3160_v43, %v1142_v38  ;;  %v705_v19 = vld [vmem:[#allocation2 + $0x14] sm:$0x1]  ;;  %v3359_v38 = vld [vmem:[#allocation2 + $0xc] sm:$0xff] }
  0x6a   : > { %v1568_v60 = vor.u32 %v1567_v49, %v1564_v45  ;;  %v1577_v61 = vrot.slane %v1575_v50, 4  ;;  %v768_v3 = vshrl.u32 %v703_v55, 16  ;;  %v771_v4 = vshll.u32 %v703_v55, 16  ;;  %v1077_v22 = vld [vmem:[#allocation2 + $0x10] sm:$0xf] }
  0x6b   : > { %v756_v6 = vsel %vm3768_vm12, %v751_v51, %v755_v27  ;;  %v1146_v7 = vsel %vm3761_vm11, %v1144_v53, %v1145_v48  ;;  %v777_v8 = vshll.u32 %v704_v59, 16  ;;  %v781_v9 = vshrl.u32 %v704_v59, 16  ;;  %v1524_v1 = vld [vmem:[#allocation2 + $0x18] sm:$0xf]  ;;  %v1525_v25 = vld [vmem:[#allocation2 + $0x1c] sm:$0xf] }
  0x6c   : > { %v1578_v5 = vor.u32 %v1577_v61, %v1573_v56  ;;  %v766_v10 = vsel %vm3768_vm12, %v761_v58, %v765_v47  ;;  %v1569_v11 = vrot.slane %v1568_v60, 4  ;;  %v1583_v13 = vrot.slane %v1581_v62, 5  ;;  %v1076_v31 = vld [vmem:[#allocation2 + $0xc] sm:$0xe]  ;;  %v1526_v44 = vld [vmem:[#allocation2 + $0x20] sm:$0x1] }
  0x6d   : > { %v1199_v14 = vunpack.c.l.b16 %v1143_v2  ;;  %v1200_v15 = vunpack.c.l.b16 %v1146_v7  ;;  %v770_v0 = vrot.slane %v768_v3, 4  ;;  %v773_v16 = vrot.slane %v771_v4, 5  ;;  %v706_v47 = vld [vmem:[#allocation2 + $0x18] sm:$0xf]  ;;  %v707_v55 = vld [vmem:[#allocation2 + $0x1c] sm:$0xf] }
  0x6e   : > { %v1579_v12 = vrot.slane %v1578_v5, 4  ;;  %v938_v17 = vunpack.c.l.b16 %v756_v6  ;;  %v939_v18 = vunpack.c.l.b16 %v766_v10  ;;  %v779_v20 = vrot.slane %v777_v8, 5 }
  0x6f   : > { %v783_v21 = vrot.slane %v781_v9, 4  ;;  %v1574_v23 = vsel %vm3768_vm12, %v1569_v11, %v1573_v56  ;;  %v1586_v26 = vshrl.u32 %v1524_v1, 16  ;;  %v1589_v27 = vshll.u32 %v1524_v1, 16 }
  0x70   : > { %v1584_v24 = vsel %vm3768_vm12, %v1579_v12, %v1583_v13  ;;  %v1215_v28 = vpack.c.b16 %v1200_v15, %v1199_v14  ;;  %v774_v29 = vor.u32 %v773_v16, %v770_v0  ;;  %v787_v30 = vshll.u32 %v705_v19, 16  ;;  %v708_v15 = vld [vmem:[#allocation2 + $0x20] sm:$0x1] }
  0x71   : > { %3141 = vmatmul.msk.bf16.gmra.mxu1 %vm594_vm6, %v3351_v34  ;;  %3143 = vmatmul.msk.bf16.gmra.mxu2 %vm594_vm6, %v3353_v35  ;;  %v1149_v32 = vrot.slane %v1077_v22, 5  ;;  %v954_v33 = vpack.c.b16 %v939_v18, %v938_v17  ;;  %v784_v34 = vor.u32 %v783_v21, %v779_v20  ;;  %v1078_v35 = vld [vmem:[#allocation2 + $0x14] sm:$0x1]  ;;  %v1756_v36 = vunpack.c.l.b16 %v1574_v23  ;;  %v1080_v17 = vld [vmem:[#allocation2 + $0x1c] sm:$0xf] }
  0x72   : > { %v1757_v37 = vunpack.c.l.b16 %v1584_v24  ;;  %v1588_v39 = vrot.slane %v1586_v26, 4  ;;  %v1595_v41 = vshll.u32 %v1525_v25, 16  ;;  %v1599_v42 = vshrl.u32 %v1525_v25, 16  ;;  %v1528_v23 = vld [vmem:[#allocation2 + $0x28] sm:$0xf] }
  0x73   : > { %v3161_v43 = vrot.slane %v1076_v31, 9  ;;  %v775_v45 = vrot.slane %v774_v29, 4  ;;  %v1152_v46 = vrot.slane %v1078_v35, 5  ;;  %v785_v50 = vrot.slane %v784_v34, 4 }
  0x74   : > { %3145 = vmatmul.msk.bf16.gmra.mxu3 %vm594_vm6, %v3355_v40  ;;  %3139 = vmatmul.msk.bf16.gmra.mxu0 %vm594_vm6, %v3349_v54  ;;  %v1591_v40 = vrot.slane %v1589_v27, 5  ;;  %v1597_v48 = vrot.slane %v1595_v41, 5  ;;  %v1601_v49 = vrot.slane %v1599_v42, 4  ;;  %v789_v51 = vrot.slane %v787_v30, 5  ;;  %v3360_v27 = vld [vmem:[#allocation2 + $0x18] sm:$0xff] }
  0x75   : > { %v1151_v53 = vrot.slane %v1149_v32, 4  ;;  %v1772_v54 = vpack.c.b16 %v1757_v37, %v1756_v36  ;;  %v1605_v59 = vshll.u32 %v1526_v44, 16  ;;  %v792_v60 = vshrl.u32 %v706_v47, 16  ;;  %v709_v41 = vld [vmem:[#allocation2 + $0x24] sm:$0xf] }
  0x76   : > { %v1592_v56 = vor.u32 %v1591_v40, %v1588_v39  ;;  %v1602_v58 = vor.u32 %v1601_v49, %v1597_v48  ;;  %v795_v61 = vshll.u32 %v706_v47, 16  ;;  %v780_v62 = vsel %vm3768_vm12, %v775_v45, %v779_v20  ;;  %v1527_v20 = vld [vmem:[#allocation2 + $0x24] sm:$0xf]  ;;  %v1081_v39 = vld [vmem:[#allocation2 + $0x20] sm:$0x1] }
  0x77   : > { %v1150_v63 = vsel %vm3761_vm11, %v3161_v43, %v1149_v32  ;;  %v790_v2 = vsel %vm3768_vm12, %v785_v50, %v789_v51  ;;  %v1153_v3 = vsel %vm3761_vm11, %v1151_v53, %v1152_v46  ;;  %v801_v4 = vshll.u32 %v707_v55, 16  ;;  %v1079_v32 = vld [vmem:[#allocation2 + $0x18] sm:$0xe]  ;;  %v1529_v40 = vld [vmem:[#allocation2 + $0x2c] sm:$0x1] }
  0x78   : > { %v805_v5 = vshrl.u32 %v707_v55, 16  ;;  %v1593_v6 = vrot.slane %v1592_v56, 4  ;;  %v1603_v7 = vrot.slane %v1602_v58, 4  ;;  %v1607_v8 = vrot.slane %v1605_v59, 5  ;;  %v710_v42 = vld [vmem:[#allocation2 + $0x28] sm:$0xf] }
  0x79   : > { %v794_v9 = vrot.slane %v792_v60, 4  ;;  %v797_v10 = vrot.slane %v795_v61, 5  ;;  %v940_v11 = vunpack.c.l.b16 %v780_v62  ;;  %v941_v12 = vunpack.c.l.b16 %v790_v2 }
  0x7a   : > { %v1201_v13 = vunpack.c.l.b16 %v1150_v63  ;;  %v1202_v14 = vunpack.c.l.b16 %v1153_v3  ;;  %v803_v0 = vrot.slane %v801_v4, 5  ;;  %v807_v16 = vrot.slane %v805_v5, 4  ;;  %v711_v4 = vld [vmem:[#allocation2 + $0x2c] sm:$0x1] }
  0x7b   : > { %v1598_v18 = vsel %vm3768_vm12, %v1593_v6, %v1597_v48  ;;  %v1608_v19 = vsel %vm3768_vm12, %v1603_v7, %v1607_v8  ;;  %v798_v21 = vor.u32 %v797_v10, %v794_v9  ;;  %v811_v22 = vshll.u32 %v708_v15, 16 }
  0x7c   : > { %v1610_v24 = vshrl.u32 %v1527_v20, 16  ;;  %v1613_v1 = vshll.u32 %v1527_v20, 16  ;;  %v955_v25 = vpack.c.b16 %v941_v12, %v940_v11  ;;  %v1216_v26 = vpack.c.b16 %v1202_v14, %v1201_v13  ;;  %v1083_v13 = vld [vmem:[#allocation2 + $0x28] sm:$0xf] }
  0x7d   : > { %v1156_v29 = vrot.slane %v1080_v17, 5  ;;  %v1758_v30 = vunpack.c.l.b16 %v1598_v18  ;;  %v1759_v31 = vunpack.c.l.b16 %v1608_v19  ;;  %v1619_v35 = vshll.u32 %v1528_v23, 16  ;;  %v1531_v19 = vld [vmem:[#allocation2 + $0x34] sm:$0xf] }
  0x7e   : > { %v1615_v34 = vrot.slane %v1613_v1, 5  ;;  %v1623_v36 = vshrl.u32 %v1528_v23, 16  ;;  %v799_v37 = vrot.slane %v798_v21, 4  ;;  %v3162_v46 = vrot.slane %v1079_v32, 9  ;;  %v3361_v1 = vld [vmem:[#allocation2 + $0x24] sm:$0xff] }
  0x7f   : > { %v1621_v43 = vrot.slane %v1619_v35, 5  ;;  %v1158_v47 = vrot.slane %v1156_v29, 4  ;;  %v1773_v48 = vpack.c.b16 %v1759_v31, %v1758_v30  ;;  %v1159_v49 = vrot.slane %v1081_v39, 5 }
  0x80   : > { %v1625_v44 = vrot.slane %v1623_v36, 4  ;;  %v1629_v53 = vshll.u32 %v1529_v40, 16  ;;  %v819_v55 = vshll.u32 %v709_v41, 16  ;;  %v825_v56 = vshll.u32 %v710_v42, 16  ;;  %v713_v40 = vld [vmem:[#allocation2 + $0x34] sm:$0xf] }
  0x81   : > { %3152 = vmatmul.msk.bf16.vlgmr.msrb.gmra.mxu1 %vm594_vm6, %v954_v33  ;;  %3174 = vmatmul.msk.bf16.vlgmr.msrb.gmra.mxu2 %vm594_vm6, %v1215_v28  ;;  %v808_v28 = vor.u32 %v807_v16, %v803_v0  ;;  %v1612_v33 = vrot.slane %v1610_v24, 4  ;;  %v829_v58 = vshrl.u32 %v710_v42, 16  ;;  %v804_v59 = vsel %vm3768_vm12, %v799_v37, %v803_v0  ;;  %v1530_v16 = vld [vmem:[#allocation2 + $0x30] sm:$0xf]  ;;  %v1532_v37 = vld [vmem:[#allocation2 + $0x38] sm:$0x1] }
  0x82   : > { %v1626_v51 = vor.u32 %v1625_v44, %v1621_v43  ;;  %v1157_v61 = vsel %vm3761_vm11, %v3162_v46, %v1156_v29  ;;  %v1160_v62 = vsel %vm3761_vm11, %v1158_v47, %v1159_v49  ;;  %v1631_v3 = vrot.slane %v1629_v53, 5  ;;  %v712_v29 = vld [vmem:[#allocation2 + $0x30] sm:$0xf] }
  0x83   : > { %v809_v45 = vrot.slane %v808_v28, 4  ;;  %v1616_v50 = vor.u32 %v1615_v34, %v1612_v33  ;;  %v821_v6 = vrot.slane %v819_v55, 5  ;;  %v3816_v7 = vrot.slane %v825_v56, 5 }
  0x84   : > { %3220 = vmatmul.msk.bf16.vlgmr.msrb.gmra.mxu3 %vm594_vm6, %v3359_v38  ;;  %3234 = vmatmul.msk.bf16.vlgmr.msrb.gmra.mxu0 %vm594_vm6, %v1772_v54  ;;  %v813_v38 = vrot.slane %v811_v22, 5  ;;  %v816_v54 = vshrl.u32 %v709_v41, 16  ;;  %v1627_v2 = vrot.slane %v1626_v51, 4  ;;  %v831_v8 = vrot.slane %v829_v58, 4 }
  0x85   : > { %v1617_v63 = vrot.slane %v1616_v50, 4  ;;  %v942_v9 = vunpack.c.l.b16 %v804_v59  ;;  %v1203_v11 = vunpack.c.l.b16 %v1157_v61  ;;  %v1204_v12 = vunpack.c.l.b16 %v1160_v62 }
  0x86   : > { %v814_v60 = vsel %vm3768_vm12, %v809_v45, %v813_v38  ;;  %v818_v5 = vrot.slane %v816_v54, 4  ;;  %v835_v14 = vshll.u32 %v711_v4, 16  ;;  %v1632_v0 = vsel %vm3768_vm12, %v1627_v2, %v1631_v3 }
  0x87   : > { %v943_v10 = vunpack.c.l.b16 %v814_v60  ;;  %v1622_v15 = vsel %vm3768_vm12, %v1617_v63, %v1621_v43  ;;  %v832_v18 = vor.u32 %v831_v8, %v3816_v7  ;;  %v1634_v20 = vshrl.u32 %v1530_v16, 16  ;;  %v714_v60 = vld [vmem:[#allocation2 + $0x38] sm:$0x1]  ;;  %v1086_v8 = vld [vmem:[#allocation2 + $0x34] sm:$0xf] }
  0x88   : > { %v822_v17 = vor.u32 %v821_v6, %v818_v5  ;;  %v1637_v21 = vshll.u32 %v1530_v16, 16  ;;  %v1163_v22 = vrot.slane %v1083_v13, 5  ;;  %v1217_v24 = vpack.c.b16 %v1204_v12, %v1203_v11  ;;  %v1533_v13 = vld [vmem:[#allocation2 + $0x3c] sm:$0xf] }
  0x89   : > { %v956_v23 = vpack.c.b16 %v943_v10, %v942_v9  ;;  %v1761_v28 = vunpack.c.l.b16 %v1632_v0  ;;  %v1636_v30 = vrot.slane %v1634_v20, 4  ;;  %v1643_v32 = vshll.u32 %v1531_v19, 16  ;;  %v1534_v0 = vld [vmem:[#allocation2 + $0x40] sm:$0xf]  ;;  %v3362_v20 = vld [vmem:[#allocation2 + $0x30] sm:$0xff] }
  0x8a   : > { %v1639_v31 = vrot.slane %v1637_v21, 5  ;;  %v1647_v33 = vshrl.u32 %v1531_v19, 16  ;;  %v823_v34 = vrot.slane %v822_v17, 4  ;;  %v833_v35 = vrot.slane %v832_v18, 4  ;;  %v1085_v21 = vld [vmem:[#allocation2 + $0x30] sm:$0xe] }
  0x8b   : > { %v837_v36 = vrot.slane %v835_v14, 5  ;;  %v1165_v39 = vrot.slane %v1163_v22, 4  ;;  %v1645_v41 = vrot.slane %v1643_v32, 5  ;;  %v840_v45 = vshrl.u32 %v712_v29, 16 }
  0x8c   : > { %v1649_v42 = vrot.slane %v1647_v33, 4  ;;  %v843_v46 = vshll.u32 %v712_v29, 16  ;;  %v1640_v47 = vor.u32 %v1639_v31, %v1636_v30  ;;  %v1653_v49 = vshll.u32 %v1532_v37, 16 }
  0x8d   : > { %v849_v50 = vshll.u32 %v713_v40, 16  ;;  %v853_v51 = vshrl.u32 %v713_v40, 16  ;;  %v828_v53 = vsel %vm3768_vm12, %v823_v34, %v3816_v7  ;;  %v838_v54 = vsel %vm3768_vm12, %v833_v35, %v837_v36 }
  0x8e   : > { %v842_v58 = vrot.slane %v840_v45, 4  ;;  %v845_v59 = vrot.slane %v843_v46, 5  ;;  %v1641_v61 = vrot.slane %v1640_v47, 4  ;;  %v1655_v63 = vrot.slane %v1653_v49, 5 }
  0x8f   : > { %v3836_v2 = vrot.slane %v849_v50, 5  ;;  %v855_v3 = vrot.slane %v853_v51, 4  ;;  %v944_v4 = vunpack.c.l.b16 %v828_v53  ;;  %v945_v5 = vunpack.c.l.b16 %v838_v54  ;;  %v717_v51 = vld [vmem:[#allocation2 + $0x44] sm:$0x1] }
  0x90   : > { %v846_v9 = vor.u32 %v845_v59, %v842_v58  ;;  %v859_v10 = vshll.u32 %v714_v60, 16  ;;  %v1646_v11 = vsel %vm3768_vm12, %v1641_v61, %v1645_v41  ;;  %v1658_v16 = vshrl.u32 %v1533_v13, 16 }
  0x91   : > { %3153 = vmatmul.msk.bf16.gmra.mxu1 %vm594_vm6, %v955_v25  ;;  %3175 = vmatmul.msk.bf16.gmra.mxu2 %vm594_vm6, %v1216_v26  ;;  %v1082_v25 = vld [vmem:[#allocation2 + $0x24] sm:$0xe]  ;;  %v1084_v26 = vld [vmem:[#allocation2 + $0x2c] sm:$0x1]  ;;  %v856_v14 = vor.u32 %v855_v3, %v3836_v2  ;;  %v1661_v17 = vshll.u32 %v1533_v13, 16  ;;  %v957_v18 = vpack.c.b16 %v945_v5, %v944_v4  ;;  %v1667_v31 = vshll.u32 %v1534_v0, 16 }
  0x92   : > { %v3163_v38 = vrot.slane %v1082_v25, 9  ;;  %v1166_v43 = vrot.slane %v1084_v26, 5  ;;  %v715_v26 = vld [vmem:[#allocation2 + $0x3c] sm:$0xf]  ;;  %v1660_v29 = vrot.slane %v1658_v16, 4  ;;  %v1671_v32 = vshrl.u32 %v1534_v0, 16 }
  0x93   : > { %v1663_v30 = vrot.slane %v1661_v17, 5  ;;  %v857_v33 = vrot.slane %v856_v14, 4  ;;  %v3164_v34 = vrot.slane %v1085_v21, 9  ;;  %v864_v37 = vshrl.u32 %v715_v26, 16  ;;  %v3363_v14 = vld [vmem:[#allocation2 + $0x3c] sm:$0xff] }
  0x94   : > { %3221 = vmatmul.msk.bf16.gmra.mxu3 %vm594_vm6, %v3360_v27  ;;  %3235 = vmatmul.msk.bf16.gmra.mxu0 %vm594_vm6, %v1773_v48  ;;  %v1760_v27 = vunpack.c.l.b16 %v1622_v15  ;;  %v1650_v48 = vor.u32 %v1649_v42, %v1645_v41  ;;  %v1164_v55 = vsel %vm3761_vm11, %v3163_v38, %v1163_v22  ;;  %v1167_v56 = vsel %vm3761_vm11, %v1165_v39, %v1166_v43  ;;  %v1087_v22 = vld [vmem:[#allocation2 + $0x38] sm:$0x1]  ;;  %v1537_v0 = vld [vmem:[#allocation2 + $0x4c] sm:$0xf] }
  0x95   : > { %v1205_v6 = vunpack.c.l.b16 %v1164_v55  ;;  %v1206_v7 = vunpack.c.l.b16 %v1167_v56  ;;  %v1170_v15 = vrot.slane %v1086_v8, 5  ;;  %v1173_v36 = vrot.slane %v1087_v22, 5 }
  0x96   : > { %v1774_v44 = vpack.c.b16 %v1761_v28, %v1760_v27  ;;  %v1651_v62 = vrot.slane %v1650_v48, 4  ;;  %v716_v27 = vld [vmem:[#allocation2 + $0x40] sm:$0xf]  ;;  %v1535_v28 = vld [vmem:[#allocation2 + $0x44] sm:$0x1]  ;;  %v867_v38 = vshll.u32 %v715_v26, 16  ;;  %v1664_v45 = vor.u32 %v1663_v30, %v1660_v29 }
  0x97   : > { %v1218_v19 = vpack.c.b16 %v1206_v7, %v1205_v6  ;;  %v1172_v35 = vrot.slane %v1170_v15, 4  ;;  %v1669_v39 = vrot.slane %v1667_v31, 5  ;;  %v1673_v40 = vrot.slane %v1671_v32, 4  ;;  %v1089_v6 = vld [vmem:[#allocation2 + $0x40] sm:$0xf] }
  0x98   : > { %v1656_v12 = vsel %vm3768_vm12, %v1651_v62, %v1655_v63  ;;  %v873_v42 = vshll.u32 %v716_v27, 16  ;;  %v877_v43 = vshrl.u32 %v716_v27, 16  ;;  %v3472_v47 = vmov 0.0  }
  0x99   : > { %v1763_v25 = vunpack.c.l.b16 %v1656_v12  ;;  %v1674_v46 = vor.u32 %v1673_v40, %v1669_v39  ;;  %502 = vst.msk [vmem:[#allocation3 + $0x20] sm:$0xff] %vm497_vm13, %v3472_v47  ;;  %v1171_v50 = vsel %vm3761_vm11, %v3164_v34, %v1170_v15  ;;  %v1174_v53 = vsel %vm3761_vm11, %v1172_v35, %v1173_v36  ;;  %v1536_v12 = vld [vmem:[#allocation2 + $0x48] sm:$0xf] }
  0x9a   : > { %498 = vst.msk [vmem:[#allocation3] sm:$0xff] %vm497_vm13, %v3472_v47  ;;  %v866_v54 = vrot.slane %v864_v37, 4  ;;  %v869_v55 = vrot.slane %v867_v38, 5  ;;  %v3860_v56 = vrot.slane %v873_v42, 5  ;;  %v879_v58 = vrot.slane %v877_v43, 4 }
  0x9b   : > { %499 = vst.msk [vmem:[#allocation3 + $0x8] sm:$0xff] %vm497_vm13, %v3472_v47  ;;  %v1665_v59 = vrot.slane %v1664_v45, 4  ;;  %v1675_v60 = vrot.slane %v1674_v46, 4  ;;  %v883_v62 = vshll.u32 %v717_v51, 16  ;;  %v1207_v3 = vunpack.c.l.b16 %v1171_v50 }
  0x9c   : > { %500 = vst.msk [vmem:[#allocation3 + $0x10] sm:$0xff] %vm497_vm13, %v3472_v47  ;;  %v1208_v4 = vunpack.c.l.b16 %v1174_v53  ;;  %v870_v5 = vor.u32 %v869_v55, %v866_v54  ;;  %v880_v7 = vor.u32 %v879_v58, %v3860_v56  ;;  %v1177_v15 = vrot.slane %v1089_v6, 5  ;;  %v720_v55 = vld [vmem:[#allocation2 + $0x50] sm:$0x1] }
  0x9d   : > { %501 = vst.msk [vmem:[#allocation3 + $0x18] sm:$0xff] %vm497_vm13, %v3472_v47  ;;  %v1670_v8 = vsel %vm3768_vm12, %v1665_v59, %v1669_v39  ;;  %v1682_v16 = vshrl.u32 %v1536_v12, 16  ;;  %v1685_v17 = vshll.u32 %v1536_v12, 16  ;;  %v1691_v29 = vshll.u32 %v1537_v0, 16 }
  0x9e   : > { %503 = vst.msk [vmem:[#allocation3 + $0x28] sm:$0xff] %vm497_vm13, %v3472_v47  ;;  %v1764_v21 = vunpack.c.l.b16 %v1670_v8  ;;  %v1695_v30 = vshrl.u32 %v1537_v0, 16  ;;  %v1179_v31 = vrot.slane %v1177_v15, 4  ;;  %v1540_v8 = vld [vmem:[#allocation2 + $0x58] sm:$0xf] }
  0x9f   : > { %504 = vst.msk [vmem:[#allocation3 + $0x30] sm:$0xff] %vm497_vm13, %v3472_v47  ;;  %v1687_v26 = vrot.slane %v1685_v17, 5  ;;  %v1693_v37 = vrot.slane %v1691_v29, 5 }
  0xa0   : > { %505 = vst.msk [vmem:[#allocation3 + $0x38] sm:$0xff] %vm497_vm13, %v3472_v47  ;;  %v1697_v38 = vrot.slane %v1695_v30, 4 }
  0xa1   : > { %3154 = vmatmul.msk.bf16.gmra.mxu1 %vm594_vm6, %v956_v23  ;;  %3176 = vmatmul.msk.bf16.gmra.mxu2 %vm594_vm6, %v1217_v24  ;;  %v847_v23 = vrot.slane %v846_v9, 4  ;;  %v861_v24 = vrot.slane %v859_v10, 5  ;;  %v885_v10 = vrot.slane %v883_v62, 5  ;;  %506 = vst.msk [vmem:[#allocation3 + $0x40] sm:$0xff] %vm497_vm13, %v3472_v47  ;;  %v1092_v62 = vld [vmem:[#allocation2 + $0x4c] sm:$0xf] }
  0xa2   : > { %507 = vst.msk [vmem:[#allocation3 + $0x48] sm:$0xff] %vm497_vm13, %v3472_v47  ;;  %v1698_v42 = vor.u32 %v1697_v38, %v1693_v37 }
  0xa3   : > { %v852_v48 = vsel %vm3768_vm12, %v847_v23, %v3836_v2  ;;  %v862_v49 = vsel %vm3768_vm12, %v857_v33, %v861_v24  ;;  %508 = vst.msk [vmem:[#allocation3 + $0x50] sm:$0xff] %vm497_vm13, %v3472_v47  ;;  %v718_v23 = vld [vmem:[#allocation2 + $0x48] sm:$0xf]  ;;  %v881_v24 = vrot.slane %v880_v7, 4  ;;  %v1184_v7 = vrot.slane %v1092_v62, 5 }
  0xa4   : > { %3222 = vmatmul.msk.bf16.gmra.mxu3 %vm594_vm6, %v3361_v1  ;;  %3236 = vmatmul.msk.bf16.gmra.mxu0 %vm594_vm6, %v1774_v44  ;;  %v1762_v1 = vunpack.c.l.b16 %v1646_v11  ;;  %v1677_v44 = vshll.u32 %v1535_v28, 16  ;;  %v946_v63 = vunpack.c.l.b16 %v852_v48  ;;  %v947_v2 = vunpack.c.l.b16 %v862_v49  ;;  %v1088_v11 = vld [vmem:[#allocation2 + $0x3c] sm:$0xe]  ;;  %509 = vst.msk [vmem:[#allocation3 + $0x58] sm:$0xff] %vm497_vm13, %v3472_v47  ;;  %v1538_v28 = vld [vmem:[#allocation2 + $0x50] sm:$0x1] }
  0xa5   : > { %v3165_v27 = vrot.slane %v1088_v11, 9  ;;  %510 = vst.msk [vmem:[#allocation3 + $0x60] sm:$0xff] %vm497_vm13, %v3472_v47  ;;  %v888_v33 = vshrl.u32 %v718_v23, 16  ;;  %v891_v34 = vshll.u32 %v718_v23, 16  ;;  %v1699_v53 = vrot.slane %v1698_v42, 4 }
  0xa6   : > { %v1775_v41 = vpack.c.b16 %v1763_v25, %v1762_v1  ;;  %v1679_v61 = vrot.slane %v1677_v44, 5  ;;  %v958_v13 = vpack.c.b16 %v947_v2, %v946_v63  ;;  %v719_v1 = vld [vmem:[#allocation2 + $0x4c] sm:$0xf]  ;;  %v1684_v25 = vrot.slane %v1682_v16, 4  ;;  %511 = vst.msk [vmem:[#allocation3 + $0x68] sm:$0xff] %vm497_vm13, %v3472_v47 }
  0xa7   : > { %512 = vst.msk [vmem:[#allocation3 + $0x70] sm:$0xff] %vm497_vm13, %v3472_v47  ;;  %v897_v36 = vshll.u32 %v719_v1, 16  ;;  %v901_v39 = vshrl.u32 %v719_v1, 16  ;;  %v886_v44 = vsel %vm3768_vm12, %v881_v24, %v885_v10  ;;  %v1178_v45 = vsel %vm3761_vm11, %v3165_v27, %v1177_v15  ;;  %v3364_v16 = vld [vmem:[#allocation2 + $0x48] sm:$0xff]  ;;  %v722_v27 = vld [vmem:[#allocation2 + $0x58] sm:$0xf] }
  0xa8   : > { %v1680_v9 = vsel %vm3768_vm12, %v1675_v60, %v1679_v61  ;;  %513 = vst.msk [vmem:[#allocation3 + $0x78] sm:$0xff] %vm497_vm13, %v3472_v47  ;;  %v1688_v40 = vor.u32 %v1687_v26, %v1684_v25  ;;  %v890_v47 = vrot.slane %v888_v33, 4  ;;  %v893_v48 = vrot.slane %v891_v34, 5 }
  0xa9   : > { %v1765_v22 = vunpack.c.l.b16 %v1680_v9  ;;  %v899_v49 = vrot.slane %v897_v36, 5  ;;  %v903_v50 = vrot.slane %v901_v39, 4  ;;  %v949_v58 = vunpack.c.l.b16 %v886_v44 }
  0xaa   : > { %v1689_v51 = vrot.slane %v1688_v40, 4  ;;  %v1209_v59 = vunpack.c.l.b16 %v1178_v45  ;;  %v894_v61 = vor.u32 %v893_v48, %v890_v47  ;;  %v907_v2 = vshll.u32 %v720_v55, 16  ;;  %v1095_v55 = vld [vmem:[#allocation2 + $0x58] sm:$0xf] }
  0xab   : > { %v1776_v35 = vpack.c.b16 %v1765_v22, %v1764_v21  ;;  %v904_v63 = vor.u32 %v903_v50, %v899_v49  ;;  %v721_v21 = vld [vmem:[#allocation2 + $0x54] sm:$0xf]  ;;  %v1541_v22 = vld [vmem:[#allocation2 + $0x5c] sm:$0x1]  ;;  %v1715_v23 = vshll.u32 %v1540_v8, 16  ;;  %v1719_v24 = vshrl.u32 %v1540_v8, 16 }
  0xac   : > { %v895_v12 = vrot.slane %v894_v61, 4  ;;  %v1186_v25 = vrot.slane %v1184_v7, 4  ;;  %v912_v33 = vshrl.u32 %v721_v21, 16  ;;  %v915_v36 = vshll.u32 %v721_v21, 16 }
  0xad   : > { %v905_v17 = vrot.slane %v904_v63, 4  ;;  %v1717_v30 = vrot.slane %v1715_v23, 5  ;;  %v925_v38 = vshrl.u32 %v722_v27, 16  ;;  %v1542_v63 = vld [vmem:[#allocation2 + $0x60] sm:$0xf] }
  0xae   : > { %v914_v47 = vrot.slane %v912_v33, 4  ;;  %v917_v48 = vrot.slane %v915_v36, 5 }
  0xaf   : > { %v927_v50 = vrot.slane %v925_v38, 4 }
  0xb1   : > { %3155 = vmatmul.msk.bf16.gmra.mxu1 %vm594_vm6, %v957_v18  ;;  %3177 = vmatmul.msk.bf16.gmra.mxu2 %vm594_vm6, %v1218_v19  ;;  %v1219_v18 = vpack.c.b16 %v1208_v4, %v1207_v3  ;;  %v871_v19 = vrot.slane %v870_v5, 4  ;;  %v1694_v3 = vsel %vm3768_vm12, %v1689_v51, %v1693_v37  ;;  %v1539_v5 = vld [vmem:[#allocation2 + $0x54] sm:$0xf]  ;;  %v921_v37 = vshll.u32 %v722_v27, 16  ;;  %v723_v51 = vld [vmem:[#allocation2 + $0x5c] sm:$0x1] }
  0xb2   : > { %v1706_v9 = vshrl.u32 %v1539_v5, 16  ;;  %v1709_v10 = vshll.u32 %v1539_v5, 16  ;;  %v1766_v15 = vunpack.c.l.b16 %v1694_v3  ;;  %v931_v62 = vshll.u32 %v723_v51, 16  ;;  %v534_v3 = vld [vmem:[#allocation3 + $0x20] sm:$0xff] }
  0xb3   : > { %v876_v43 = vsel %vm3768_vm12, %v871_v19, %v3860_v56  ;;  %v1733_v5 = vshll.u32 %v1542_v63, 16 }
  0xb4   : > { %3223 = vmatmul.msk.bf16.gmra.mxu3 %vm594_vm6, %v3362_v20  ;;  %3237 = vmatmul.msk.bf16.gmra.mxu0 %vm594_vm6, %v1775_v41  ;;  %v1090_v20 = vld [vmem:[#allocation2 + $0x44] sm:$0x1]  ;;  %v1701_v41 = vshll.u32 %v1538_v28, 16  ;;  %v948_v56 = vunpack.c.l.b16 %v876_v43  ;;  %v1708_v19 = vrot.slane %v1706_v9, 4  ;;  %v900_v28 = vsel %vm3768_vm12, %v895_v12, %v899_v49  ;;  %v1094_v9 = vld [vmem:[#allocation2 + $0x54] sm:$0xe] }
  0xb5   : > { %v1180_v32 = vrot.slane %v1090_v20, 5  ;;  %v1711_v20 = vrot.slane %v1709_v10, 5  ;;  %v950_v40 = vunpack.c.l.b16 %v900_v28  ;;  %v3924_v49 = vrot.slane %v921_v37, 5  ;;  %v2336_v28 = vld [vmem:[#allocation2 + $0x18] sm:$0xf] }
  0xb6   : > { %v1703_v54 = vrot.slane %v1701_v41, 5  ;;  %v959_v6 = vpack.c.b16 %v949_v58, %v948_v56  ;;  %v1191_v10 = vrot.slane %v1095_v55, 5  ;;  %v933_v23 = vrot.slane %v931_v62, 5  ;;  %v1892_v62 = vld [vmem:[#allocation2 + $0x10] sm:$0xf] }
  0xb7   : > { %v1181_v46 = vsel %vm3761_vm11, %v1179_v31, %v1180_v32  ;;  %v1721_v31 = vrot.slane %v1719_v24, 4  ;;  %v1712_v34 = vor.u32 %v1711_v20, %v1708_v19  ;;  %v928_v61 = vor.u32 %v927_v50, %v3924_v49  ;;  %v1544_v19 = vld [vmem:[#allocation2 + $0x68] sm:$0x1] }
  0xb8   : > { %v1210_v60 = vunpack.c.l.b16 %v1181_v46  ;;  %v1704_v4 = vsel %vm3768_vm12, %v1699_v53, %v1703_v54  ;;  %v3167_v24 = vrot.slane %v1094_v9, 9  ;;  %v1749_v33 = vshll.u32 %v1544_v19, 16 }
  0xb9   : > { %v1767_v0 = vunpack.c.l.b16 %v1704_v4  ;;  %v1722_v39 = vor.u32 %v1721_v31, %v1717_v30  ;;  %v1713_v44 = vrot.slane %v1712_v34, 4  ;;  %v1730_v4 = vshrl.u32 %v1542_v63, 16  ;;  %v2337_v34 = vld [vmem:[#allocation2 + $0x1c] sm:$0xf] }
  0xba   : > { %v1220_v11 = vpack.c.b16 %v1210_v60, %v1209_v59  ;;  %v918_v60 = vor.u32 %v917_v48, %v914_v47  ;;  %v2386_v47 = vshll.u32 %v2337_v34, 16  ;;  %v2390_v48 = vshrl.u32 %v2337_v34, 16 }
  0xbb   : > { %v1777_v29 = vpack.c.b16 %v1767_v0, %v1766_v15  ;;  %v1723_v45 = vrot.slane %v1722_v39, 4  ;;  %v1718_v56 = vsel %vm3768_vm12, %v1713_v44, %v1717_v30  ;;  %v1096_v15 = vld [vmem:[#allocation2 + $0x5c] sm:$0x1]  ;;  %v1732_v0 = vrot.slane %v1730_v4, 4  ;;  %v535_v39 = vld [vmem:[#allocation3 + $0x28] sm:$0xff] }
  0xbc   : > { %v3952_v4 = vrot.slane %v2386_v47, 5 }
  0xc1   : > { %3156 = vmatmul.msk.bf16.gmra.mxu1 %vm594_vm6, %v958_v13  ;;  %3178 = vmatmul.msk.bf16.gmra.mxu2 %vm594_vm6, %v1219_v18  ;;  %v1091_v13 = vld [vmem:[#allocation2 + $0x48] sm:$0xe]  ;;  %v909_v18 = vrot.slane %v907_v2, 5  ;;  %v1543_v2 = vld [vmem:[#allocation2 + $0x64] sm:$0xf] }
  0xc2   : > { %v3166_v1 = vrot.slane %v1091_v13, 9 }
  0xc3   : > { %v910_v32 = vsel %vm3768_vm12, %v905_v17, %v909_v18  ;;  %v919_v18 = vrot.slane %v918_v60, 4 }
  0xc4   : > { %3224 = vmatmul.msk.bf16.gmra.mxu3 %vm594_vm6, %v3363_v14  ;;  %3238 = vmatmul.msk.bf16.gmra.mxu0 %vm594_vm6, %v1776_v35  ;;  %v1093_v14 = vld [vmem:[#allocation2 + $0x50] sm:$0x1]  ;;  %v1725_v35 = vshll.u32 %v1541_v22, 16  ;;  %v1185_v41 = vsel %vm3761_vm11, %v3166_v1, %v1184_v7  ;;  %v951_v43 = vunpack.c.l.b16 %v910_v32  ;;  %v1743_v7 = vshrl.u32 %v1543_v2, 16  ;;  %v530_v1 = vld [vmem:[#allocation3] sm:$0xff] }
  0xc5   : > { %v1187_v26 = vrot.slane %v1093_v14, 5  ;;  %v1211_v53 = vunpack.c.l.b16 %v1185_v41  ;;  %v3365_v14 = vld [vmem:[#allocation2 + $0x54] sm:$0xff]  ;;  %v929_v22 = vrot.slane %v928_v61, 4  ;;  %v924_v36 = vsel %vm3768_vm12, %v919_v18, %v3924_v49  ;;  %v531_v61 = vld [vmem:[#allocation3 + $0x8] sm:$0xff] }
  0xc6   : > { %v1727_v46 = vrot.slane %v1725_v35, 5  ;;  %v960_v59 = vpack.c.b16 %v951_v43, %v950_v40  ;;  %v1745_v21 = vrot.slane %v1743_v7, 4  ;;  %v542_v35 = vld [vmem:[#allocation3 + $0x60] sm:$0xff]  ;;  %v1192_v41 = vsel %vm3761_vm11, %v3167_v24, %v1191_v10 }
  0xc7   : > { %v1188_v42 = vsel %vm3761_vm11, %v1186_v25, %v1187_v26  ;;  %v1193_v25 = vrot.slane %v1191_v10, 4  ;;  %v1194_v26 = vrot.slane %v1096_v15, 5  ;;  %v934_v40 = vsel %vm3768_vm12, %v929_v22, %v933_v23  ;;  %v1893_v22 = vld [vmem:[#allocation2 + $0x14] sm:$0x1] }
  0xc8   : > { %v1212_v54 = vunpack.c.l.b16 %v1188_v42  ;;  %v1728_v58 = vsel %vm3768_vm12, %v1723_v45, %v1727_v46  ;;  %v2377_v42 = vshrl.u32 %v2336_v28, 16  ;;  %v2380_v43 = vshll.u32 %v2336_v28, 16  ;;  %v2707_v28 = vld [vmem:[#allocation2 + $0x1c] sm:$0xf] }
  0xc9   : > { %v1769_v12 = vunpack.c.l.b16 %v1728_v58  ;;  %v1195_v46 = vsel %vm3761_vm11, %v1193_v25, %v1194_v26  ;;  %v953_v58 = vunpack.c.l.b16 %v934_v40  ;;  %v3366_v26 = vld [vmem:[#allocation2 + $0x60] sm:$0xff]  ;;  %v2772_v40 = vrot.slane %v2707_v28, 5 }
  0xca   : > { %v1221_v8 = vpack.c.b16 %v1212_v54, %v1211_v53  ;;  %v1751_v54 = vrot.slane %v1749_v33, 5  ;;  %v1214_v60 = vunpack.c.l.b16 %v1195_v46  ;;  %v2379_v63 = vrot.slane %v2377_v42, 4  ;;  %v537_v46 = vld [vmem:[#allocation3 + $0x38] sm:$0xff] }
  0xd1   : > { %3157 = vmatmul.msk.bf16.gmra.mxu1 %vm594_vm6, %v959_v6  ;;  %3179 = vmatmul.msk.bf16.gmra.mxu2 %vm594_vm6, %v1220_v11  ;;  %v1739_v6 = vshll.u32 %v1543_v2, 16  ;;  %v1768_v11 = vunpack.c.l.b16 %v1718_v56  ;;  %v952_v56 = vunpack.c.l.b16 %v924_v36  ;;  %v2382_v2 = vrot.slane %v2380_v43, 5  ;;  %v2706_v43 = vld [vmem:[#allocation2 + $0x18] sm:$0xe] }
  0xd3   : > { %v3931_v20 = vrot.slane %v1739_v6, 5  ;;  %v1778_v27 = vpack.c.b16 %v1769_v12, %v1768_v11  ;;  %v539_v6 = vld [vmem:[#allocation3 + $0x48] sm:$0xff]  ;;  %v961_v10 = vpack.c.b16 %v953_v58, %v952_v56 }
  0xd4   : > { %3225 = vmatmul.msk.bf16.gmra.mxu3 %vm594_vm6, %v3364_v16  ;;  %3239 = vmatmul.msk.bf16.gmra.mxu0 %vm594_vm6, %v1777_v29  ;;  %v1735_v16 = vrot.slane %v1733_v5, 5  ;;  %v538_v29 = vld [vmem:[#allocation3 + $0x40] sm:$0xff]  ;;  %v2392_v5 = vrot.slane %v2390_v48, 4  ;;  %v543_v11 = vld [vmem:[#allocation3 + $0x68] sm:$0xff] }
  0xd5   : > { %v1746_v32 = vor.u32 %v1745_v21, %v3931_v20  ;;  %v1891_v21 = vld [vmem:[#allocation2 + $0xc] sm:$0xe] }
  0xd6   : > { %v1736_v31 = vor.u32 %v1735_v16, %v1732_v0  ;;  %v1957_v0 = vrot.slane %v1892_v62, 5  ;;  %v2383_v16 = vor.u32 %v2382_v2, %v2379_v63  ;;  %v2393_v24 = vor.u32 %v2392_v5, %v3952_v4 }
  0xd7   : > { %v1747_v53 = vrot.slane %v1746_v32, 4  ;;  %v532_v32 = vld [vmem:[#allocation3 + $0x10] sm:$0xff] }
  0xd8   : > { %v1737_v51 = vrot.slane %v1736_v31, 4  ;;  %v1960_v31 = vrot.slane %v1893_v22, 5  ;;  %v2384_v34 = vrot.slane %v2383_v16, 4  ;;  %v2341_v16 = vld [vmem:[#allocation2 + $0x2c] sm:$0x1] }
  0xd9   : > { %v1752_v9 = vsel %vm3768_vm12, %v1747_v53, %v1751_v54 }
  0xda   : > { %v2389_v53 = vsel %vm3768_vm12, %v2384_v34, %v3952_v4  ;;  %v533_v4 = vld [vmem:[#allocation3 + $0x18] sm:$0xff] }
  0xde   : > { %v638_v13 = vpop.f32.mrf.mxu1 }
  0xdf   : > { %v672_v17 = vadd.f32 %v638_v13, %v534_v3  ;;  %v2338_v3 = vld [vmem:[#allocation2 + $0x20] sm:$0x1] }
  0xe1   : > { %688 = vst.msk [vmem:[#allocation3 + $0x20] sm:$0xff] %vm497_vm13, %v672_v17  ;;  %3158 = vmatmul.msk.bf16.gmra.mxu1 %vm594_vm6, %v960_v59  ;;  %3180 = vmatmul.msk.bf16.gmra.mxu2 %vm594_vm6, %v1221_v8  ;;  %v628_v30 = vpop.f32.mrf.mxu0  ;;  %v1213_v59 = vunpack.c.l.b16 %v1192_v41  ;;  %v1742_v8 = vsel %vm3768_vm12, %v1737_v51, %v3931_v20  ;;  %v2396_v17 = vshll.u32 %v2338_v3, 16  ;;  %v1771_v20 = vunpack.c.l.b16 %v1752_v9  ;;  %v544_v41 = vld [vmem:[#allocation3 + $0x70] sm:$0xff] }
  0xe2   : > { %v668_v37 = vadd.f32 %v628_v30, %v530_v1  ;;  %v1770_v23 = vunpack.c.l.b16 %v1742_v8  ;;  %v1959_v30 = vrot.slane %v1957_v0, 4  ;;  %v541_v8 = vld [vmem:[#allocation3 + $0x58] sm:$0xff] }
  0xe3   : > { %v1222_v15 = vpack.c.b16 %v1214_v60, %v1213_v59  ;;  %v2398_v36 = vrot.slane %v2396_v17, 5  ;;  %v3324_v59 = vrot.slane %v2706_v43, 9  ;;  %v2774_v60 = vrot.slane %v2772_v40, 4 }
  0xe4   : > { %3226 = vmatmul.msk.bf16.gmra.mxu3 %vm594_vm6, %v3365_v14  ;;  %v648_v38 = vpop.f32.mrf.mxu2  ;;  %684 = vst.msk [vmem:[#allocation3] sm:$0xff] %vm497_vm13, %v668_v37  ;;  %3240 = vmatmul.msk.bf16.gmra.mxu0 %vm594_vm6, %v1778_v27  ;;  %v536_v14 = vld [vmem:[#allocation3 + $0x30] sm:$0xff]  ;;  %v1779_v33 = vpack.c.b16 %v1771_v20, %v1770_v23  ;;  %v1961_v48 = vsel %vm3761_vm11, %v1959_v30, %v1960_v31 }
  0xe5   : > { %v676_v44 = vadd.f32 %v648_v38, %v538_v29  ;;  %v3242_v29 = vrot.slane %v1891_v21, 9  ;;  %v540_v37 = vld [vmem:[#allocation3 + $0x50] sm:$0xff] }
  0xe6   : > { %v640_v49 = vpop.f32.mrf.mxu1 }
  0xe7   : > { %v658_v45 = vpop.f32.mrf.mxu3  ;;  %692 = vst.msk [vmem:[#allocation3 + $0x40] sm:$0xff] %vm497_vm13, %v676_v44  ;;  %v673_v55 = vadd.f32 %v640_v49, %v535_v39  ;;  %v2339_v39 = vld [vmem:[#allocation2 + $0x24] sm:$0xf]  ;;  %v2708_v44 = vld [vmem:[#allocation2 + $0x20] sm:$0x1]  ;;  %v1958_v47 = vsel %vm3761_vm11, %v3242_v29, %v1957_v0 }
  0xe8   : > { %v680_v50 = vadd.f32 %v658_v45, %v542_v35  ;;  %v2394_v35 = vrot.slane %v2393_v24, 4  ;;  %v2340_v49 = vld [vmem:[#allocation2 + $0x28] sm:$0xf]  ;;  %v2404_v63 = vshll.u32 %v2339_v39, 16  ;;  %v2014_v5 = vunpack.c.l.b16 %v1958_v47  ;;  %v3370_v24 = vld [vmem:[#allocation2 + $0x18] sm:$0xff] }
  0xe9   : > { %689 = vst.msk [vmem:[#allocation3 + $0x28] sm:$0xff] %vm497_vm13, %v673_v55  ;;  %v630_v7 = vpop.f32.mrf.mxu0  ;;  %v2401_v55 = vshrl.u32 %v2339_v39, 16  ;;  %v2410_v2 = vshll.u32 %v2340_v49, 16  ;;  %v2414_v3 = vshrl.u32 %v2340_v49, 16  ;;  %v2709_v49 = vld [vmem:[#allocation2 + $0x24] sm:$0xe] }
  0xea   : > { %696 = vst.msk [vmem:[#allocation3 + $0x60] sm:$0xff] %vm497_vm13, %v680_v50  ;;  %v669_v12 = vadd.f32 %v630_v7, %v531_v61  ;;  %v2399_v54 = vsel %vm3768_vm12, %v2394_v35, %v2398_v36  ;;  %v2775_v61 = vrot.slane %v2708_v44, 5  ;;  %v2571_v7 = vunpack.c.l.b16 %v2389_v53 }
  0xeb   : > { %v2572_v9 = vunpack.c.l.b16 %v2399_v54  ;;  %v2406_v17 = vrot.slane %v2404_v63, 5  ;;  %v724_v22 = vld [vmem:[#allocation3] sm:$0xff]  ;;  %v3325_v63 = vrot.slane %v2709_v49, 9 }
  0xec   : > { %v650_v13 = vpop.f32.mrf.mxu2  ;;  %685 = vst.msk [vmem:[#allocation3 + $0x8] sm:$0xff] %vm497_vm13, %v669_v12  ;;  %v2403_v12 = vrot.slane %v2401_v55, 4  ;;  %v2345_v49 = vld [vmem:[#allocation2 + $0x3c] sm:$0xf] }
  0xed   : > { %v677_v18 = vadd.f32 %v650_v13, %v539_v6  ;;  %v2015_v6 = vunpack.c.l.b16 %v1961_v48  ;;  %v2773_v13 = vsel %vm3761_vm11, %v3324_v59, %v2772_v40  ;;  %v2587_v31 = vpack.c.b16 %v2572_v9, %v2571_v7 }
  0xee   : > { %v643_v1 = vpop.f32.mrf.mxu1  ;;  %v2407_v35 = vor.u32 %v2406_v17, %v2403_v12 }
  0xef   : > { %v660_v19 = vpop.f32.mrf.mxu3  ;;  %693 = vst.msk [vmem:[#allocation3 + $0x48] sm:$0xff] %vm497_vm13, %v677_v18  ;;  %v674_v27 = vadd.f32 %v643_v1, %v536_v14  ;;  %v2776_v14 = vsel %vm3761_vm11, %v2774_v60, %v2775_v61  ;;  %v3985_v18 = vrot.slane %v2410_v2, 5  ;;  %v2030_v23 = vpack.c.b16 %v2015_v6, %v2014_v5 }
  0xf0   : > { %v681_v25 = vadd.f32 %v660_v19, %v543_v11  ;;  %v1895_v11 = vld [vmem:[#allocation2 + $0x1c] sm:$0xf]  ;;  %v2416_v19 = vrot.slane %v2414_v3, 4  ;;  %v2830_v28 = vunpack.c.l.b16 %v2776_v14  ;;  %v2408_v47 = vrot.slane %v2407_v35, 4 }
  0xf1   : > { %690 = vst.msk [vmem:[#allocation3 + $0x30] sm:$0xff] %vm497_vm13, %v674_v27  ;;  %3159 = vmatmul.msk.bf16.gmra.mxu1 %vm594_vm6, %v961_v10  ;;  %3181 = vmatmul.msk.bf16.gmra.mxu2 %vm594_vm6, %v1222_v15  ;;  %v633_v38 = vpop.f32.mrf.mxu0  ;;  %v545_v15 = vld [vmem:[#allocation3 + $0x78] sm:$0xff]  ;;  %v2829_v27 = vunpack.c.l.b16 %v2773_v13  ;;  %v2344_v13 = vld [vmem:[#allocation2 + $0x38] sm:$0x1] }
  0xf2   : > { %697 = vst.msk [vmem:[#allocation3 + $0x68] sm:$0xff] %vm497_vm13, %v681_v25  ;;  %v670_v42 = vadd.f32 %v633_v38, %v532_v32  ;;  %v1894_v25 = vld [vmem:[#allocation2 + $0x18] sm:$0xe]  ;;  %v1896_v32 = vld [vmem:[#allocation2 + $0x20] sm:$0x1]  ;;  %v2417_v36 = vor.u32 %v2416_v19, %v3985_v18  ;;  %v2413_v6 = vsel %vm3768_vm12, %v2408_v47, %v3985_v18 }
  0xf3   : > { %v3243_v38 = vrot.slane %v1894_v25, 9  ;;  %v1967_v40 = vrot.slane %v1896_v32, 5  ;;  %v725_v53 = vld [vmem:[#allocation3 + $0x8] sm:$0xff] }
  0xf4   : > { %3227 = vmatmul.msk.bf16.gmra.mxu3 %vm594_vm6, %v3366_v26  ;;  %v653_v45 = vpop.f32.mrf.mxu2  ;;  %686 = vst.msk [vmem:[#allocation3 + $0x10] sm:$0xff] %vm497_vm13, %v670_v42  ;;  %3241 = vmatmul.msk.bf16.gmra.mxu0 %vm594_vm6, %v1779_v33  ;;  %v1964_v26 = vrot.slane %v1895_v11, 5  ;;  %v2420_v33 = vshll.u32 %v2341_v16, 16  ;;  %v2342_v42 = vld [vmem:[#allocation2 + $0x30] sm:$0xf]  ;;  %v2418_v48 = vrot.slane %v2417_v36, 4  ;;  %v2573_v16 = vunpack.c.l.b16 %v2413_v6 }
  0xf5   : > { %v678_v50 = vadd.f32 %v653_v45, %v540_v37  ;;  %v2710_v37 = vld [vmem:[#allocation2 + $0x28] sm:$0xf]  ;;  %v2343_v45 = vld [vmem:[#allocation2 + $0x34] sm:$0xf]  ;;  %v2425_v55 = vshrl.u32 %v2342_v42, 16  ;;  %v2428_v59 = vshll.u32 %v2342_v42, 16 }
  0xf6   : > { %v645_v56 = vpop.f32.mrf.mxu1  ;;  %v1966_v39 = vrot.slane %v1964_v26, 4  ;;  %v2422_v44 = vrot.slane %v2420_v33, 5  ;;  %v1965_v54 = vsel %vm3761_vm11, %v3243_v38, %v1964_v26  ;;  %v2434_v60 = vshll.u32 %v2343_v45, 16  ;;  %v3371_v25 = vld [vmem:[#allocation2 + $0x24] sm:$0xff]  ;;  %v2713_v36 = vld [vmem:[#allocation2 + $0x34] sm:$0xf] }
  0xf7   : > { %v663_v51 = vpop.f32.mrf.mxu3  ;;  %694 = vst.msk [vmem:[#allocation3 + $0x50] sm:$0xff] %vm497_vm13, %v678_v50  ;;  %v675_v62 = vadd.f32 %v645_v56, %v537_v46  ;;  %v2779_v46 = vrot.slane %v2710_v37, 5  ;;  %v2711_v50 = vld [vmem:[#allocation2 + $0x2c] sm:$0x1]  ;;  %v2438_v61 = vshrl.u32 %v2343_v45, 16  ;;  %v2427_v11 = vrot.slane %v2425_v55, 4 }
  0xf8   : > { %v682_v58 = vadd.f32 %v663_v51, %v544_v41  ;;  %v2845_v41 = vpack.c.b16 %v2830_v28, %v2829_v27  ;;  %v2782_v3 = vrot.slane %v2711_v50, 5  ;;  %v2430_v14 = vrot.slane %v2428_v59, 5  ;;  %v1897_v27 = vld [vmem:[#allocation2 + $0x24] sm:$0xe]  ;;  %v1899_v28 = vld [vmem:[#allocation2 + $0x2c] sm:$0x1] }
  0xf9   : > { %691 = vst.msk [vmem:[#allocation3 + $0x38] sm:$0xff] %vm497_vm13, %v675_v62  ;;  %v635_v10 = vpop.f32.mrf.mxu0  ;;  %v2781_v2 = vrot.slane %v2779_v46, 4  ;;  %v2780_v18 = vsel %vm3761_vm11, %v3325_v63, %v2779_v46  ;;  %v3244_v38 = vrot.slane %v1897_v27, 9  ;;  %v2786_v50 = vrot.slane %v2713_v36, 5 }
  0xfa   : > { %698 = vst.msk [vmem:[#allocation3 + $0x70] sm:$0xff] %vm497_vm13, %v682_v58  ;;  %v671_v0 = vadd.f32 %v635_v10, %v533_v4  ;;  %v1968_v58 = vsel %vm3761_vm11, %v1966_v39, %v1967_v40  ;;  %v2423_v4 = vsel %vm3768_vm12, %v2418_v48, %v2422_v44  ;;  %v1898_v10 = vld [vmem:[#allocation2 + $0x28] sm:$0xf]  ;;  %v1974_v40 = vrot.slane %v1899_v28, 5 }
  0xfb   : > { %v2017_v9 = vunpack.c.l.b16 %v1968_v58  ;;  %v2574_v17 = vunpack.c.l.b16 %v2423_v4  ;;  %v2788_v4 = vrot.slane %v2786_v50, 4 }
  0xfc   : > { %v655_v21 = vpop.f32.mrf.mxu2  ;;  %687 = vst.msk [vmem:[#allocation3 + $0x18] sm:$0xff] %vm497_vm13, %v671_v0  ;;  %v2440_v0 = vrot.slane %v2438_v61, 4 }
  0xfd   : > { %v679_v20 = vadd.f32 %v655_v21, %v541_v8  ;;  %v2016_v8 = vunpack.c.l.b16 %v1965_v54  ;;  %v2783_v21 = vsel %vm3761_vm11, %v2781_v2, %v2782_v3  ;;  %v2714_v54 = vld [vmem:[#allocation2 + $0x38] sm:$0x1]  ;;  %v2449_v2 = vshrl.u32 %v2345_v49, 16 }
  0xfe   : > { %v1001_v29 = vpop.f32.mrf.mxu1  ;;  %v2832_v32 = vunpack.c.l.b16 %v2783_v21 }
  0xff   : > { %v665_v1 = vpop.f32.mrf.mxu3  ;;  %695 = vst.msk [vmem:[#allocation3 + $0x58] sm:$0xff] %vm497_vm13, %v679_v20  ;;  %v1041_v34 = vadd.f32 %v1001_v29, %v724_v22  ;;  %v2031_v20 = vpack.c.b16 %v2017_v9, %v2016_v8  ;;  %v2431_v29 = vor.u32 %v2430_v14, %v2427_v11  ;;  %v2451_v21 = vrot.slane %v2449_v2, 4 }
 0x100   : > { %v683_v30 = vadd.f32 %v665_v1, %v545_v15  ;;  %v4010_v15 = vrot.slane %v2434_v60, 5  ;;  %v2444_v1 = vshll.u32 %v2344_v13, 16  ;;  %v2346_v60 = vld [vmem:[#allocation2 + $0x40] sm:$0xf] }
 0x101   : > { %1057 = vst.msk [vmem:[#allocation3] sm:$0xff] %vm497_vm13, %v1041_v34  ;;  %3256 = vmatmul.msk.bf16.vlgmr.msra.gmra.mxu1 %vm594_vm6, %v2030_v23  ;;  %3302 = vmatmul.msk.bf16.vlgmr.msra.gmra.mxu2 %vm594_vm6, %v3370_v24  ;;  %v3995_v43 = vpop.f32.mrf.mxu0  ;;  %v726_v23 = vld [vmem:[#allocation3 + $0x10] sm:$0xff]  ;;  %v1971_v24 = vrot.slane %v1898_v10, 5  ;;  %v2588_v34 = vpack.c.b16 %v2574_v17, %v2573_v16  ;;  %v2432_v44 = vrot.slane %v2431_v29, 4  ;;  %v2458_v9 = vshll.u32 %v2346_v60, 16 }
 0x102   : > { %699 = vst.msk [vmem:[#allocation3 + $0x78] sm:$0xff] %vm497_vm13, %v683_v30  ;;  %v2441_v30 = vor.u32 %v2440_v0, %v4010_v15  ;;  %v2462_v10 = vshrl.u32 %v2346_v60, 16 }
 0x103   : > { %v1973_v39 = vrot.slane %v1971_v24, 4  ;;  %v727_v58 = vld [vmem:[#allocation3 + $0x18] sm:$0xff]  ;;  %v1972_v59 = vsel %vm3761_vm11, %v3244_v38, %v1971_v24 }
 0x104   : > { %3316 = vmatmul.msk.bf16.vlgmr.msra.gmra.mxu3 %vm594_vm6, %v2587_v31  ;;  %v1262_v51 = vpop.f32.mrf.mxu2  ;;  %3338 = vmatmul.msk.bf16.vlgmr.msra.gmra.mxu0 %vm594_vm6, %v2845_v41  ;;  %v2831_v31 = vunpack.c.l.b16 %v2780_v18  ;;  %v2446_v41 = vrot.slane %v2444_v1, 5  ;;  %v2442_v45 = vrot.slane %v2441_v30, 4  ;;  %v1901_v18 = vld [vmem:[#allocation2 + $0x34] sm:$0xf]  ;;  %v2347_v1 = vld [vmem:[#allocation2 + $0x44] sm:$0x1] }
 0x105   : > { %v2464_v27 = vrot.slane %v2462_v10, 4 }
 0x106   : > { %v1003_v62 = vpop.f32.mrf.mxu1  ;;  %v2846_v46 = vpack.c.b16 %v2832_v32, %v2831_v31  ;;  %v2447_v63 = vsel %vm3768_vm12, %v2442_v45, %v2446_v41  ;;  %v3372_v32 = vld [vmem:[#allocation2 + $0x30] sm:$0xff] }
 0x107   : > { %v3999_v56 = vpop.f32.mrf.mxu3  ;;  %v1042_v5 = vadd.f32 %v1003_v62, %v725_v53  ;;  %v2712_v53 = vld [vmem:[#allocation2 + $0x30] sm:$0xe]  ;;  %v1975_v62 = vsel %vm3761_vm11, %v1973_v39, %v1974_v40  ;;  %v2576_v0 = vunpack.c.l.b16 %v2447_v63  ;;  %v1902_v40 = vld [vmem:[#allocation2 + $0x38] sm:$0x1] }
 0x108   : > { %v1097_v7 = vld [vmem:[#allocation3] sm:$0xff]  ;;  %v3326_v6 = vrot.slane %v2712_v53, 9  ;;  %v2019_v13 = vunpack.c.l.b16 %v1975_v62  ;;  %v2349_v62 = vld [vmem:[#allocation2 + $0x4c] sm:$0xf] }
 0x109   : > { %v1302_v12 = vadd.f32 %v1262_v51, %v1097_v7  ;;  %1058 = vst.msk [vmem:[#allocation3 + $0x8] sm:$0xff] %vm497_vm13, %v1042_v5  ;;  %v4012_v19 = vpop.f32.mrf.mxu0  ;;  %v2452_v5 = vshll.u32 %v2345_v49, 16  ;;  %v2789_v7 = vrot.slane %v2714_v54, 5  ;;  %v2348_v54 = vld [vmem:[#allocation2 + $0x48] sm:$0xf] }
 0x10b   : > { %1318 = vst.msk [vmem:[#allocation3] sm:$0xff] %vm497_vm13, %v1302_v12  ;;  %v2018_v12 = vunpack.c.l.b16 %v1972_v59 }
 0x10c   : > { %v1264_v22 = vpop.f32.mrf.mxu2 }
 0x10d   : > { %v2032_v30 = vpack.c.b16 %v2019_v13, %v2018_v12  ;;  %v2482_v12 = vshll.u32 %v2349_v62, 16  ;;  %v2486_v13 = vshrl.u32 %v2349_v62, 16  ;;  %v2719_v62 = vld [vmem:[#allocation2 + $0x4c] sm:$0xf] }
 0x10e   : > { %v1006_v33 = vpop.f32.mrf.mxu1 }
 0x10f   : > { %v4019_v26 = vpop.f32.mrf.mxu3  ;;  %v1043_v35 = vadd.f32 %v1006_v33, %v726_v23  ;;  %v2787_v23 = vsel %vm3761_vm11, %v3326_v6, %v2786_v50 }
 0x110   : > { %v1098_v37 = vld [vmem:[#allocation3 + $0x8] sm:$0xff]  ;;  %v2833_v36 = vunpack.c.l.b16 %v2787_v23 }
 0x111   : > { %v1303_v42 = vadd.f32 %v1264_v22, %v1098_v37  ;;  %1059 = vst.msk [vmem:[#allocation3 + $0x10] sm:$0xff] %vm497_vm13, %v1043_v35  ;;  %3257 = vmatmul.msk.bf16.gmra.mxu1 %vm594_vm6, %v2031_v20  ;;  %3303 = vmatmul.msk.bf16.gmra.mxu2 %vm594_vm6, %v3371_v25  ;;  %v4026_v48 = vpop.f32.mrf.mxu0  ;;  %v2454_v22 = vrot.slane %v2452_v5, 5  ;;  %v2790_v20 = vsel %vm3761_vm11, %v2788_v4, %v2789_v7  ;;  %v4052_v25 = vrot.slane %v2458_v9, 5  ;;  %v728_v37 = vld [vmem:[#allocation3 + $0x20] sm:$0xff]  ;;  %v2717_v5 = vld [vmem:[#allocation2 + $0x44] sm:$0x1] }
 0x112   : > { %v1351_v47 = vld [vmem:[#allocation3] sm:$0xff]  ;;  %v1978_v35 = vrot.slane %v1901_v18, 5  ;;  %v2476_v9 = vshll.u32 %v2348_v54, 16  ;;  %v2796_v18 = vrot.slane %v2717_v5, 5 }
 0x113   : > { %v1489_v51 = vadd.f32 %v3999_v56, %v1351_v47  ;;  %1319 = vst.msk [vmem:[#allocation3 + $0x8] sm:$0xff] %vm497_vm13, %v1303_v42  ;;  %v2437_v56 = vsel %vm3768_vm12, %v2432_v44, %v4010_v15  ;;  %v2455_v41 = vor.u32 %v2454_v22, %v2451_v21  ;;  %v2468_v42 = vshll.u32 %v2347_v1, 16  ;;  %v1904_v1 = vld [vmem:[#allocation2 + $0x40] sm:$0xf] }
 0x114   : > { %3317 = vmatmul.msk.bf16.gmra.mxu3 %vm594_vm6, %v2588_v34  ;;  %v1267_v55 = vpop.f32.mrf.mxu2  ;;  %3339 = vmatmul.msk.bf16.gmra.mxu0 %vm594_vm6, %v2846_v46  ;;  %v2575_v15 = vunpack.c.l.b16 %v2437_v56  ;;  %v1900_v34 = vld [vmem:[#allocation2 + $0x30] sm:$0xe]  ;;  %v2465_v45 = vor.u32 %v2464_v27, %v4052_v25  ;;  %v2716_v46 = vld [vmem:[#allocation2 + $0x40] sm:$0xf]  ;;  %v1980_v50 = vrot.slane %v1978_v35, 4 }
 0x115   : > { %1505 = vst.msk [vmem:[#allocation3] sm:$0xff] %vm497_vm13, %v1489_v51  ;;  %v3245_v47 = vrot.slane %v1900_v34, 9  ;;  %v1981_v51 = vrot.slane %v1902_v40, 5  ;;  %v2456_v59 = vrot.slane %v2455_v41, 4  ;;  %v2470_v60 = vrot.slane %v2468_v42, 5 }
 0x116   : > { %v1008_v3 = vpop.f32.mrf.mxu1  ;;  %v2589_v39 = vpack.c.b16 %v2576_v0, %v2575_v15  ;;  %v2793_v56 = vrot.slane %v2716_v46, 5  ;;  %v2466_v2 = vrot.slane %v2465_v45, 4  ;;  %v1985_v42 = vrot.slane %v1904_v1, 5 }
 0x117   : > { %v4033_v61 = vpop.f32.mrf.mxu3  ;;  %v1044_v8 = vadd.f32 %v1008_v3, %v727_v58  ;;  %v2715_v3 = vld [vmem:[#allocation2 + $0x3c] sm:$0xe]  ;;  %v1979_v7 = vsel %vm3761_vm11, %v3245_v47, %v1978_v35 }
 0x118   : > { %v1099_v11 = vld [vmem:[#allocation3 + $0x10] sm:$0xff]  ;;  %v3327_v0 = vrot.slane %v2715_v3, 9  ;;  %v2471_v22 = vsel %vm3768_vm12, %v2466_v2, %v2470_v60  ;;  %v1987_v2 = vrot.slane %v1985_v42, 4 }
 0x119   : > { %v1304_v14 = vadd.f32 %v1267_v55, %v1099_v11  ;;  %1060 = vst.msk [vmem:[#allocation3 + $0x18] sm:$0xff] %vm497_vm13, %v1044_v8  ;;  %v4044_v17 = vpop.f32.mrf.mxu0  ;;  %v2473_v8 = vshrl.u32 %v2348_v54, 16  ;;  %v730_v54 = vld [vmem:[#allocation3 + $0x30] sm:$0xff] }
 0x11a   : > { %v1352_v16 = vld [vmem:[#allocation3 + $0x8] sm:$0xff] }
 0x11b   : > { %v1490_v24 = vadd.f32 %v4019_v26, %v1352_v16  ;;  %1320 = vst.msk [vmem:[#allocation3 + $0x10] sm:$0xff] %vm497_vm13, %v1304_v14  ;;  %v2834_v26 = vunpack.c.l.b16 %v2790_v20  ;;  %v729_v14 = vld [vmem:[#allocation3 + $0x28] sm:$0xff]  ;;  %v2795_v16 = vrot.slane %v2793_v56, 4  ;;  %v2020_v20 = vunpack.c.l.b16 %v1979_v7 }
 0x11c   : > { %v1545_v28 = vld [vmem:[#allocation3] sm:$0xff]  ;;  %v1269_v29 = vpop.f32.mrf.mxu2  ;;  %v2475_v27 = vrot.slane %v2473_v8, 4 }
 0x11d   : > { %1506 = vst.msk [vmem:[#allocation3 + $0x8] sm:$0xff] %vm497_vm13, %v1490_v24  ;;  %v1859_v31 = vadd.f32 %v3995_v43, %v1545_v28  ;;  %v2847_v53 = vpack.c.b16 %v2834_v26, %v2833_v36  ;;  %v2478_v28 = vrot.slane %v2476_v9, 5  ;;  %v2578_v36 = vunpack.c.l.b16 %v2471_v22 }
 0x11e   : > { %v1011_v38 = vpop.f32.mrf.mxu1  ;;  %v2794_v26 = vsel %vm3761_vm11, %v3327_v0, %v2793_v56 }
 0x11f   : > { %v4056_v33 = vpop.f32.mrf.mxu3  ;;  %1875 = vst.msk [vmem:[#allocation3] sm:$0xff] %vm497_vm13, %v1859_v31  ;;  %v1045_v44 = vadd.f32 %v1011_v38, %v728_v37  ;;  %v4084_v31 = vrot.slane %v2482_v12, 5  ;;  %v2797_v37 = vsel %vm3761_vm11, %v2795_v16, %v2796_v18 }
 0x120   : > { %v1100_v43 = vld [vmem:[#allocation3 + $0x18] sm:$0xff] }
 0x121   : > { %v1305_v49 = vadd.f32 %v1269_v29, %v1100_v43  ;;  %1061 = vst.msk [vmem:[#allocation3 + $0x20] sm:$0xff] %vm497_vm13, %v1045_v44  ;;  %3258 = vmatmul.msk.bf16.gmra.mxu1 %vm594_vm6, %v2032_v30  ;;  %3304 = vmatmul.msk.bf16.gmra.mxu2 %vm594_vm6, %v3372_v32  ;;  %v4064_v58 = vpop.f32.mrf.mxu0  ;;  %v2350_v30 = vld [vmem:[#allocation2 + $0x50] sm:$0x1]  ;;  %v2488_v32 = vrot.slane %v2486_v13, 4  ;;  %v2479_v44 = vor.u32 %v2478_v28, %v2475_v27  ;;  %v3373_v43 = vld [vmem:[#allocation2 + $0x3c] sm:$0xff] }
 0x122   : > { %v1353_v55 = vld [vmem:[#allocation3 + $0x10] sm:$0xff]  ;;  %v2492_v45 = vshll.u32 %v2350_v30, 16 }
 0x123   : > { %v1491_v63 = vadd.f32 %v4033_v61, %v1353_v55  ;;  %1321 = vst.msk [vmem:[#allocation3 + $0x18] sm:$0xff] %vm497_vm13, %v1305_v49  ;;  %v1982_v61 = vsel %vm3761_vm11, %v1980_v50, %v1981_v51  ;;  %v1903_v49 = vld [vmem:[#allocation2 + $0x3c] sm:$0xe]  ;;  %v1905_v50 = vld [vmem:[#allocation2 + $0x44] sm:$0x1]  ;;  %v2489_v51 = vor.u32 %v2488_v32, %v4084_v31 }
 0x124   : > { %3318 = vmatmul.msk.bf16.gmra.mxu3 %vm594_vm6, %v2589_v39  ;;  %v1546_v6 = vld [vmem:[#allocation3 + $0x8] sm:$0xff]  ;;  %v1272_v4 = vpop.f32.mrf.mxu2  ;;  %3340 = vmatmul.msk.bf16.gmra.mxu0 %vm594_vm6, %v2847_v53  ;;  %v2021_v24 = vunpack.c.l.b16 %v1982_v61  ;;  %v2836_v53 = vunpack.c.l.b16 %v2797_v37  ;;  %v2494_v3 = vrot.slane %v2492_v45, 5  ;;  %v2800_v61 = vrot.slane %v2719_v62, 5  ;;  %v2718_v13 = vld [vmem:[#allocation2 + $0x48] sm:$0xe] }
 0x125   : > { %1507 = vst.msk [vmem:[#allocation3 + $0x10] sm:$0xff] %vm497_vm13, %v1491_v63  ;;  %v1860_v10 = vadd.f32 %v4012_v19, %v1546_v6  ;;  %v2461_v19 = vsel %vm3768_vm12, %v2456_v59, %v4052_v25  ;;  %v3246_v63 = vrot.slane %v1903_v49, 9  ;;  %v2480_v6 = vrot.slane %v2479_v44, 4  ;;  %v2353_v49 = vld [vmem:[#allocation2 + $0x5c] sm:$0x1] }
 0x126   : > { %v1013_v15 = vpop.f32.mrf.mxu1  ;;  %v2577_v35 = vunpack.c.l.b16 %v2461_v19  ;;  %v2033_v41 = vpack.c.b16 %v2021_v24, %v2020_v20  ;;  %v731_v24 = vld [vmem:[#allocation3 + $0x38] sm:$0xff]  ;;  %v3328_v28 = vrot.slane %v2718_v13, 9  ;;  %v1906_v62 = vld [vmem:[#allocation2 + $0x48] sm:$0xe] }
 0x127   : > { %v4072_v11 = vpop.f32.mrf.mxu3  ;;  %1876 = vst.msk [vmem:[#allocation3 + $0x8] sm:$0xff] %vm497_vm13, %v1860_v10  ;;  %v1046_v21 = vadd.f32 %v1013_v15, %v729_v14  ;;  %v2351_v10 = vld [vmem:[#allocation2 + $0x54] sm:$0xf]  ;;  %v2720_v14 = vld [vmem:[#allocation2 + $0x50] sm:$0x1]  ;;  %v1986_v16 = vsel %vm3761_vm11, %v3246_v63, %v1985_v42 }
 0x128   : > { %v1101_v23 = vld [vmem:[#allocation3 + $0x20] sm:$0xff]  ;;  %v2590_v59 = vpack.c.b16 %v2578_v36, %v2577_v35  ;;  %v2497_v20 = vshrl.u32 %v2351_v10, 16  ;;  %v2500_v27 = vshll.u32 %v2351_v10, 16  ;;  %v2803_v30 = vrot.slane %v2720_v14, 5 }
 0x129   : > { %v1306_v29 = vadd.f32 %v1272_v4, %v1101_v23  ;;  %1062 = vst.msk [vmem:[#allocation3 + $0x28] sm:$0xff] %vm497_vm13, %v1046_v21  ;;  %v4086_v25 = vpop.f32.mrf.mxu0  ;;  %v2490_v4 = vrot.slane %v2489_v51, 4  ;;  %v2352_v21 = vld [vmem:[#allocation2 + $0x58] sm:$0xf]  ;;  %v2022_v36 = vunpack.c.l.b16 %v1986_v16  ;;  %v2801_v45 = vsel %vm3761_vm11, %v3328_v28, %v2800_v61 }
 0x12a   : > { %v1354_v34 = vld [vmem:[#allocation3 + $0x18] sm:$0xff]  ;;  %v2506_v32 = vshll.u32 %v2352_v21, 16  ;;  %v2499_v42 = vrot.slane %v2497_v20, 4  ;;  %v2502_v44 = vrot.slane %v2500_v27, 5  ;;  %v2837_v63 = vunpack.c.l.b16 %v2801_v45  ;;  %v2722_v10 = vld [vmem:[#allocation2 + $0x58] sm:$0xf] }
 0x12b   : > { %v1492_v38 = vadd.f32 %v4056_v33, %v1354_v34  ;;  %1322 = vst.msk [vmem:[#allocation3 + $0x20] sm:$0xff] %vm497_vm13, %v1306_v29  ;;  %v2835_v33 = vunpack.c.l.b16 %v2794_v26  ;;  %v2495_v23 = vsel %vm3768_vm12, %v2490_v4, %v2494_v3  ;;  %v2802_v29 = vrot.slane %v2800_v61, 4  ;;  %v2723_v27 = vld [vmem:[#allocation2 + $0x5c] sm:$0x1] }
 0x12c   : > { %v1547_v39 = vld [vmem:[#allocation3 + $0x10] sm:$0xff]  ;;  %v1274_v40 = vpop.f32.mrf.mxu2  ;;  %v2510_v34 = vshrl.u32 %v2352_v21, 16  ;;  %v2516_v4 = vshll.u32 %v2353_v49, 16  ;;  %v3247_v61 = vrot.slane %v1906_v62, 9  ;;  %v1910_v49 = vld [vmem:[#allocation2 + $0x58] sm:$0xf] }
 0x12d   : > { %1508 = vst.msk [vmem:[#allocation3 + $0x18] sm:$0xff] %vm497_vm13, %v1492_v38  ;;  %v1861_v46 = vadd.f32 %v4026_v48, %v1547_v39  ;;  %v1988_v48 = vrot.slane %v1905_v50, 5  ;;  %v2848_v7 = vpack.c.b16 %v2836_v53, %v2835_v33  ;;  %v2580_v38 = vunpack.c.l.b16 %v2495_v23 }
 0x12e   : > { %v1016_v55 = vpop.f32.mrf.mxu1  ;;  %v4132_v50 = vrot.slane %v2506_v32, 5  ;;  %v2512_v51 = vrot.slane %v2510_v34, 4  ;;  %v2807_v23 = vrot.slane %v2722_v10, 5 }
 0x12f   : > { %v4096_v47 = vpop.f32.mrf.mxu3  ;;  %1877 = vst.msk [vmem:[#allocation3 + $0x10] sm:$0xff] %vm497_vm13, %v1861_v46  ;;  %v1047_v60 = vadd.f32 %v1016_v55, %v730_v54  ;;  %v1989_v18 = vsel %vm3761_vm11, %v1987_v2, %v1988_v48  ;;  %v2804_v46 = vsel %vm3761_vm11, %v2802_v29, %v2803_v30  ;;  %v732_v2 = vld [vmem:[#allocation3 + $0x40] sm:$0xff] }
 0x130   : > { %v1102_v56 = vld [vmem:[#allocation3 + $0x28] sm:$0xff] }
 0x131   : > { %v1307_v5 = vadd.f32 %v1274_v40, %v1102_v56  ;;  %1063 = vst.msk [vmem:[#allocation3 + $0x30] sm:$0xff] %vm497_vm13, %v1047_v60  ;;  %3259 = vmatmul.msk.bf16.gmra.mxu1 %vm594_vm6, %v2033_v41  ;;  %3305 = vmatmul.msk.bf16.gmra.mxu2 %vm594_vm6, %v3373_v43  ;;  %v4104_v9 = vpop.f32.mrf.mxu0  ;;  %v1907_v41 = vld [vmem:[#allocation2 + $0x4c] sm:$0xf] }
 0x132   : > { %v1355_v8 = vld [vmem:[#allocation3 + $0x20] sm:$0xff]  ;;  %v1992_v56 = vrot.slane %v1907_v41, 5  ;;  %v2810_v41 = vrot.slane %v2723_v27, 5 }
 0x133   : > { %v1493_v12 = vadd.f32 %v4072_v11, %v1355_v8  ;;  %1323 = vst.msk [vmem:[#allocation3 + $0x28] sm:$0xff] %vm497_vm13, %v1307_v5  ;;  %v2485_v11 = vsel %vm3768_vm12, %v2480_v6, %v4084_v31  ;;  %v2023_v31 = vunpack.c.l.b16 %v1989_v18  ;;  %v1908_v5 = vld [vmem:[#allocation2 + $0x50] sm:$0x1]  ;;  %v2503_v6 = vor.u32 %v2502_v44, %v2499_v42 }
 0x134   : > { %3319 = vmatmul.msk.bf16.gmra.mxu3 %vm594_vm6, %v2590_v59  ;;  %v1548_v15 = vld [vmem:[#allocation3 + $0x18] sm:$0xff]  ;;  %v1277_v0 = vpop.f32.mrf.mxu2  ;;  %3341 = vmatmul.msk.bf16.gmra.mxu0 %vm594_vm6, %v2848_v7  ;;  %v2579_v37 = vunpack.c.l.b16 %v2485_v11  ;;  %v3374_v59 = vld [vmem:[#allocation2 + $0x48] sm:$0xff]  ;;  %v2513_v8 = vor.u32 %v2512_v51, %v4132_v50  ;;  %v1994_v13 = vrot.slane %v1992_v56, 4  ;;  %v1995_v14 = vrot.slane %v1908_v5, 5  ;;  %v2355_v11 = vld [vmem:[#allocation2 + $0x64] sm:$0xf] }
 0x135   : > { %1509 = vst.msk [vmem:[#allocation3 + $0x20] sm:$0xff] %vm497_vm13, %v1493_v12  ;;  %v1862_v19 = vadd.f32 %v4044_v17, %v1548_v15  ;;  %v2034_v54 = vpack.c.b16 %v2023_v31, %v2022_v36  ;;  %v2504_v21 = vrot.slane %v2503_v6, 4  ;;  %v1993_v30 = vsel %vm3761_vm11, %v3247_v61, %v1992_v56 }
 0x136   : > { %v1018_v1 = vpop.f32.mrf.mxu1  ;;  %v2591_v3 = vpack.c.b16 %v2580_v38, %v2579_v37  ;;  %v2530_v36 = vshll.u32 %v2355_v11, 16  ;;  %v2534_v31 = vshrl.u32 %v2355_v11, 16  ;;  %v2725_v11 = vld [vmem:[#allocation2 + $0x64] sm:$0xf] }
 0x137   : > { %v4114_v22 = vpop.f32.mrf.mxu3  ;;  %1878 = vst.msk [vmem:[#allocation3 + $0x18] sm:$0xff] %vm497_vm13, %v1862_v19  ;;  %v1048_v17 = vadd.f32 %v1018_v1, %v731_v24  ;;  %v2518_v19 = vrot.slane %v2516_v4, 5  ;;  %v2514_v24 = vrot.slane %v2513_v8, 4  ;;  %v2721_v1 = vld [vmem:[#allocation2 + $0x54] sm:$0xe]  ;;  %v1999_v4 = vrot.slane %v1910_v49, 5 }
 0x138   : > { %v1103_v35 = vld [vmem:[#allocation3 + $0x30] sm:$0xff]  ;;  %v3329_v38 = vrot.slane %v2721_v1, 9 }
 0x139   : > { %v1308_v26 = vadd.f32 %v1277_v0, %v1103_v35  ;;  %1064 = vst.msk [vmem:[#allocation3 + $0x38] sm:$0xff] %vm497_vm13, %v1048_v17  ;;  %v4124_v40 = vpop.f32.mrf.mxu0  ;;  %v2354_v0 = vld [vmem:[#allocation2 + $0x60] sm:$0xf]  ;;  %v2519_v44 = vsel %vm3768_vm12, %v2514_v24, %v2518_v19  ;;  %v2001_v24 = vrot.slane %v1999_v4, 4 }
 0x13a   : > { %v1356_v39 = vld [vmem:[#allocation3 + $0x28] sm:$0xff]  ;;  %v2521_v17 = vshrl.u32 %v2354_v0, 16  ;;  %v2524_v32 = vshll.u32 %v2354_v0, 16  ;;  %v734_v0 = vld [vmem:[#allocation3 + $0x50] sm:$0xff] }
 0x13b   : > { %v1494_v43 = vadd.f32 %v4096_v47, %v1356_v39  ;;  %1324 = vst.msk [vmem:[#allocation3 + $0x30] sm:$0xff] %vm497_vm13, %v1308_v26  ;;  %v2838_v47 = vunpack.c.l.b16 %v2804_v46  ;;  %v733_v26 = vld [vmem:[#allocation3 + $0x48] sm:$0xff]  ;;  %v2809_v39 = vrot.slane %v2807_v23, 4  ;;  %v2024_v46 = vunpack.c.l.b16 %v1993_v30 }
 0x13c   : > { %v1549_v33 = vld [vmem:[#allocation3 + $0x20] sm:$0xff]  ;;  %v1279_v53 = vpop.f32.mrf.mxu2  ;;  %v2523_v51 = vrot.slane %v2521_v17, 4 }
 0x13d   : > { %1510 = vst.msk [vmem:[#allocation3 + $0x28] sm:$0xff] %vm497_vm13, %v1494_v43  ;;  %v1863_v55 = vadd.f32 %v4064_v58, %v1549_v33  ;;  %v2849_v15 = vpack.c.b16 %v2838_v47, %v2837_v63  ;;  %v2526_v33 = vrot.slane %v2524_v32, 5  ;;  %v2582_v63 = vunpack.c.l.b16 %v2519_v44 }
 0x13e   : > { %v1021_v48 = vpop.f32.mrf.mxu1  ;;  %v2808_v47 = vsel %vm3761_vm11, %v3329_v38, %v2807_v23 }
 0x13f   : > { %v4136_v60 = vpop.f32.mrf.mxu3  ;;  %1879 = vst.msk [vmem:[#allocation3 + $0x20] sm:$0xff] %vm497_vm13, %v1863_v55  ;;  %v1049_v7 = vadd.f32 %v1021_v48, %v732_v2  ;;  %v4164_v55 = vrot.slane %v2530_v36, 5  ;;  %v2811_v2 = vsel %vm3761_vm11, %v2809_v39, %v2810_v41 }
 0x140   : > { %v1104_v58 = vld [vmem:[#allocation3 + $0x38] sm:$0xff] }
 0x141   : > { %v1309_v12 = vadd.f32 %v1279_v53, %v1104_v58  ;;  %1065 = vst.msk [vmem:[#allocation3 + $0x40] sm:$0xff] %vm497_vm13, %v1049_v7  ;;  %3260 = vmatmul.msk.bf16.gmra.mxu1 %vm594_vm6, %v2034_v54  ;;  %3306 = vmatmul.msk.bf16.gmra.mxu2 %vm594_vm6, %v3374_v59  ;;  %v4144_v18 = vpop.f32.mrf.mxu0  ;;  %v2356_v54 = vld [vmem:[#allocation2 + $0x68] sm:$0x1]  ;;  %v2536_v59 = vrot.slane %v2534_v31, 4  ;;  %v2527_v7 = vor.u32 %v2526_v33, %v2523_v51  ;;  %v3375_v58 = vld [vmem:[#allocation2 + $0x54] sm:$0xff] }
 0x142   : > { %v1357_v16 = vld [vmem:[#allocation3 + $0x30] sm:$0xff]  ;;  %v2540_v8 = vshll.u32 %v2356_v54, 16  ;;  %v2724_v31 = vld [vmem:[#allocation2 + $0x60] sm:$0xe] }
 0x143   : > { %v1495_v20 = vadd.f32 %v4114_v22, %v1357_v16  ;;  %1325 = vst.msk [vmem:[#allocation3 + $0x38] sm:$0xff] %vm497_vm13, %v1309_v12  ;;  %v1996_v22 = vsel %vm3761_vm11, %v1994_v13, %v1995_v14  ;;  %v1909_v12 = vld [vmem:[#allocation2 + $0x54] sm:$0xe]  ;;  %v1911_v13 = vld [vmem:[#allocation2 + $0x5c] sm:$0x1]  ;;  %v2537_v14 = vor.u32 %v2536_v59, %v4164_v55  ;;  %v3330_v33 = vrot.slane %v2724_v31, 9 }
 0x144   : > { %3320 = vmatmul.msk.bf16.gmra.mxu3 %vm594_vm6, %v2591_v3  ;;  %v1550_v28 = vld [vmem:[#allocation3 + $0x28] sm:$0xff]  ;;  %v1282_v29 = vpop.f32.mrf.mxu2  ;;  %3342 = vmatmul.msk.bf16.gmra.mxu0 %vm594_vm6, %v2849_v15  ;;  %v2025_v43 = vunpack.c.l.b16 %v1996_v22  ;;  %v2840_v15 = vunpack.c.l.b16 %v2811_v2  ;;  %v2542_v1 = vrot.slane %v2540_v8, 5  ;;  %v2814_v22 = vrot.slane %v2725_v11, 5 }
 0x145   : > { %1511 = vst.msk [vmem:[#allocation3 + $0x30] sm:$0xff] %vm497_vm13, %v1495_v20  ;;  %v1864_v34 = vadd.f32 %v4086_v25, %v1550_v28  ;;  %v2509_v25 = vsel %vm3768_vm12, %v2504_v21, %v4132_v50  ;;  %v3248_v20 = vrot.slane %v1909_v12, 9  ;;  %v2528_v28 = vrot.slane %v2527_v7, 4  ;;  %v2359_v12 = vld [vmem:[#allocation2 + $0x74] sm:$0x1] }
 0x146   : > { %v1023_v37 = vpop.f32.mrf.mxu1  ;;  %v2581_v56 = vunpack.c.l.b16 %v2509_v25  ;;  %v2035_v6 = vpack.c.b16 %v2025_v43, %v2024_v46  ;;  %v735_v43 = vld [vmem:[#allocation3 + $0x58] sm:$0xff]  ;;  %v2815_v8 = vsel %vm3761_vm11, %v3330_v33, %v2814_v22 }
 0x147   : > { %v4152_v35 = vpop.f32.mrf.mxu3  ;;  %1880 = vst.msk [vmem:[#allocation3 + $0x28] sm:$0xff] %vm497_vm13, %v1864_v34  ;;  %v1050_v42 = vadd.f32 %v1023_v37, %v733_v26  ;;  %v2357_v34 = vld [vmem:[#allocation2 + $0x6c] sm:$0xf]  ;;  %v2726_v26 = vld [vmem:[#allocation2 + $0x68] sm:$0x1]  ;;  %v2000_v39 = vsel %vm3761_vm11, %v3248_v20, %v1999_v4 }
 0x148   : > { %v1105_v45 = vld [vmem:[#allocation3 + $0x40] sm:$0xff]  ;;  %v2592_v21 = vpack.c.b16 %v2582_v63, %v2581_v56  ;;  %v2545_v46 = vshrl.u32 %v2357_v34, 16  ;;  %v2548_v51 = vshll.u32 %v2357_v34, 16  ;;  %v2817_v54 = vrot.slane %v2726_v26, 5  ;;  %v2728_v34 = vld [vmem:[#allocation2 + $0x70] sm:$0xf] }
 0x149   : > { %v1310_v53 = vadd.f32 %v1282_v29, %v1105_v45  ;;  %1066 = vst.msk [vmem:[#allocation3 + $0x48] sm:$0xff] %vm497_vm13, %v1050_v42  ;;  %v4166_v50 = vpop.f32.mrf.mxu0  ;;  %v2538_v29 = vrot.slane %v2537_v14, 4  ;;  %v2358_v42 = vld [vmem:[#allocation2 + $0x70] sm:$0xf]  ;;  %v2026_v63 = vunpack.c.l.b16 %v2000_v39 }
 0x14a   : > { %v1358_v62 = vld [vmem:[#allocation3 + $0x38] sm:$0xff]  ;;  %v2554_v59 = vshll.u32 %v2358_v42, 16  ;;  %v2547_v4 = vrot.slane %v2545_v46, 4  ;;  %v2550_v7 = vrot.slane %v2548_v51, 5  ;;  %v2727_v46 = vld [vmem:[#allocation2 + $0x6c] sm:$0xe] }
 0x14b   : > { %v1496_v48 = vadd.f32 %v4136_v60, %v1358_v62  ;;  %1326 = vst.msk [vmem:[#allocation3 + $0x40] sm:$0xff] %vm497_vm13, %v1310_v53  ;;  %v2839_v60 = vunpack.c.l.b16 %v2808_v47  ;;  %v2543_v45 = vsel %vm3768_vm12, %v2538_v29, %v2542_v1  ;;  %v2816_v53 = vrot.slane %v2814_v22, 4  ;;  %v1912_v1 = vld [vmem:[#allocation2 + $0x60] sm:$0xe] }
 0x14c   : > { %v1551_v3 = vld [vmem:[#allocation3 + $0x30] sm:$0xff]  ;;  %v1284_v5 = vpop.f32.mrf.mxu2  ;;  %v2558_v62 = vshrl.u32 %v2358_v42, 16 }
 0x14d   : > { %1512 = vst.msk [vmem:[#allocation3 + $0x38] sm:$0xff] %vm497_vm13, %v1496_v48  ;;  %v1865_v10 = vadd.f32 %v4104_v9, %v1551_v3  ;;  %v2002_v9 = vrot.slane %v1911_v13, 5  ;;  %v2850_v30 = vpack.c.b16 %v2840_v15, %v2839_v60  ;;  %v2584_v48 = vunpack.c.l.b16 %v2543_v45 }
 0x14e   : > { %v1026_v16 = vpop.f32.mrf.mxu1  ;;  %v4212_v13 = vrot.slane %v2554_v59, 5  ;;  %v2560_v14 = vrot.slane %v2558_v62, 4  ;;  %v3331_v62 = vrot.slane %v2727_v46, 9 }
 0x14f   : > { %v4176_v61 = vpop.f32.mrf.mxu3  ;;  %1881 = vst.msk [vmem:[#allocation3 + $0x30] sm:$0xff] %vm497_vm13, %v1865_v10  ;;  %v1051_v19 = vadd.f32 %v1026_v16, %v734_v0  ;;  %v2003_v41 = vsel %vm3761_vm11, %v2001_v24, %v2002_v9  ;;  %v2818_v10 = vsel %vm3761_vm11, %v2816_v53, %v2817_v54 }
 0x150   : > { %v1106_v23 = vld [vmem:[#allocation3 + $0x48] sm:$0xff]  ;;  %v2842_v20 = vunpack.c.l.b16 %v2818_v10 }
 0x151   : > { %v1311_v27 = vadd.f32 %v1284_v5, %v1106_v23  ;;  %1067 = vst.msk [vmem:[#allocation3 + $0x50] sm:$0xff] %vm497_vm13, %v1051_v19  ;;  %3261 = vmatmul.msk.bf16.gmra.mxu1 %vm594_vm6, %v2035_v6  ;;  %3307 = vmatmul.msk.bf16.gmra.mxu2 %vm594_vm6, %v3375_v58  ;;  %v4184_v32 = vpop.f32.mrf.mxu0  ;;  %v1913_v6 = vld [vmem:[#allocation2 + $0x64] sm:$0xf]  ;;  %v2841_v23 = vunpack.c.l.b16 %v2815_v8 }
 0x152   : > { %v1359_v17 = vld [vmem:[#allocation3 + $0x40] sm:$0xff]  ;;  %v2006_v11 = vrot.slane %v1913_v6, 5 }
 0x153   : > { %v1497_v36 = vadd.f32 %v4152_v35, %v1359_v17  ;;  %1327 = vst.msk [vmem:[#allocation3 + $0x48] sm:$0xff] %vm497_vm13, %v1311_v27  ;;  %v2533_v35 = vsel %vm3768_vm12, %v2528_v28, %v4164_v55  ;;  %v2027_v55 = vunpack.c.l.b16 %v2003_v41  ;;  %v2551_v27 = vor.u32 %v2550_v7, %v2547_v4 }
 0x154   : > { %3321 = vmatmul.msk.bf16.gmra.mxu3 %vm594_vm6, %v2592_v21  ;;  %v1552_v37 = vld [vmem:[#allocation3 + $0x38] sm:$0xff]  ;;  %v1287_v38 = vpop.f32.mrf.mxu2  ;;  %3343 = vmatmul.msk.bf16.gmra.mxu0 %vm594_vm6, %v2850_v30  ;;  %v2583_v2 = vunpack.c.l.b16 %v2533_v35  ;;  %v3376_v21 = vld [vmem:[#allocation2 + $0x60] sm:$0xff]  ;;  %v2564_v28 = vshll.u32 %v2359_v12, 16  ;;  %v1914_v30 = vld [vmem:[#allocation2 + $0x68] sm:$0x1]  ;;  %v2561_v17 = vor.u32 %v2560_v14, %v4212_v13  ;;  %v2008_v31 = vrot.slane %v2006_v11, 4 }
 0x155   : > { %1513 = vst.msk [vmem:[#allocation3 + $0x40] sm:$0xff] %vm497_vm13, %v1497_v36  ;;  %v1866_v25 = vadd.f32 %v4124_v40, %v1552_v37  ;;  %v2036_v0 = vpack.c.b16 %v2027_v55, %v2026_v63  ;;  %v3249_v36 = vrot.slane %v1912_v1, 9  ;;  %v2851_v26 = vpack.c.b16 %v2842_v20, %v2841_v23  ;;  %v738_v23 = vld [vmem:[#allocation3 + $0x70] sm:$0xff] }
 0x156   : > { %v1028_v49 = vpop.f32.mrf.mxu1  ;;  %v2593_v9 = vpack.c.b16 %v2584_v48, %v2583_v2  ;;  %v2552_v41 = vrot.slane %v2551_v27, 4  ;;  %v2566_v42 = vrot.slane %v2564_v28, 5  ;;  %v2562_v45 = vrot.slane %v2561_v17, 4 }
 0x157   : > { %v4194_v44 = vpop.f32.mrf.mxu3  ;;  %1882 = vst.msk [vmem:[#allocation3 + $0x38] sm:$0xff] %vm497_vm13, %v1866_v25  ;;  %v1052_v40 = vadd.f32 %v1028_v49, %v735_v43  ;;  %v2821_v25 = vrot.slane %v2728_v34, 5  ;;  %v2729_v43 = vld [vmem:[#allocation2 + $0x74] sm:$0x1]  ;;  %v2007_v54 = vsel %vm3761_vm11, %v3249_v36, %v2006_v11 }
 0x158   : > { %v1107_v56 = vld [vmem:[#allocation3 + $0x50] sm:$0xff]  ;;  %v2824_v63 = vrot.slane %v2729_v43, 5  ;;  %v739_v34 = vld [vmem:[#allocation3 + $0x78] sm:$0xff] }
 0x159   : > { %v1312_v47 = vadd.f32 %v1287_v38, %v1107_v56  ;;  %1068 = vst.msk [vmem:[#allocation3 + $0x58] sm:$0xff] %vm497_vm13, %v1052_v40  ;;  %v4204_v5 = vpop.f32.mrf.mxu0  ;;  %v2009_v38 = vrot.slane %v1914_v30, 5  ;;  %v737_v40 = vld [vmem:[#allocation3 + $0x68] sm:$0xff]  ;;  %v2823_v56 = vrot.slane %v2821_v25, 4 }
 0x15a   : > { %v1360_v3 = vld [vmem:[#allocation3 + $0x48] sm:$0xff] }
 0x15b   : > { %v1498_v58 = vadd.f32 %v4176_v61, %v1360_v3  ;;  %1328 = vst.msk [vmem:[#allocation3 + $0x50] sm:$0xff] %vm497_vm13, %v1312_v47  ;;  %v736_v61 = vld [vmem:[#allocation3 + $0x60] sm:$0xff]  ;;  %v2567_v47 = vsel %vm3768_vm12, %v2562_v45, %v2566_v42  ;;  %v2028_v3 = vunpack.c.l.b16 %v2007_v54  ;;  %v2825_v12 = vsel %vm3761_vm11, %v2823_v56, %v2824_v63 }
 0x15c   : > { %v1553_v60 = vld [vmem:[#allocation3 + $0x40] sm:$0xff]  ;;  %v1289_v15 = vpop.f32.mrf.mxu2  ;;  %v2586_v8 = vunpack.c.l.b16 %v2567_v47  ;;  %v2844_v11 = vunpack.c.l.b16 %v2825_v12 }
 0x15d   : > { %1514 = vst.msk [vmem:[#allocation3 + $0x48] sm:$0xff] %vm497_vm13, %v1498_v58  ;;  %v1867_v16 = vadd.f32 %v4144_v18, %v1553_v60  ;;  %v2822_v58 = vsel %vm3761_vm11, %v3331_v62, %v2821_v25 }
 0x15e   : > { %v1031_v24 = vpop.f32.mrf.mxu1 }
 0x15f   : > { %v4216_v19 = vpop.f32.mrf.mxu3  ;;  %1883 = vst.msk [vmem:[#allocation3 + $0x40] sm:$0xff] %vm497_vm13, %v1867_v16  ;;  %v1053_v29 = vadd.f32 %v1031_v24, %v736_v61 }
 0x160   : > { %v1108_v18 = vld [vmem:[#allocation3 + $0x58] sm:$0xff] }
 0x161   : > { %v1313_v22 = vadd.f32 %v1289_v15, %v1108_v18  ;;  %1069 = vst.msk [vmem:[#allocation3 + $0x60] sm:$0xff] %vm497_vm13, %v1053_v29  ;;  %3262 = vmatmul.msk.bf16.gmra.mxu1 %vm594_vm6, %v2036_v0  ;;  %3308 = vmatmul.msk.bf16.gmra.mxu2 %vm594_vm6, %v3376_v21  ;;  %v4224_v39 = vpop.f32.mrf.mxu0  ;;  %v3377_v0 = vld [vmem:[#allocation2 + $0x6c] sm:$0xff]  ;;  %v2843_v21 = vunpack.c.l.b16 %v2822_v58 }
 0x162   : > { %v1361_v37 = vld [vmem:[#allocation3 + $0x50] sm:$0xff] }
 0x163   : > { %v1499_v35 = vadd.f32 %v4194_v44, %v1361_v37  ;;  %1329 = vst.msk [vmem:[#allocation3 + $0x58] sm:$0xff] %vm497_vm13, %v1313_v22  ;;  %v2010_v44 = vsel %vm3761_vm11, %v2008_v31, %v2009_v38 }
 0x164   : > { %3322 = vmatmul.msk.bf16.gmra.mxu3 %vm594_vm6, %v2593_v9  ;;  %v1554_v49 = vld [vmem:[#allocation3 + $0x48] sm:$0xff]  ;;  %v1292_v51 = vpop.f32.mrf.mxu2  ;;  %3344 = vmatmul.msk.bf16.gmra.mxu0 %vm594_vm6, %v2851_v26  ;;  %v2029_v6 = vunpack.c.l.b16 %v2010_v44 }
 0x165   : > { %1515 = vst.msk [vmem:[#allocation3 + $0x50] sm:$0xff] %vm497_vm13, %v1499_v35  ;;  %v1868_v33 = vadd.f32 %v4166_v50, %v1554_v49  ;;  %v2557_v50 = vsel %vm3768_vm12, %v2552_v41, %v4212_v13  ;;  %v1915_v35 = vld [vmem:[#allocation3] sm:$0xff]  ;;  %v1916_v44 = vld [vmem:[#allocation3 + $0x8] sm:$0xff] }
 0x166   : > { %v1033_v59 = vpop.f32.mrf.mxu1  ;;  %v2585_v7 = vunpack.c.l.b16 %v2557_v50  ;;  %v2037_v15 = vpack.c.b16 %v2029_v6, %v2028_v3 }
 0x167   : > { %v1479_v53 = vpop.f32.mrf.mxu3  ;;  %1884 = vst.msk [vmem:[#allocation3 + $0x48] sm:$0xff] %vm497_vm13, %v1868_v33  ;;  %v1054_v55 = vadd.f32 %v1033_v59, %v737_v40 }
 0x168   : > { %v1109_v2 = vld [vmem:[#allocation3 + $0x60] sm:$0xff]  ;;  %v2594_v61 = vpack.c.b16 %v2586_v8, %v2585_v7  ;;  %v1917_v7 = vld [vmem:[#allocation3 + $0x10] sm:$0xff] }
 0x169   : > { %v1314_v48 = vadd.f32 %v1292_v51, %v1109_v2  ;;  %1070 = vst.msk [vmem:[#allocation3 + $0x68] sm:$0xff] %vm497_vm13, %v1054_v55  ;;  %v4242_v10 = vpop.f32.mrf.mxu0 }
 0x16a   : > { %v1362_v4 = vld [vmem:[#allocation3 + $0x58] sm:$0xff] }
 0x16b   : > { %v1500_v57 = vadd.f32 %v4216_v19, %v1362_v4  ;;  %1330 = vst.msk [vmem:[#allocation3 + $0x60] sm:$0xff] %vm497_vm13, %v1314_v48 }
 0x16c   : > { %v1555_v13 = vld [vmem:[#allocation3 + $0x50] sm:$0xff]  ;;  %v1294_v14 = vpop.f32.mrf.mxu2 }
 0x16d   : > { %1516 = vst.msk [vmem:[#allocation3 + $0x58] sm:$0xff] %vm497_vm13, %v1500_v57  ;;  %v1869_v60 = vadd.f32 %v4184_v32, %v1555_v13  ;;  %v2852_v32 = vpack.c.b16 %v2844_v11, %v2843_v21  ;;  %v1918_v21 = vld [vmem:[#allocation3 + $0x18] sm:$0xff] }
 0x16e   : > { %v1036_v20 = vpop.f32.mrf.mxu1 }
 0x16f   : > { %v1481_v16 = vpop.f32.mrf.mxu3  ;;  %1885 = vst.msk [vmem:[#allocation3 + $0x50] sm:$0xff] %vm497_vm13, %v1869_v60  ;;  %v1055_v52 = vadd.f32 %v1036_v20, %v738_v23 }
 0x170   : > { %v1110_v19 = vld [vmem:[#allocation3 + $0x68] sm:$0xff] }
 0x171   : > { %v1315_v24 = vadd.f32 %v1294_v14, %v1110_v19  ;;  %1071 = vst.msk [vmem:[#allocation3 + $0x70] sm:$0xff] %vm497_vm13, %v1055_v52  ;;  %3263 = vmatmul.msk.bf16.gmra.mxu1 %vm594_vm6, %v2037_v15  ;;  %3309 = vmatmul.msk.bf16.gmra.mxu2 %vm594_vm6, %v3377_v0  ;;  %v1854_v1 = vpop.f32.mrf.mxu0 }
 0x172   : > { %v1363_v9 = vld [vmem:[#allocation3 + $0x60] sm:$0xff] }
 0x173   : > { %v1501_v27 = vadd.f32 %v1479_v53, %v1363_v9  ;;  %1331 = vst.msk [vmem:[#allocation3 + $0x68] sm:$0xff] %vm497_vm13, %v1315_v24 }
 0x174   : > { %3323 = vmatmul.msk.bf16.gmra.mxu3 %vm594_vm6, %v2594_v61  ;;  %v1556_v28 = vld [vmem:[#allocation3 + $0x58] sm:$0xff]  ;;  %v1297_v29 = vpop.f32.mrf.mxu2  ;;  %3345 = vmatmul.msk.bf16.gmra.mxu0 %vm594_vm6, %v2852_v32 }
 0x175   : > { %1517 = vst.msk [vmem:[#allocation3 + $0x60] sm:$0xff] %vm497_vm13, %v1501_v27  ;;  %v1870_v30 = vadd.f32 %v4204_v5, %v1556_v28  ;;  %v1919_v28 = vld [vmem:[#allocation3 + $0x20] sm:$0xff] }
 0x176   : > { %v1038_v18 = vpop.f32.mrf.mxu1 }
 0x177   : > { %v1484_v17 = vpop.f32.mrf.mxu3  ;;  %1886 = vst.msk [vmem:[#allocation3 + $0x58] sm:$0xff] %vm497_vm13, %v1870_v30  ;;  %v1056_v22 = vadd.f32 %v1038_v18, %v739_v34 }
 0x178   : > { %v1111_v36 = vld [vmem:[#allocation3 + $0x70] sm:$0xff] }
 0x179   : > { %v1316_v31 = vadd.f32 %v1297_v29, %v1111_v36  ;;  %1072 = vst.msk [vmem:[#allocation3 + $0x78] sm:$0xff] %vm497_vm13, %v1056_v22  ;;  %v1856_v37 = vpop.f32.mrf.mxu0 }
 0x17a   : > { %v1364_v26 = vld [vmem:[#allocation3 + $0x68] sm:$0xff] }
 0x17b   : > { %v1502_v38 = vadd.f32 %v1481_v16, %v1364_v26  ;;  %1332 = vst.msk [vmem:[#allocation3 + $0x70] sm:$0xff] %vm497_vm13, %v1316_v31 }
 0x17c   : > { %v1557_v41 = vld [vmem:[#allocation3 + $0x60] sm:$0xff]  ;;  %v1299_v42 = vpop.f32.mrf.mxu2 }
 0x17d   : > { %1518 = vst.msk [vmem:[#allocation3 + $0x68] sm:$0xff] %vm497_vm13, %v1502_v38  ;;  %v1871_v5 = vadd.f32 %v4224_v39, %v1557_v41 }
 0x17e   : > { %v2077_v45 = vpop.f32.mrf.mxu1 }
 0x17f   : > { %v1486_v25 = vpop.f32.mrf.mxu3  ;;  %1887 = vst.msk [vmem:[#allocation3 + $0x60] sm:$0xff] %vm497_vm13, %v1871_v5  ;;  %v2117_v46 = vadd.f32 %v2077_v45, %v1915_v35 }
 0x180   : > { %v1112_v43 = vld [vmem:[#allocation3 + $0x78] sm:$0xff] }
 0x181   : > { %v1317_v49 = vadd.f32 %v1299_v42, %v1112_v43  ;;  %2133 = vst.msk [vmem:[#allocation3] sm:$0xff] %vm497_vm13, %v2117_v46  ;;  %v2892_v33 = vpop.f32.mrf.mxu0  ;;  %v1920_v42 = vld [vmem:[#allocation3 + $0x28] sm:$0xff] }
 0x182   : > { %v1365_v51 = vld [vmem:[#allocation3 + $0x70] sm:$0xff] }
 0x183   : > { %v1503_v53 = vadd.f32 %v1484_v17, %v1365_v51  ;;  %1333 = vst.msk [vmem:[#allocation3 + $0x78] sm:$0xff] %vm497_vm13, %v1317_v49 }
 0x184   : > { %v1558_v54 = vld [vmem:[#allocation3 + $0x68] sm:$0xff]  ;;  %v2264_v40 = vpop.f32.mrf.mxu2 }
 0x185   : > { %1519 = vst.msk [vmem:[#allocation3 + $0x70] sm:$0xff] %vm497_vm13, %v1503_v53  ;;  %v1872_v39 = vadd.f32 %v4242_v10, %v1558_v54  ;;  %v1921_v54 = vld [vmem:[#allocation3 + $0x30] sm:$0xff] }
 0x186   : > { %v2079_v62 = vpop.f32.mrf.mxu1 }
 0x187   : > { %v2634_v59 = vpop.f32.mrf.mxu3  ;;  %1888 = vst.msk [vmem:[#allocation3 + $0x68] sm:$0xff] %vm497_vm13, %v1872_v39  ;;  %v2118_v56 = vadd.f32 %v2079_v62, %v1916_v44 }
 0x188   : > { %v2166_v63 = vld [vmem:[#allocation3] sm:$0xff] }
 0x189   : > { %v2304_v55 = vadd.f32 %v2264_v40, %v2166_v63  ;;  %2134 = vst.msk [vmem:[#allocation3 + $0x8] sm:$0xff] %vm497_vm13, %v2118_v56  ;;  %v2894_v47 = vpop.f32.mrf.mxu0 }
 0x18a   : > { %v1366_v50 = vld [vmem:[#allocation3 + $0x78] sm:$0xff] }
 0x18b   : > { %v1504_v2 = vadd.f32 %v1486_v25, %v1366_v50  ;;  %2320 = vst.msk [vmem:[#allocation3] sm:$0xff] %vm497_vm13, %v2304_v55 }
 0x18c   : > { %v1559_v48 = vld [vmem:[#allocation3 + $0x70] sm:$0xff]  ;;  %v2266_v3 = vpop.f32.mrf.mxu2 }
 0x18d   : > { %1520 = vst.msk [vmem:[#allocation3 + $0x78] sm:$0xff] %vm497_vm13, %v1504_v2  ;;  %v1873_v6 = vadd.f32 %v1854_v1, %v1559_v48 }
 0x18e   : > { %v2082_v8 = vpop.f32.mrf.mxu1 }
 0x18f   : > { %v2636_v4 = vpop.f32.mrf.mxu3  ;;  %1889 = vst.msk [vmem:[#allocation3 + $0x70] sm:$0xff] %vm497_vm13, %v1873_v6  ;;  %v2119_v10 = vadd.f32 %v2082_v8, %v1917_v7  ;;  %v1922_v6 = vld [vmem:[#allocation3 + $0x38] sm:$0xff] }
 0x190   : > { %v2167_v58 = vld [vmem:[#allocation3 + $0x8] sm:$0xff] }
 0x191   : > { %v2305_v12 = vadd.f32 %v2266_v3, %v2167_v58  ;;  %2135 = vst.msk [vmem:[#allocation3 + $0x10] sm:$0xff] %vm497_vm13, %v2119_v10  ;;  %v2897_v13 = vpop.f32.mrf.mxu0 }
 0x192   : > { %v2360_v57 = vld [vmem:[#allocation3] sm:$0xff] }
 0x193   : > { %v2674_v14 = vadd.f32 %v2634_v59, %v2360_v57  ;;  %2321 = vst.msk [vmem:[#allocation3 + $0x8] sm:$0xff] %vm497_vm13, %v2305_v12 }
 0x194   : > { %v1560_v60 = vld [vmem:[#allocation3 + $0x78] sm:$0xff]  ;;  %v2269_v15 = vpop.f32.mrf.mxu2 }
 0x195   : > { %2690 = vst.msk [vmem:[#allocation3] sm:$0xff] %vm497_vm13, %v2674_v14  ;;  %v1874_v0 = vadd.f32 %v1856_v37, %v1560_v60 }
 0x196   : > { %v2084_v11 = vpop.f32.mrf.mxu1 }
 0x197   : > { %v2639_v16 = vpop.f32.mrf.mxu3  ;;  %1890 = vst.msk [vmem:[#allocation3 + $0x78] sm:$0xff] %vm497_vm13, %v1874_v0  ;;  %v2120_v23 = vadd.f32 %v2084_v11, %v1918_v21  ;;  %v1923_v0 = vld [vmem:[#allocation3 + $0x40] sm:$0xff] }
 0x198   : > { %v2168_v20 = vld [vmem:[#allocation3 + $0x10] sm:$0xff] }
 0x199   : > { %v2306_v61 = vadd.f32 %v2269_v15, %v2168_v20  ;;  %2136 = vst.msk [vmem:[#allocation3 + $0x18] sm:$0xff] %vm497_vm13, %v2120_v23  ;;  %v2899_v24 = vpop.f32.mrf.mxu0 }
 0x19a   : > { %v2361_v52 = vld [vmem:[#allocation3 + $0x8] sm:$0xff] }
 0x19b   : > { %v2675_v19 = vadd.f32 %v2636_v4, %v2361_v52  ;;  %2322 = vst.msk [vmem:[#allocation3 + $0x10] sm:$0xff] %vm497_vm13, %v2306_v61 }
 0x19c   : > { %v2730_v32 = vld [vmem:[#allocation3] sm:$0xff]  ;;  %v2271_v9 = vpop.f32.mrf.mxu2 }
 0x19d   : > { %2691 = vst.msk [vmem:[#allocation3 + $0x8] sm:$0xff] %vm497_vm13, %v2675_v19  ;;  %v2932_v1 = vadd.f32 %v2892_v33, %v2730_v32 }
 0x19e   : > { %v2087_v29 = vpop.f32.mrf.mxu1 }
 0x19f   : > { %v2641_v27 = vpop.f32.mrf.mxu3  ;;  %2948 = vst.msk [vmem:[#allocation3] sm:$0xff] %vm497_vm13, %v2932_v1  ;;  %v2121_v30 = vadd.f32 %v2087_v29, %v1919_v28  ;;  %v1924_v28 = vld [vmem:[#allocation3 + $0x48] sm:$0xff] }
 0x1a0   : > { %v2169_v17 = vld [vmem:[#allocation3 + $0x18] sm:$0xff] }
 0x1a1   : > { %v2307_v34 = vadd.f32 %v2271_v9, %v2169_v17  ;;  %2137 = vst.msk [vmem:[#allocation3 + $0x20] sm:$0xff] %vm497_vm13, %v2121_v30  ;;  %v2902_v38 = vpop.f32.mrf.mxu0 }
 0x1a2   : > { %v2362_v18 = vld [vmem:[#allocation3 + $0x10] sm:$0xff] }
 0x1a3   : > { %v2676_v22 = vadd.f32 %v2639_v16, %v2362_v18  ;;  %2323 = vst.msk [vmem:[#allocation3 + $0x18] sm:$0xff] %vm497_vm13, %v2307_v34 }
 0x1a4   : > { %v2731_v36 = vld [vmem:[#allocation3 + $0x8] sm:$0xff]  ;;  %v2274_v31 = vpop.f32.mrf.mxu2 }
 0x1a5   : > { %2692 = vst.msk [vmem:[#allocation3 + $0x10] sm:$0xff] %vm497_vm13, %v2676_v22  ;;  %v2933_v26 = vadd.f32 %v2894_v47, %v2731_v36 }
 0x1a6   : > { %v2964_v41 = vld [vmem:[#allocation3] sm:$0xff]  ;;  %v2089_v5 = vpop.f32.mrf.mxu1 }
 0x1a7   : > { %v2644_v37 = vpop.f32.mrf.mxu3  ;;  %2980 = vst.msk [vmem:[%s3550_s13] sm:$0xff] %vm497_vm13, %v2964_v41  ;;  %v2122_v25 = vadd.f32 %v2089_v5, %v1920_v42  ;;  %v1925_v41 = vld [vmem:[#allocation3 + $0x50] sm:$0xff] }
 0x1a8   : > { %2949 = vst.msk [vmem:[#allocation3 + $0x8] sm:$0xff] %vm497_vm13, %v2933_v26  ;;  %v2170_v35 = vld [vmem:[#allocation3 + $0x20] sm:$0xff] }
 0x1a9   : > { %v2308_v45 = vadd.f32 %v2274_v31, %v2170_v35  ;;  %2138 = vst.msk [vmem:[#allocation3 + $0x28] sm:$0xff] %vm497_vm13, %v2122_v25  ;;  %v2904_v44 = vpop.f32.mrf.mxu0 }
 0x1aa   : > { %v2363_v46 = vld [vmem:[#allocation3 + $0x18] sm:$0xff] }
 0x1ab   : > { %v2677_v43 = vadd.f32 %v2641_v27, %v2363_v46  ;;  %2324 = vst.msk [vmem:[#allocation3 + $0x20] sm:$0xff] %vm497_vm13, %v2308_v45 }
 0x1ac   : > { %v2732_v49 = vld [vmem:[#allocation3 + $0x10] sm:$0xff]  ;;  %v2276_v51 = vpop.f32.mrf.mxu2 }
 0x1ad   : > { %2693 = vst.msk [vmem:[#allocation3 + $0x18] sm:$0xff] %vm497_vm13, %v2677_v43  ;;  %v2934_v33 = vadd.f32 %v2897_v13, %v2732_v49 }
 0x1ae   : > { %v2092_v40 = vpop.f32.mrf.mxu1 }
 0x1af   : > { %v2646_v53 = vpop.f32.mrf.mxu3  ;;  %v2965_v39 = vld [vmem:[#allocation3 + $0x8] sm:$0xff]  ;;  %2950 = vst.msk [vmem:[#allocation3 + $0x10] sm:$0xff] %vm497_vm13, %v2934_v33  ;;  %v2123_v59 = vadd.f32 %v2092_v40, %v1921_v54  ;;  %v1926_v54 = vld [vmem:[#allocation3 + $0x58] sm:$0xff] }
 0x1b0   : > { %2981 = vst.msk [vmem:[%s3550_s13 + $0x8] sm:$0xff] %vm497_vm13, %v2965_v39  ;;  %v2171_v62 = vld [vmem:[#allocation3 + $0x28] sm:$0xff] }
 0x1b1   : > { %v2309_v56 = vadd.f32 %v2276_v51, %v2171_v62  ;;  %2139 = vst.msk [vmem:[#allocation3 + $0x30] sm:$0xff] %vm497_vm13, %v2123_v59  ;;  %v2907_v58 = vpop.f32.mrf.mxu0 }
 0x1b2   : > { %v2364_v63 = vld [vmem:[#allocation3 + $0x20] sm:$0xff] }
 0x1b3   : > { %v2678_v55 = vadd.f32 %v2644_v37, %v2364_v63  ;;  %2325 = vst.msk [vmem:[#allocation3 + $0x28] sm:$0xff] %vm497_vm13, %v2309_v56 }
 0x1b4   : > { %v2733_v50 = vld [vmem:[#allocation3 + $0x18] sm:$0xff]  ;;  %v2279_v47 = vpop.f32.mrf.mxu2 }
 0x1b5   : > { %2694 = vst.msk [vmem:[#allocation3 + $0x20] sm:$0xff] %vm497_vm13, %v2678_v55  ;;  %v2935_v2 = vadd.f32 %v2899_v24, %v2733_v50 }
 0x1b6   : > { %v2966_v3 = vld [vmem:[#allocation3 + $0x10] sm:$0xff]  ;;  %v2094_v4 = vpop.f32.mrf.mxu1 }
 0x1b7   : > { %v2649_v48 = vpop.f32.mrf.mxu3  ;;  %2982 = vst.msk [vmem:[%s3550_s13 + $0x10] sm:$0xff] %vm497_vm13, %v2966_v3  ;;  %v2124_v7 = vadd.f32 %v2094_v4, %v1922_v6 }
 0x1b8   : > { %2951 = vst.msk [vmem:[#allocation3 + $0x18] sm:$0xff] %vm497_vm13, %v2935_v2  ;;  %v2172_v8 = vld [vmem:[#allocation3 + $0x30] sm:$0xff] }
 0x1b9   : > { %v2310_v10 = vadd.f32 %v2279_v47, %v2172_v8  ;;  %2140 = vst.msk [vmem:[#allocation3 + $0x38] sm:$0xff] %vm497_vm13, %v2124_v7  ;;  %v2909_v19 = vpop.f32.mrf.mxu0 }
 0x1ba   : > { %v2365_v12 = vld [vmem:[#allocation3 + $0x28] sm:$0xff] }
 0x1bb   : > { %v2679_v57 = vadd.f32 %v2646_v53, %v2365_v12  ;;  %2326 = vst.msk [vmem:[#allocation3 + $0x30] sm:$0xff] %vm497_vm13, %v2310_v10 }
 0x1bc   : > { %v2734_v13 = vld [vmem:[#allocation3 + $0x20] sm:$0xff]  ;;  %v2281_v14 = vpop.f32.mrf.mxu2 }
 0x1bd   : > { %2695 = vst.msk [vmem:[#allocation3 + $0x28] sm:$0xff] %vm497_vm13, %v2679_v57  ;;  %v2936_v60 = vadd.f32 %v2902_v38, %v2734_v13 }
 0x1be   : > { %v2097_v16 = vpop.f32.mrf.mxu1 }
 0x1bf   : > { %v2651_v15 = vpop.f32.mrf.mxu3  ;;  %v2967_v21 = vld [vmem:[#allocation3 + $0x18] sm:$0xff]  ;;  %2952 = vst.msk [vmem:[#allocation3 + $0x20] sm:$0xff] %vm497_vm13, %v2936_v60  ;;  %v2125_v11 = vadd.f32 %v2097_v16, %v1923_v0  ;;  %v1928_v0 = vld [vmem:[#allocation3 + $0x68] sm:$0xff] }
 0x1c0   : > { %2983 = vst.msk [vmem:[%s3550_s13 + $0x18] sm:$0xff] %vm497_vm13, %v2967_v21  ;;  %v2173_v23 = vld [vmem:[#allocation3 + $0x38] sm:$0xff] }
 0x1c1   : > { %v2311_v20 = vadd.f32 %v2281_v14, %v2173_v23  ;;  %2141 = vst.msk [vmem:[#allocation3 + $0x40] sm:$0xff] %vm497_vm13, %v2125_v11  ;;  %v2912_v38 = vpop.f32.mrf.mxu0 }
 0x1c2   : > { %v2366_v61 = vld [vmem:[#allocation3 + $0x30] sm:$0xff] }
 0x1c3   : > { %v2680_v52 = vadd.f32 %v2649_v48, %v2366_v61  ;;  %2327 = vst.msk [vmem:[#allocation3 + $0x38] sm:$0xff] %vm497_vm13, %v2311_v20  ;;  %v1927_v48 = vld [vmem:[#allocation3 + $0x60] sm:$0xff] }
 0x1c4   : > { %v2735_v24 = vld [vmem:[#allocation3 + $0x28] sm:$0xff]  ;;  %v2284_v32 = vpop.f32.mrf.mxu2 }
 0x1c5   : > { %2696 = vst.msk [vmem:[#allocation3 + $0x30] sm:$0xff] %vm497_vm13, %v2680_v52  ;;  %v2937_v9 = vadd.f32 %v2904_v44, %v2735_v24 }
 0x1c6   : > { %v2968_v27 = vld [vmem:[#allocation3 + $0x20] sm:$0xff]  ;;  %v2099_v29 = vpop.f32.mrf.mxu1 }
 0x1c7   : > { %v2654_v1 = vpop.f32.mrf.mxu3  ;;  %2984 = vst.msk [vmem:[%s3550_s13 + $0x20] sm:$0xff] %vm497_vm13, %v2968_v27  ;;  %v2126_v30 = vadd.f32 %v2099_v29, %v1924_v28 }
 0x1c8   : > { %2953 = vst.msk [vmem:[#allocation3 + $0x28] sm:$0xff] %vm497_vm13, %v2937_v9  ;;  %v2174_v17 = vld [vmem:[#allocation3 + $0x40] sm:$0xff] }
 0x1c9   : > { %v2312_v34 = vadd.f32 %v2284_v32, %v2174_v17  ;;  %2142 = vst.msk [vmem:[#allocation3 + $0x48] sm:$0xff] %vm497_vm13, %v2126_v30  ;;  %v2914_v44 = vpop.f32.mrf.mxu0 }
 0x1ca   : > { %v2367_v18 = vld [vmem:[#allocation3 + $0x38] sm:$0xff] }
 0x1cb   : > { %v2681_v22 = vadd.f32 %v2651_v15, %v2367_v18  ;;  %2328 = vst.msk [vmem:[#allocation3 + $0x40] sm:$0xff] %vm497_vm13, %v2312_v34 }
 0x1cc   : > { %v2736_v36 = vld [vmem:[#allocation3 + $0x30] sm:$0xff]  ;;  %v2286_v31 = vpop.f32.mrf.mxu2 }
 0x1cd   : > { %2697 = vst.msk [vmem:[#allocation3 + $0x38] sm:$0xff] %vm497_vm13, %v2681_v22  ;;  %v2938_v26 = vadd.f32 %v2907_v58, %v2736_v36 }
 0x1ce   : > { %v2102_v42 = vpop.f32.mrf.mxu1 }
 0x1cf   : > { %v2656_v37 = vpop.f32.mrf.mxu3  ;;  %v2969_v5 = vld [vmem:[#allocation3 + $0x28] sm:$0xff]  ;;  %2954 = vst.msk [vmem:[#allocation3 + $0x30] sm:$0xff] %vm497_vm13, %v2938_v26  ;;  %v2127_v25 = vadd.f32 %v2102_v42, %v1925_v41  ;;  %v1930_v41 = vld [vmem:[#allocation3 + $0x78] sm:$0xff] }
 0x1d0   : > { %2985 = vst.msk [vmem:[%s3550_s13 + $0x28] sm:$0xff] %vm497_vm13, %v2969_v5  ;;  %v2175_v35 = vld [vmem:[#allocation3 + $0x48] sm:$0xff] }
 0x1d1   : > { %v2313_v45 = vadd.f32 %v2286_v31, %v2175_v35  ;;  %2143 = vst.msk [vmem:[#allocation3 + $0x50] sm:$0xff] %vm497_vm13, %v2127_v25  ;;  %v2917_v58 = vpop.f32.mrf.mxu0 }
 0x1d2   : > { %v2368_v46 = vld [vmem:[#allocation3 + $0x40] sm:$0xff] }
 0x1d3   : > { %v2682_v43 = vadd.f32 %v2654_v1, %v2368_v46  ;;  %2329 = vst.msk [vmem:[#allocation3 + $0x48] sm:$0xff] %vm497_vm13, %v2313_v45  ;;  %v1929_v1 = vld [vmem:[#allocation3 + $0x70] sm:$0xff] }
 0x1d4   : > { %v2737_v49 = vld [vmem:[#allocation3 + $0x38] sm:$0xff]  ;;  %v2289_v51 = vpop.f32.mrf.mxu2 }
 0x1d5   : > { %2698 = vst.msk [vmem:[#allocation3 + $0x40] sm:$0xff] %vm497_vm13, %v2682_v43  ;;  %v2939_v33 = vadd.f32 %v2909_v19, %v2737_v49 }
 0x1d6   : > { %v2970_v53 = vld [vmem:[#allocation3 + $0x30] sm:$0xff]  ;;  %v2104_v40 = vpop.f32.mrf.mxu1 }
 0x1d7   : > { %2986 = vst.msk [vmem:[%s3550_s13 + $0x30] sm:$0xff] %vm497_vm13, %v2970_v53  ;;  %v2128_v39 = vadd.f32 %v2104_v40, %v1926_v54  ;;  %v2659_v59 = vpop.f32.mrf.mxu3 }
 0x1d8   : > { %2955 = vst.msk [vmem:[#allocation3 + $0x38] sm:$0xff] %vm497_vm13, %v2939_v33  ;;  %v2176_v62 = vld [vmem:[#allocation3 + $0x50] sm:$0xff] }
 0x1d9   : > { %v2314_v56 = vadd.f32 %v2289_v51, %v2176_v62  ;;  %2144 = vst.msk [vmem:[#allocation3 + $0x58] sm:$0xff] %vm497_vm13, %v2128_v39  ;;  %v2919_v19 = vpop.f32.mrf.mxu0 }
 0x1da   : > { %v2369_v63 = vld [vmem:[#allocation3 + $0x48] sm:$0xff] }
 0x1db   : > { %v2683_v55 = vadd.f32 %v2656_v37, %v2369_v63  ;;  %2330 = vst.msk [vmem:[#allocation3 + $0x50] sm:$0xff] %vm497_vm13, %v2314_v56 }
 0x1dc   : > { %v2738_v50 = vld [vmem:[#allocation3 + $0x40] sm:$0xff]  ;;  %v2291_v47 = vpop.f32.mrf.mxu2 }
 0x1dd   : > { %2699 = vst.msk [vmem:[#allocation3 + $0x48] sm:$0xff] %vm497_vm13, %v2683_v55  ;;  %v2940_v2 = vadd.f32 %v2912_v38, %v2738_v50 }
 0x1de   : > { %v2107_v3 = vpop.f32.mrf.mxu1 }
 0x1df   : > { %v2971_v6 = vld [vmem:[#allocation3 + $0x38] sm:$0xff]  ;;  %2956 = vst.msk [vmem:[#allocation3 + $0x40] sm:$0xff] %vm497_vm13, %v2940_v2  ;;  %v2129_v4 = vadd.f32 %v2107_v3, %v1927_v48  ;;  %v2661_v10 = vpop.f32.mrf.mxu3 }
 0x1e0   : > { %2987 = vst.msk [vmem:[%s3550_s13 + $0x38] sm:$0xff] %vm497_vm13, %v2971_v6  ;;  %v2177_v7 = vld [vmem:[#allocation3 + $0x58] sm:$0xff] }
 0x1e1   : > { %v2315_v8 = vadd.f32 %v2291_v47, %v2177_v7  ;;  %2145 = vst.msk [vmem:[#allocation3 + $0x60] sm:$0xff] %vm497_vm13, %v2129_v4  ;;  %v2922_v26 = vpop.f32.mrf.mxu0 }
 0x1e2   : > { %v2370_v12 = vld [vmem:[#allocation3 + $0x50] sm:$0xff] }
 0x1e3   : > { %v2684_v57 = vadd.f32 %v2659_v59, %v2370_v12  ;;  %2331 = vst.msk [vmem:[#allocation3 + $0x58] sm:$0xff] %vm497_vm13, %v2315_v8 }
 0x1e4   : > { %v2739_v13 = vld [vmem:[#allocation3 + $0x48] sm:$0xff]  ;;  %v2294_v14 = vpop.f32.mrf.mxu2 }
 0x1e5   : > { %2700 = vst.msk [vmem:[#allocation3 + $0x50] sm:$0xff] %vm497_vm13, %v2684_v57  ;;  %v2941_v60 = vadd.f32 %v2914_v44, %v2739_v13 }
 0x1e6   : > { %v2972_v15 = vld [vmem:[#allocation3 + $0x40] sm:$0xff]  ;;  %v2109_v16 = vpop.f32.mrf.mxu1 }
 0x1e7   : > { %2988 = vst.msk [vmem:[%s3550_s13 + $0x40] sm:$0xff] %vm497_vm13, %v2972_v15  ;;  %v2130_v21 = vadd.f32 %v2109_v16, %v1928_v0  ;;  %v2664_v52 = vpop.f32.mrf.mxu3 }
 0x1e8   : > { %2957 = vst.msk [vmem:[#allocation3 + $0x48] sm:$0xff] %vm497_vm13, %v2941_v60  ;;  %v2178_v11 = vld [vmem:[#allocation3 + $0x60] sm:$0xff] }
 0x1e9   : > { %v2316_v23 = vadd.f32 %v2294_v14, %v2178_v11  ;;  %2146 = vst.msk [vmem:[#allocation3 + $0x68] sm:$0xff] %vm497_vm13, %v2130_v21  ;;  %v2924_v33 = vpop.f32.mrf.mxu0 }
 0x1ea   : > { %v2371_v20 = vld [vmem:[#allocation3 + $0x58] sm:$0xff] }
 0x1eb   : > { %v2685_v61 = vadd.f32 %v2661_v10, %v2371_v20  ;;  %2332 = vst.msk [vmem:[#allocation3 + $0x60] sm:$0xff] %vm497_vm13, %v2316_v23 }
 0x1ec   : > { %v2740_v24 = vld [vmem:[#allocation3 + $0x50] sm:$0xff]  ;;  %v2296_v32 = vpop.f32.mrf.mxu2 }
 0x1ed   : > { %2701 = vst.msk [vmem:[#allocation3 + $0x58] sm:$0xff] %vm497_vm13, %v2685_v61  ;;  %v2942_v9 = vadd.f32 %v2917_v58, %v2740_v24 }
 0x1ee   : > { %v2112_v27 = vpop.f32.mrf.mxu1 }
 0x1ef   : > { %v2973_v28 = vld [vmem:[#allocation3 + $0x48] sm:$0xff]  ;;  %2958 = vst.msk [vmem:[#allocation3 + $0x50] sm:$0xff] %vm497_vm13, %v2942_v9  ;;  %v2131_v29 = vadd.f32 %v2112_v27, %v1929_v1  ;;  %v2666_v31 = vpop.f32.mrf.mxu3 }
 0x1f0   : > { %2989 = vst.msk [vmem:[%s3550_s13 + $0x48] sm:$0xff] %vm497_vm13, %v2973_v28  ;;  %v2179_v30 = vld [vmem:[#allocation3 + $0x68] sm:$0xff] }
 0x1f1   : > { %v2317_v17 = vadd.f32 %v2296_v32, %v2179_v30  ;;  %2147 = vst.msk [vmem:[#allocation3 + $0x70] sm:$0xff] %vm497_vm13, %v2131_v29  ;;  %v2927_v47 = vpop.f32.mrf.mxu0 }
 0x1f2   : > { %v2372_v34 = vld [vmem:[#allocation3 + $0x60] sm:$0xff] }
 0x1f3   : > { %v2686_v18 = vadd.f32 %v2664_v52, %v2372_v34  ;;  %2333 = vst.msk [vmem:[#allocation3 + $0x68] sm:$0xff] %vm497_vm13, %v2317_v17 }
 0x1f4   : > { %v2741_v22 = vld [vmem:[#allocation3 + $0x58] sm:$0xff]  ;;  %v2299_v38 = vpop.f32.mrf.mxu2 }
 0x1f5   : > { %2702 = vst.msk [vmem:[#allocation3 + $0x60] sm:$0xff] %vm497_vm13, %v2686_v18  ;;  %v2943_v36 = vadd.f32 %v2919_v19, %v2741_v22 }
 0x1f6   : > { %v2974_v37 = vld [vmem:[#allocation3 + $0x50] sm:$0xff]  ;;  %v2114_v42 = vpop.f32.mrf.mxu1 }
 0x1f7   : > { %2990 = vst.msk [vmem:[%s3550_s13 + $0x50] sm:$0xff] %vm497_vm13, %v2974_v37  ;;  %v2132_v5 = vadd.f32 %v2114_v42, %v1930_v41  ;;  %v2669_v53 = vpop.f32.mrf.mxu3 }
 0x1f8   : > { %2959 = vst.msk [vmem:[#allocation3 + $0x58] sm:$0xff] %vm497_vm13, %v2943_v36  ;;  %v2180_v25 = vld [vmem:[#allocation3 + $0x70] sm:$0xff] }
 0x1f9   : > { %v2318_v35 = vadd.f32 %v2299_v38, %v2180_v25  ;;  %2148 = vst.msk [vmem:[#allocation3 + $0x78] sm:$0xff] %vm497_vm13, %v2132_v5  ;;  %v2929_v7 = vpop.f32.mrf.mxu0 }
 0x1fa   : > { %v2373_v45 = vld [vmem:[#allocation3 + $0x68] sm:$0xff] }
 0x1fb   : > { %v2687_v46 = vadd.f32 %v2666_v31, %v2373_v45  ;;  %2334 = vst.msk [vmem:[#allocation3 + $0x70] sm:$0xff] %vm497_vm13, %v2318_v35 }
 0x1fc   : > { %v2742_v43 = vld [vmem:[#allocation3 + $0x60] sm:$0xff]  ;;  %v2301_v40 = vpop.f32.mrf.mxu2 }
 0x1fd   : > { %2703 = vst.msk [vmem:[#allocation3 + $0x68] sm:$0xff] %vm497_vm13, %v2687_v46  ;;  %v2944_v49 = vadd.f32 %v2922_v26, %v2742_v43 }
 0x1ff   : > { %v2975_v51 = vld [vmem:[#allocation3 + $0x58] sm:$0xff]  ;;  %2960 = vst.msk [vmem:[#allocation3 + $0x60] sm:$0xff] %vm497_vm13, %v2944_v49  ;;  %v2671_v50 = vpop.f32.mrf.mxu3 }
 0x200   : > { %2991 = vst.msk [vmem:[%s3550_s13 + $0x58] sm:$0xff] %vm497_vm13, %v2975_v51  ;;  %v2181_v54 = vld [vmem:[#allocation3 + $0x78] sm:$0xff] }
 0x201   : > { %v2319_v39 = vadd.f32 %v2301_v40, %v2181_v54 }
 0x202   : > { %v2374_v59 = vld [vmem:[#allocation3 + $0x70] sm:$0xff] }
 0x203   : > { %v2688_v44 = vadd.f32 %v2669_v53, %v2374_v59  ;;  %2335 = vst.msk [vmem:[#allocation3 + $0x78] sm:$0xff] %vm497_vm13, %v2319_v39 }
 0x204   : > { %v2743_v62 = vld [vmem:[#allocation3 + $0x68] sm:$0xff] }
 0x205   : > { %2704 = vst.msk [vmem:[#allocation3 + $0x70] sm:$0xff] %vm497_vm13, %v2688_v44  ;;  %v2945_v56 = vadd.f32 %v2924_v33, %v2743_v62 }
 0x206   : > { %v2976_v63 = vld [vmem:[#allocation3 + $0x60] sm:$0xff] }
 0x207   : > { %2992 = vst.msk [vmem:[%s3550_s13 + $0x60] sm:$0xff] %vm497_vm13, %v2976_v63 }
 0x208   : > { %2961 = vst.msk [vmem:[#allocation3 + $0x68] sm:$0xff] %vm497_vm13, %v2945_v56 }
 0x20a   : > { %v2375_v55 = vld [vmem:[#allocation3 + $0x78] sm:$0xff] }
 0x20b   : > { %v2689_v2 = vadd.f32 %v2671_v50, %v2375_v55 }
 0x20c   : > { %v2744_v48 = vld [vmem:[#allocation3 + $0x70] sm:$0xff] }
 0x20d   : > { %2705 = vst.msk [vmem:[#allocation3 + $0x78] sm:$0xff] %vm497_vm13, %v2689_v2  ;;  %v2946_v3 = vadd.f32 %v2927_v47, %v2744_v48 }
 0x20f   : > { %v2977_v6 = vld [vmem:[#allocation3 + $0x68] sm:$0xff]  ;;  %2962 = vst.msk [vmem:[#allocation3 + $0x70] sm:$0xff] %vm497_vm13, %v2946_v3 }
 0x210   : > { %2993 = vst.msk [vmem:[%s3550_s13 + $0x68] sm:$0xff] %vm497_vm13, %v2977_v6 }
 0x214   : > { %v2745_v4 = vld [vmem:[#allocation3 + $0x78] sm:$0xff] }
 0x215   : > { %v2947_v8 = vadd.f32 %v2929_v7, %v2745_v4 }
 0x216   : > { %v2978_v10 = vld [vmem:[#allocation3 + $0x70] sm:$0xff] }
 0x217   : > { %2994 = vst.msk [vmem:[%s3550_s13 + $0x70] sm:$0xff] %vm497_vm13, %v2978_v10 }
 0x218   : > { %2963 = vst.msk [vmem:[#allocation3 + $0x78] sm:$0xff] %vm497_vm13, %v2947_v8 }
 0x21f   : > { %v2979_v58 = vld [vmem:[#allocation3 + $0x78] sm:$0xff] }
 0x220   : > { %2995 = vst.msk [vmem:[%s3550_s13 + $0x78] sm:$0xff] %vm497_vm13, %v2979_v58 }
 0x221 PF: > { %s14_s19 = sadd.s32 1, %s3468_s19   ;;  %s4398_s15 = smov %s3460_s17 }
 0x222   : > { %p11_p9 = scmp.ge.s32.totalorder %s14_s19, 6   ;;  %s4399_s16 = smov %s3464_s18 }
 0x223   : > { %s4400_s17 = smov %s4403_s20  ;;  %s4401_s18 = smov %s4407_s21 }
 0x224   :  { %13 = sbr.rel (!%p11_p9) target bundleno = 3 (0x3), region = 86 }

</bundles_post_ra>
